<compile_context>
chip_gen: v5e
topology: v5e:2x2
jax: 0.10.0
libtpu: 0.0.40
codegen_flags: <defaults>
</compile_context>

<pallas_src>
import functools

import jax
import jax.numpy as jnp
from jax.experimental import pallas as pl
from jax.experimental.pallas import tpu as pltpu

FC_HIDDEN = 512  # nn.Linear(hidden_dim*seq_len, 512)


# ----------------------------- fused kernel ---------------------------------

def _lstm_gates(gates, c_prev, hidden_dim):
    """PyTorch LSTM cell update, gate order (i, f, g, o).

    EUP trick: with 4*H <= 128 the whole (B, 4H) gate tensor is one vreg row,
    so ONE sigmoid pass + ONE tanh pass over the full tensor replaces three
    sigmoids + one tanh on 32-lane sub-slices.  Transcendental cost is per-vreg,
    not per-element, and the EUP sits on the serial recurrence chain.
    """
    H = hidden_dim
    sig = jax.nn.sigmoid(gates)            # i | f | (unused) | o
    th = jnp.tanh(gates)                   # (unused x2) | g | (unused)
    i = sig[:, 0 * H:1 * H]
    f = sig[:, 1 * H:2 * H]
    g = th[:, 2 * H:3 * H]
    o = sig[:, 3 * H:4 * H]
    c_new = f * c_prev + i * g
    h_new = o * jnp.tanh(c_new)
    return h_new, c_new


def music_rnn_kernel(x_ref,
                     wih0_ref, whh0_ref, b0_ref,
                     wih1_ref, whh1_ref, b1_ref,
                     wih2_ref, whh2_ref, b2_ref,
                     fc1w_hbm, fc1b_ref, fc2w_hbm, fc2b_ref,
                     out_ref,
                     rnn_sc, fc1w_vm, fc2w_vm, dma_sem,
                     *, seq_len, batch, hidden_dim):
    """x_ref: (S*B, E) f32, out_ref: (B, vocab_pad) f32, rnn_sc: (S*B, H) f32."""
    H = hidden_dim
    B = batch
    S = seq_len

    # Kick off the head-weight DMAs immediately; they are the two largest
    # operands and their HBM->VMEM copy overlaps the serial LSTM recurrence.
    fc1_cp = pltpu.make_async_copy(fc1w_hbm, fc1w_vm, dma_sem.at[0])
    fc2_cp = pltpu.make_async_copy(fc2w_hbm, fc2w_vm, dma_sem.at[1])
    fc1_cp.start()
    fc2_cp.start()

    # Hoisted layer-0 input projection for ALL timesteps at once: one MXU push
    # of (S*B, E) @ (E, 4H) instead of S tiny ones; bias b0 folded in here.
    xw = jnp.dot(x_ref[...], wih0_ref[...],
                 preferred_element_type=jnp.float32) + b0_ref[...]       # (S*B, 4H)

    # Hoist recurrent weights / biases out of the unrolled time loop (JAX does
    # not CSE broadcast_in_dim, so broadcast the biases exactly once).
    whh0 = whh0_ref[...]
    wih1 = wih1_ref[...]
    whh1 = whh1_ref[...]
    wih2 = wih2_ref[...]
    whh2 = whh2_ref[...]
    b1 = jnp.broadcast_to(b1_ref[...], (B, 4 * H))
    b2 = jnp.broadcast_to(b2_ref[...], (B, 4 * H))

    zeros = jnp.zeros((B, H), jnp.float32)
    h0, c0, h1, c1, h2, c2 = zeros, zeros, zeros, zeros, zeros, zeros

    # TODO(synk): nn.Dropout(0.2) between LSTM layers is training-only; identity
    # (inference) semantics implemented here.
    # Static unroll (S is small); h/c state stays in vregs across steps.
    # TODO(synk): switch to lax.fori_loop(..., unroll=k) if seq_len grows.
    for t in range(S):
        # layer 0 — only the recurrent matmul remains on the serial path.
        g0 = xw[t * B:(t + 1) * B, :] + jnp.dot(
            h0, whh0, preferred_element_type=jnp.float32)
        h0, c0 = _lstm_gates(g0, c0, H)

        # layers 1 & 2 — two dots instead of a per-step lane concatenate; the
        # second dot overlaps the first dot's drain instead of serialising an
        # XLU concat before the MXU push.
        g1 = (jnp.dot(h0, wih1, preferred_element_type=jnp.float32)
              + jnp.dot(h1, whh1, preferred_element_type=jnp.float32) + b1)
        h1, c1 = _lstm_gates(g1, c1, H)

        g2 = (jnp.dot(h1, wih2, preferred_element_type=jnp.float32)
              + jnp.dot(h2, whh2, preferred_element_type=jnp.float32) + b2)
        h2, c2 = _lstm_gates(g2, c2, H)

        # One contiguous, lane-offset-0 store per step.  The flat bytes of this
        # (S*B, H) buffer are exactly PyTorch's contiguous (S, B, H) rnn_out.
        rnn_sc[t * B:(t + 1) * B, :] = h2

    # ---------------- MLP head (fused; rnn_out never leaves VMEM) -----------
    # PyTorch does rnn_out.view(batch, -1) @ fc1_w.  On the shared flat buffer:
    #   rnn_flat[i, q*H:(q+1)*H] == rnn_sc[i*S + q, :]
    # so fc1 decomposes into S accumulated (B, H) @ (H, 512) dots, where the
    # (B, H) operand is the stride-S sublane gather of rows {q, q+S, ...}.
    # This reproduces view(batch, -1) exactly without any in-kernel reshape.
    # TODO(synk): nn.Dropout(0.2) before fc1 is identity at inference.
    fc1_cp.wait()                                   # overlapped with the recurrence
    hid = jnp.broadcast_to(fc1b_ref[...], (B, FC_HIDDEN))
    for q in range(S):
        xq = rnn_sc[pl.ds(q, B, stride=S), :]                       # (B, H)
        hid = hid + jnp.dot(xq, fc1w_vm[q * H:(q + 1) * H, :],
                            preferred_element_type=jnp.float32)
    hid = jnp.where(hid > 0, hid, 0.01 * hid)                       # LeakyReLU(0.01)

    fc2_cp.wait()
    out_ref[...] = jnp.dot(hid, fc2w_vm[...],
                           preferred_element_type=jnp.float32) + fc2b_ref[...]


# ----------------------------- wrappers --------------------------------------

def init_params(key, embedding_dim, hidden_dim, unique_notes, seq_len):
    vocab = unique_notes + 1
    vocab_pad = ((vocab + 127) // 128) * 128
    k_rnn = 1.0 / float(hidden_dim) ** 0.5
    keys = jax.random.split(key, 20)
    ki = iter(range(20))

    def unif(k, shape, bound):
        return jax.random.uniform(k, shape, jnp.float32, -bound, bound)

    params = {"emb": jax.random.normal(keys[next(ki)], (vocab, embedding_dim),
                                       jnp.float32)}

    # LSTM layer 0 (input size E), layers 1 & 2 (input size H).  Weights stored
    # transposed (in_dim, 4H); b = b_ih + b_hh.  All f32 (keeps the recurrent
    # state bit-comparable to an f32 reference; the matmuls here are tiny).
    params["w_ih0"] = unif(keys[next(ki)], (embedding_dim, 4 * hidden_dim), k_rnn)
    params["w_hh0"] = unif(keys[next(ki)], (hidden_dim, 4 * hidden_dim), k_rnn)
    params["b0"] = (unif(keys[next(ki)], (1, 4 * hidden_dim), k_rnn)
                    + unif(keys[next(ki)], (1, 4 * hidden_dim), k_rnn))
    for layer in (1, 2):
        params[f"w_ih{layer}"] = unif(keys[next(ki)],
                                      (hidden_dim, 4 * hidden_dim), k_rnn)
        params[f"w_hh{layer}"] = unif(keys[next(ki)],
                                      (hidden_dim, 4 * hidden_dim), k_rnn)
        params[f"b{layer}"] = (unif(keys[next(ki)], (1, 4 * hidden_dim), k_rnn)
                               + unif(keys[next(ki)], (1, 4 * hidden_dim), k_rnn))

    fc_in = hidden_dim * seq_len
    k1 = 1.0 / float(fc_in) ** 0.5
    k2 = 1.0 / float(FC_HIDDEN) ** 0.5
    params["fc1_w"] = unif(keys[next(ki)], (fc_in, FC_HIDDEN), k1)        # transposed
    params["fc1_b"] = unif(keys[next(ki)], (1, FC_HIDDEN), k1)
    fc2_w = unif(keys[next(ki)], (FC_HIDDEN, vocab), k2)                  # transposed
    fc2_b = unif(keys[next(ki)], (1, vocab), k2)
    # Pad vocab -> multiple of 128 so the kernel's final store is lane-dense.
    params["fc2_w"] = jnp.pad(fc2_w, ((0, 0), (0, vocab_pad - vocab)))
    params["fc2_b"] = jnp.pad(fc2_b, ((0, 0), (0, vocab_pad - vocab)))
    return params


@functools.partial(jax.jit, static_argnames=("seq_len", "hidden_dim"))
def music_rnn_forward(params, x, *, seq_len, hidden_dim):
    batch = x.shape[0]
    vocab = params["emb"].shape[0]
    vocab_pad = params["fc2_w"].shape[1]

    # Embedding lookup (gather) — glue in plain JAX.
    # TODO(synk): fuse the gather into the kernel (scalar-prefetch ids + DMA row
    # gather) if seq_len / embedding_dim grow; negligible at these sizes.
    embeds = jnp.take(params["emb"], x, axis=0)                 # (B, S, E)
    # PyTorch `embeds.view(seq_len, batch, -1)`: row (t*B + b) of the raw flat
    # buffer is the LSTM's step-t, batch-b input — exactly this reshape.
    x_flat = embeds.reshape(seq_len * batch, -1)                # (S*B, E)

    kernel = functools.partial(music_rnn_kernel, seq_len=seq_len, batch=batch,
                               hidden_dim=hidden_dim)
    vmem_spec = pl.BlockSpec(memory_space=pltpu.MemorySpace.VMEM)
    hbm_spec = pl.BlockSpec(memory_space=pl.ANY)        # head weights: manual DMA

    out_pad = pl.pallas_call(
        kernel,
        out_shape=jax.ShapeDtypeStruct((batch, vocab_pad), jnp.float32),
        in_specs=[vmem_spec] * 10 + [hbm_spec, vmem_spec, hbm_spec, vmem_spec],
        out_specs=vmem_spec,
        scratch_shapes=[
            pltpu.VMEM((seq_len * batch, hidden_dim), jnp.float32),      # rnn_out
            pltpu.VMEM((seq_len * hidden_dim, FC_HIDDEN), jnp.float32),  # fc1_w stage
            pltpu.VMEM((FC_HIDDEN, vocab_pad), jnp.float32),             # fc2_w stage
            pltpu.SemaphoreType.DMA((2,)),
        ],
        # VMEM budget guard: total residency here is ~2 MiB; 32 MiB is safe on
        # v5e/v6e/v7x.  Tile fc1/fc2 with a grid before approaching this limit.
        compiler_params=pltpu.CompilerParams(vmem_limit_bytes=32 * 1024 * 1024),
    )(x_flat,
      params["w_ih0"], params["w_hh0"], params["b0"],
      params["w_ih1"], params["w_hh1"], params["b1"],
      params["w_ih2"], params["w_hh2"], params["b2"],
      params["fc1_w"], params["fc1_b"], params["fc2_w"], params["fc2_b"])

    return out_pad[:, :vocab]


if __name__ == "__main__":
    # TODO(synk): the GRU branch of the PyTorch module is not implemented
    # (default rnn='LSTM' is what this kernel reproduces).
    batch = 8                 # multiple of 8 fills the f32 sublanes (perf review)
    seq_len = 8
    embedding_dim = 32
    hidden_dim = 32           # 4H = 128 lanes -> one vreg row per gate tensor
    unique_notes = 64         # vocab = 65 (padded to 128 lanes internally)

    key = jax.random.PRNGKey(0)
    pkey, xkey = jax.random.split(key)
    params = init_params(pkey, embedding_dim, hidden_dim, unique_notes, seq_len)
    x = jax.random.randint(xkey, (batch, seq_len), 0, unique_notes + 1,
                           dtype=jnp.int32)

    out = music_rnn_forward(params, x, seq_len=seq_len, hidden_dim=hidden_dim)
    out = jax.block_until_ready(out)
    assert out.shape == (batch, unique_notes + 1), out.shape
    assert bool(jnp.all(jnp.isfinite(out)))
    print("KERNEL_OK")
</pallas_src>

<mosaic_0001>
module attributes {stable_mosaic.version = 11 : i64} {
  func.func @music_rnn_kernel(%arg0: memref<64x32xf32, #tpu.memory_space<vmem>>, %arg1: memref<32x128xf32, #tpu.memory_space<vmem>>, %arg2: memref<32x128xf32, #tpu.memory_space<vmem>>, %arg3: memref<1x128xf32, #tpu.memory_space<vmem>>, %arg4: memref<32x128xf32, #tpu.memory_space<vmem>>, %arg5: memref<32x128xf32, #tpu.memory_space<vmem>>, %arg6: memref<1x128xf32, #tpu.memory_space<vmem>>, %arg7: memref<32x128xf32, #tpu.memory_space<vmem>>, %arg8: memref<32x128xf32, #tpu.memory_space<vmem>>, %arg9: memref<1x128xf32, #tpu.memory_space<vmem>>, %arg10: memref<256x512xf32, #tpu.memory_space<any>>, %arg11: memref<1x512xf32, #tpu.memory_space<vmem>>, %arg12: memref<512x128xf32, #tpu.memory_space<any>>, %arg13: memref<1x128xf32, #tpu.memory_space<vmem>>, %arg14: memref<8x128xf32, #tpu.memory_space<vmem>>, %arg15: memref<64x32xf32, #tpu.memory_space<vmem>>, %arg16: memref<256x512xf32, #tpu.memory_space<vmem>>, %arg17: memref<512x128xf32, #tpu.memory_space<vmem>>, %arg18: memref<2x!tpu.dma_semaphore, #tpu.memory_space<semaphore_mem>>) attributes {dimension_semantics = [], scalar_prefetch = 0 : i64, scratch_operands = 4 : i64, tpu.core_type = #tpu.core_type<tc>} {
    %c0_i32 = arith.constant 0 : i32
    %0 = tpu.memref_slice %arg18[%c0_i32] : memref<2x!tpu.dma_semaphore, #tpu.memory_space<semaphore_mem>> -> memref<1x!tpu.dma_semaphore, #tpu.memory_space<semaphore_mem>>
    %1 = tpu.memref_squeeze %0 : memref<1x!tpu.dma_semaphore, #tpu.memory_space<semaphore_mem>> -> memref<!tpu.dma_semaphore, #tpu.memory_space<semaphore_mem>>
    tpu.enqueue_dma source(%arg10 : memref<256x512xf32, #tpu.memory_space<any>>) target(%arg16 : memref<256x512xf32, #tpu.memory_space<vmem>>) target_semaphore(%1 : memref<!tpu.dma_semaphore, #tpu.memory_space<semaphore_mem>>)
    %c1_i32 = arith.constant 1 : i32
    %2 = tpu.memref_slice %arg18[%c1_i32] : memref<2x!tpu.dma_semaphore, #tpu.memory_space<semaphore_mem>> -> memref<1x!tpu.dma_semaphore, #tpu.memory_space<semaphore_mem>>
    %3 = tpu.memref_squeeze %2 : memref<1x!tpu.dma_semaphore, #tpu.memory_space<semaphore_mem>> -> memref<!tpu.dma_semaphore, #tpu.memory_space<semaphore_mem>>
    tpu.enqueue_dma source(%arg12 : memref<512x128xf32, #tpu.memory_space<any>>) target(%arg17 : memref<512x128xf32, #tpu.memory_space<vmem>>) target_semaphore(%3 : memref<!tpu.dma_semaphore, #tpu.memory_space<semaphore_mem>>)
    %c0 = arith.constant 0 : index
    %c0_0 = arith.constant 0 : index
    %4 = vector.load %arg0[%c0, %c0_0] : memref<64x32xf32, #tpu.memory_space<vmem>>, vector<64x32xf32>
    %c0_1 = arith.constant 0 : index
    %c0_2 = arith.constant 0 : index
    %5 = vector.load %arg1[%c0_1, %c0_2] : memref<32x128xf32, #tpu.memory_space<vmem>>, vector<32x128xf32>
    %cst = arith.constant dense<0.000000e+00> : vector<64x128xf32>
    %6 = tpu.matmul %4, %5, %cst {dimension_numbers = #tpu.dot_dimension_numbers<[1], [0], [0], [1], [0, 0, 1, 1], [], []>} : vector<64x32xf32>, vector<32x128xf32>, vector<64x128xf32> -> vector<64x128xf32>
    %c0_3 = arith.constant 0 : index
    %c0_4 = arith.constant 0 : index
    %7 = vector.load %arg3[%c0_3, %c0_4] : memref<1x128xf32, #tpu.memory_space<vmem>>, vector<1x128xf32>
    %8 = vector.broadcast %7 : vector<1x128xf32> to vector<64x128xf32>
    %9 = arith.addf %6, %8 : vector<64x128xf32>
    %c0_5 = arith.constant 0 : index
    %c0_6 = arith.constant 0 : index
    %10 = vector.load %arg2[%c0_5, %c0_6] : memref<32x128xf32, #tpu.memory_space<vmem>>, vector<32x128xf32>
    %c0_7 = arith.constant 0 : index
    %c0_8 = arith.constant 0 : index
    %11 = vector.load %arg4[%c0_7, %c0_8] : memref<32x128xf32, #tpu.memory_space<vmem>>, vector<32x128xf32>
    %c0_9 = arith.constant 0 : index
    %c0_10 = arith.constant 0 : index
    %12 = vector.load %arg5[%c0_9, %c0_10] : memref<32x128xf32, #tpu.memory_space<vmem>>, vector<32x128xf32>
    %c0_11 = arith.constant 0 : index
    %c0_12 = arith.constant 0 : index
    %13 = vector.load %arg7[%c0_11, %c0_12] : memref<32x128xf32, #tpu.memory_space<vmem>>, vector<32x128xf32>
    %c0_13 = arith.constant 0 : index
    %c0_14 = arith.constant 0 : index
    %14 = vector.load %arg8[%c0_13, %c0_14] : memref<32x128xf32, #tpu.memory_space<vmem>>, vector<32x128xf32>
    %c0_15 = arith.constant 0 : index
    %c0_16 = arith.constant 0 : index
    %15 = vector.load %arg6[%c0_15, %c0_16] : memref<1x128xf32, #tpu.memory_space<vmem>>, vector<1x128xf32>
    %16 = vector.shape_cast %15 : vector<1x128xf32> to vector<1x128xf32>
    %17 = vector.broadcast %16 : vector<1x128xf32> to vector<8x128xf32>
    %c0_17 = arith.constant 0 : index
    %c0_18 = arith.constant 0 : index
    %18 = vector.load %arg9[%c0_17, %c0_18] : memref<1x128xf32, #tpu.memory_space<vmem>>, vector<1x128xf32>
    %19 = vector.shape_cast %18 : vector<1x128xf32> to vector<1x128xf32>
    %20 = vector.broadcast %19 : vector<1x128xf32> to vector<8x128xf32>
    %cst_19 = arith.constant 0.000000e+00 : f32
    %21 = vector.broadcast %cst_19 : f32 to vector<8x32xf32>
    %22 = vector.extract_strided_slice %9 {offsets = [0, 0], sizes = [8, 128], strides = [1, 1]} : vector<64x128xf32> to vector<8x128xf32>
    %cst_20 = arith.constant dense<0.000000e+00> : vector<8x128xf32>
    %23 = tpu.matmul %21, %10, %cst_20 {dimension_numbers = #tpu.dot_dimension_numbers<[1], [0], [0], [1], [0, 0, 1, 1], [], []>} : vector<8x32xf32>, vector<32x128xf32>, vector<8x128xf32> -> vector<8x128xf32>
    %24 = arith.addf %22, %23 : vector<8x128xf32>
    %25 = arith.negf %24 : vector<8x128xf32>
    %26 = math.exp %25 : vector<8x128xf32>
    %cst_21 = arith.constant 1.000000e+00 : f32
    %27 = vector.broadcast %cst_21 : f32 to vector<8x128xf32>
    %28 = arith.addf %27, %26 : vector<8x128xf32>
    %29 = arith.divf %27, %28 : vector<8x128xf32>
    %30 = math.tanh %24 : vector<8x128xf32>
    %31 = vector.extract_strided_slice %29 {offsets = [0, 0], sizes = [8, 32], strides = [1, 1]} : vector<8x128xf32> to vector<8x32xf32>
    %32 = vector.extract_strided_slice %29 {offsets = [0, 32], sizes = [8, 32], strides = [1, 1]} : vector<8x128xf32> to vector<8x32xf32>
    %33 = vector.extract_strided_slice %30 {offsets = [0, 64], sizes = [8, 32], strides = [1, 1]} : vector<8x128xf32> to vector<8x32xf32>
    %34 = vector.extract_strided_slice %29 {offsets = [0, 96], sizes = [8, 32], strides = [1, 1]} : vector<8x128xf32> to vector<8x32xf32>
    %35 = arith.mulf %32, %21 : vector<8x32xf32>
    %36 = arith.mulf %31, %33 : vector<8x32xf32>
    %37 = arith.addf %35, %36 : vector<8x32xf32>
    %38 = math.tanh %37 : vector<8x32xf32>
    %39 = arith.mulf %34, %38 : vector<8x32xf32>
    %cst_22 = arith.constant dense<0.000000e+00> : vector<8x128xf32>
    %40 = tpu.matmul %39, %11, %cst_22 {dimension_numbers = #tpu.dot_dimension_numbers<[1], [0], [0], [1], [0, 0, 1, 1], [], []>} : vector<8x32xf32>, vector<32x128xf32>, vector<8x128xf32> -> vector<8x128xf32>
    %cst_23 = arith.constant dense<0.000000e+00> : vector<8x128xf32>
    %41 = tpu.matmul %21, %12, %cst_23 {dimension_numbers = #tpu.dot_dimension_numbers<[1], [0], [0], [1], [0, 0, 1, 1], [], []>} : vector<8x32xf32>, vector<32x128xf32>, vector<8x128xf32> -> vector<8x128xf32>
    %42 = arith.addf %40, %41 : vector<8x128xf32>
    %43 = arith.addf %42, %17 : vector<8x128xf32>
    %44 = arith.negf %43 : vector<8x128xf32>
    %45 = math.exp %44 : vector<8x128xf32>
    %cst_24 = arith.constant 1.000000e+00 : f32
    %46 = vector.broadcast %cst_24 : f32 to vector<8x128xf32>
    %47 = arith.addf %46, %45 : vector<8x128xf32>
    %48 = arith.divf %46, %47 : vector<8x128xf32>
    %49 = math.tanh %43 : vector<8x128xf32>
    %50 = vector.extract_strided_slice %48 {offsets = [0, 0], sizes = [8, 32], strides = [1, 1]} : vector<8x128xf32> to vector<8x32xf32>
    %51 = vector.extract_strided_slice %48 {offsets = [0, 32], sizes = [8, 32], strides = [1, 1]} : vector<8x128xf32> to vector<8x32xf32>
    %52 = vector.extract_strided_slice %49 {offsets = [0, 64], sizes = [8, 32], strides = [1, 1]} : vector<8x128xf32> to vector<8x32xf32>
    %53 = vector.extract_strided_slice %48 {offsets = [0, 96], sizes = [8, 32], strides = [1, 1]} : vector<8x128xf32> to vector<8x32xf32>
    %54 = arith.mulf %51, %21 : vector<8x32xf32>
    %55 = arith.mulf %50, %52 : vector<8x32xf32>
    %56 = arith.addf %54, %55 : vector<8x32xf32>
    %57 = math.tanh %56 : vector<8x32xf32>
    %58 = arith.mulf %53, %57 : vector<8x32xf32>
    %cst_25 = arith.constant dense<0.000000e+00> : vector<8x128xf32>
    %59 = tpu.matmul %58, %13, %cst_25 {dimension_numbers = #tpu.dot_dimension_numbers<[1], [0], [0], [1], [0, 0, 1, 1], [], []>} : vector<8x32xf32>, vector<32x128xf32>, vector<8x128xf32> -> vector<8x128xf32>
    %cst_26 = arith.constant dense<0.000000e+00> : vector<8x128xf32>
    %60 = tpu.matmul %21, %14, %cst_26 {dimension_numbers = #tpu.dot_dimension_numbers<[1], [0], [0], [1], [0, 0, 1, 1], [], []>} : vector<8x32xf32>, vector<32x128xf32>, vector<8x128xf32> -> vector<8x128xf32>
    %61 = arith.addf %59, %60 : vector<8x128xf32>
    %62 = arith.addf %61, %20 : vector<8x128xf32>
    %63 = arith.negf %62 : vector<8x128xf32>
    %64 = math.exp %63 : vector<8x128xf32>
    %cst_27 = arith.constant 1.000000e+00 : f32
    %65 = vector.broadcast %cst_27 : f32 to vector<8x128xf32>
    %66 = arith.addf %65, %64 : vector<8x128xf32>
    %67 = arith.divf %65, %66 : vector<8x128xf32>
    %68 = math.tanh %62 : vector<8x128xf32>
    %69 = vector.extract_strided_slice %67 {offsets = [0, 0], sizes = [8, 32], strides = [1, 1]} : vector<8x128xf32> to vector<8x32xf32>
    %70 = vector.extract_strided_slice %67 {offsets = [0, 32], sizes = [8, 32], strides = [1, 1]} : vector<8x128xf32> to vector<8x32xf32>
    %71 = vector.extract_strided_slice %68 {offsets = [0, 64], sizes = [8, 32], strides = [1, 1]} : vector<8x128xf32> to vector<8x32xf32>
    %72 = vector.extract_strided_slice %67 {offsets = [0, 96], sizes = [8, 32], strides = [1, 1]} : vector<8x128xf32> to vector<8x32xf32>
    %73 = arith.mulf %70, %21 : vector<8x32xf32>
    %74 = arith.mulf %69, %71 : vector<8x32xf32>
    %75 = arith.addf %73, %74 : vector<8x32xf32>
    %76 = math.tanh %75 : vector<8x32xf32>
    %77 = arith.mulf %72, %76 : vector<8x32xf32>
    %c0_28 = arith.constant 0 : index
    %c0_29 = arith.constant 0 : index
    %78 = vector.load %arg15[%c0_28, %c0_29] : memref<64x32xf32, #tpu.memory_space<vmem>>, vector<8x32xf32>
    tpu.vector_store %arg15[%c0_28, %c0_29], %77 {strides = array<i32>} : memref<64x32xf32, #tpu.memory_space<vmem>>, vector<8x32xf32>,
    %79 = vector.extract_strided_slice %9 {offsets = [8, 0], sizes = [8, 128], strides = [1, 1]} : vector<64x128xf32> to vector<8x128xf32>
    %cst_30 = arith.constant dense<0.000000e+00> : vector<8x128xf32>
    %80 = tpu.matmul %39, %10, %cst_30 {dimension_numbers = #tpu.dot_dimension_numbers<[1], [0], [0], [1], [0, 0, 1, 1], [], []>} : vector<8x32xf32>, vector<32x128xf32>, vector<8x128xf32> -> vector<8x128xf32>
    %81 = arith.addf %79, %80 : vector<8x128xf32>
    %82 = arith.negf %81 : vector<8x128xf32>
    %83 = math.exp %82 : vector<8x128xf32>
    %cst_31 = arith.constant 1.000000e+00 : f32
    %84 = vector.broadcast %cst_31 : f32 to vector<8x128xf32>
    %85 = arith.addf %84, %83 : vector<8x128xf32>
    %86 = arith.divf %84, %85 : vector<8x128xf32>
    %87 = math.tanh %81 : vector<8x128xf32>
    %88 = vector.extract_strided_slice %86 {offsets = [0, 0], sizes = [8, 32], strides = [1, 1]} : vector<8x128xf32> to vector<8x32xf32>
    %89 = vector.extract_strided_slice %86 {offsets = [0, 32], sizes = [8, 32], strides = [1, 1]} : vector<8x128xf32> to vector<8x32xf32>
    %90 = vector.extract_strided_slice %87 {offsets = [0, 64], sizes = [8, 32], strides = [1, 1]} : vector<8x128xf32> to vector<8x32xf32>
    %91 = vector.extract_strided_slice %86 {offsets = [0, 96], sizes = [8, 32], strides = [1, 1]} : vector<8x128xf32> to vector<8x32xf32>
    %92 = arith.mulf %89, %37 : vector<8x32xf32>
    %93 = arith.mulf %88, %90 : vector<8x32xf32>
    %94 = arith.addf %92, %93 : vector<8x32xf32>
    %95 = math.tanh %94 : vector<8x32xf32>
    %96 = arith.mulf %91, %95 : vector<8x32xf32>
    %cst_32 = arith.constant dense<0.000000e+00> : vector<8x128xf32>
    %97 = tpu.matmul %96, %11, %cst_32 {dimension_numbers = #tpu.dot_dimension_numbers<[1], [0], [0], [1], [0, 0, 1, 1], [], []>} : vector<8x32xf32>, vector<32x128xf32>, vector<8x128xf32> -> vector<8x128xf32>
    %cst_33 = arith.constant dense<0.000000e+00> : vector<8x128xf32>
    %98 = tpu.matmul %58, %12, %cst_33 {dimension_numbers = #tpu.dot_dimension_numbers<[1], [0], [0], [1], [0, 0, 1, 1], [], []>} : vector<8x32xf32>, vector<32x128xf32>, vector<8x128xf32> -> vector<8x128xf32>
    %99 = arith.addf %97, %98 : vector<8x128xf32>
    %100 = arith.addf %99, %17 : vector<8x128xf32>
    %101 = arith.negf %100 : vector<8x128xf32>
    %102 = math.exp %101 : vector<8x128xf32>
    %cst_34 = arith.constant 1.000000e+00 : f32
    %103 = vector.broadcast %cst_34 : f32 to vector<8x128xf32>
    %104 = arith.addf %103, %102 : vector<8x128xf32>
    %105 = arith.divf %103, %104 : vector<8x128xf32>
    %106 = math.tanh %100 : vector<8x128xf32>
    %107 = vector.extract_strided_slice %105 {offsets = [0, 0], sizes = [8, 32], strides = [1, 1]} : vector<8x128xf32> to vector<8x32xf32>
    %108 = vector.extract_strided_slice %105 {offsets = [0, 32], sizes = [8, 32], strides = [1, 1]} : vector<8x128xf32> to vector<8x32xf32>
    %109 = vector.extract_strided_slice %106 {offsets = [0, 64], sizes = [8, 32], strides = [1, 1]} : vector<8x128xf32> to vector<8x32xf32>
    %110 = vector.extract_strided_slice %105 {offsets = [0, 96], sizes = [8, 32], strides = [1, 1]} : vector<8x128xf32> to vector<8x32xf32>
    %111 = arith.mulf %108, %56 : vector<8x32xf32>
    %112 = arith.mulf %107, %109 : vector<8x32xf32>
    %113 = arith.addf %111, %112 : vector<8x32xf32>
    %114 = math.tanh %113 : vector<8x32xf32>
    %115 = arith.mulf %110, %114 : vector<8x32xf32>
    %cst_35 = arith.constant dense<0.000000e+00> : vector<8x128xf32>
    %116 = tpu.matmul %115, %13, %cst_35 {dimension_numbers = #tpu.dot_dimension_numbers<[1], [0], [0], [1], [0, 0, 1, 1], [], []>} : vector<8x32xf32>, vector<32x128xf32>, vector<8x128xf32> -> vector<8x128xf32>
    %cst_36 = arith.constant dense<0.000000e+00> : vector<8x128xf32>
    %117 = tpu.matmul %77, %14, %cst_36 {dimension_numbers = #tpu.dot_dimension_numbers<[1], [0], [0], [1], [0, 0, 1, 1], [], []>} : vector<8x32xf32>, vector<32x128xf32>, vector<8x128xf32> -> vector<8x128xf32>
    %118 = arith.addf %116, %117 : vector<8x128xf32>
    %119 = arith.addf %118, %20 : vector<8x128xf32>
    %120 = arith.negf %119 : vector<8x128xf32>
    %121 = math.exp %120 : vector<8x128xf32>
    %cst_37 = arith.constant 1.000000e+00 : f32
    %122 = vector.broadcast %cst_37 : f32 to vector<8x128xf32>
    %123 = arith.addf %122, %121 : vector<8x128xf32>
    %124 = arith.divf %122, %123 : vector<8x128xf32>
    %125 = math.tanh %119 : vector<8x128xf32>
    %126 = vector.extract_strided_slice %124 {offsets = [0, 0], sizes = [8, 32], strides = [1, 1]} : vector<8x128xf32> to vector<8x32xf32>
    %127 = vector.extract_strided_slice %124 {offsets = [0, 32], sizes = [8, 32], strides = [1, 1]} : vector<8x128xf32> to vector<8x32xf32>
    %128 = vector.extract_strided_slice %125 {offsets = [0, 64], sizes = [8, 32], strides = [1, 1]} : vector<8x128xf32> to vector<8x32xf32>
    %129 = vector.extract_strided_slice %124 {offsets = [0, 96], sizes = [8, 32], strides = [1, 1]} : vector<8x128xf32> to vector<8x32xf32>
    %130 = arith.mulf %127, %75 : vector<8x32xf32>
    %131 = arith.mulf %126, %128 : vector<8x32xf32>
    %132 = arith.addf %130, %131 : vector<8x32xf32>
    %133 = math.tanh %132 : vector<8x32xf32>
    %134 = arith.mulf %129, %133 : vector<8x32xf32>
    %c8 = arith.constant 8 : index
    %c0_38 = arith.constant 0 : index
    %135 = vector.load %arg15[%c8, %c0_38] : memref<64x32xf32, #tpu.memory_space<vmem>>, vector<8x32xf32>
    tpu.vector_store %arg15[%c8, %c0_38], %134 {strides = array<i32>} : memref<64x32xf32, #tpu.memory_space<vmem>>, vector<8x32xf32>,
    %136 = vector.extract_strided_slice %9 {offsets = [16, 0], sizes = [8, 128], strides = [1, 1]} : vector<64x128xf32> to vector<8x128xf32>
    %cst_39 = arith.constant dense<0.000000e+00> : vector<8x128xf32>
    %137 = tpu.matmul %96, %10, %cst_39 {dimension_numbers = #tpu.dot_dimension_numbers<[1], [0], [0], [1], [0, 0, 1, 1], [], []>} : vector<8x32xf32>, vector<32x128xf32>, vector<8x128xf32> -> vector<8x128xf32>
    %138 = arith.addf %136, %137 : vector<8x128xf32>
    %139 = arith.negf %138 : vector<8x128xf32>
    %140 = math.exp %139 : vector<8x128xf32>
    %cst_40 = arith.constant 1.000000e+00 : f32
    %141 = vector.broadcast %cst_40 : f32 to vector<8x128xf32>
    %142 = arith.addf %141, %140 : vector<8x128xf32>
    %143 = arith.divf %141, %142 : vector<8x128xf32>
    %144 = math.tanh %138 : vector<8x128xf32>
    %145 = vector.extract_strided_slice %143 {offsets = [0, 0], sizes = [8, 32], strides = [1, 1]} : vector<8x128xf32> to vector<8x32xf32>
    %146 = vector.extract_strided_slice %143 {offsets = [0, 32], sizes = [8, 32], strides = [1, 1]} : vector<8x128xf32> to vector<8x32xf32>
    %147 = vector.extract_strided_slice %144 {offsets = [0, 64], sizes = [8, 32], strides = [1, 1]} : vector<8x128xf32> to vector<8x32xf32>
    %148 = vector.extract_strided_slice %143 {offsets = [0, 96], sizes = [8, 32], strides = [1, 1]} : vector<8x128xf32> to vector<8x32xf32>
    %149 = arith.mulf %146, %94 : vector<8x32xf32>
    %150 = arith.mulf %145, %147 : vector<8x32xf32>
    %151 = arith.addf %149, %150 : vector<8x32xf32>
    %152 = math.tanh %151 : vector<8x32xf32>
    %153 = arith.mulf %148, %152 : vector<8x32xf32>
    %cst_41 = arith.constant dense<0.000000e+00> : vector<8x128xf32>
    %154 = tpu.matmul %153, %11, %cst_41 {dimension_numbers = #tpu.dot_dimension_numbers<[1], [0], [0], [1], [0, 0, 1, 1], [], []>} : vector<8x32xf32>, vector<32x128xf32>, vector<8x128xf32> -> vector<8x128xf32>
    %cst_42 = arith.constant dense<0.000000e+00> : vector<8x128xf32>
    %155 = tpu.matmul %115, %12, %cst_42 {dimension_numbers = #tpu.dot_dimension_numbers<[1], [0], [0], [1], [0, 0, 1, 1], [], []>} : vector<8x32xf32>, vector<32x128xf32>, vector<8x128xf32> -> vector<8x128xf32>
    %156 = arith.addf %154, %155 : vector<8x128xf32>
    %157 = arith.addf %156, %17 : vector<8x128xf32>
    %158 = arith.negf %157 : vector<8x128xf32>
    %159 = math.exp %158 : vector<8x128xf32>
    %cst_43 = arith.constant 1.000000e+00 : f32
    %160 = vector.broadcast %cst_43 : f32 to vector<8x128xf32>
    %161 = arith.addf %160, %159 : vector<8x128xf32>
    %162 = arith.divf %160, %161 : vector<8x128xf32>
    %163 = math.tanh %157 : vector<8x128xf32>
    %164 = vector.extract_strided_slice %162 {offsets = [0, 0], sizes = [8, 32], strides = [1, 1]} : vector<8x128xf32> to vector<8x32xf32>
    %165 = vector.extract_strided_slice %162 {offsets = [0, 32], sizes = [8, 32], strides = [1, 1]} : vector<8x128xf32> to vector<8x32xf32>
    %166 = vector.extract_strided_slice %163 {offsets = [0, 64], sizes = [8, 32], strides = [1, 1]} : vector<8x128xf32> to vector<8x32xf32>
    %167 = vector.extract_strided_slice %162 {offsets = [0, 96], sizes = [8, 32], strides = [1, 1]} : vector<8x128xf32> to vector<8x32xf32>
    %168 = arith.mulf %165, %113 : vector<8x32xf32>
    %169 = arith.mulf %164, %166 : vector<8x32xf32>
    %170 = arith.addf %168, %169 : vector<8x32xf32>
    %171 = math.tanh %170 : vector<8x32xf32>
    %172 = arith.mulf %167, %171 : vector<8x32xf32>
    %cst_44 = arith.constant dense<0.000000e+00> : vector<8x128xf32>
    %173 = tpu.matmul %172, %13, %cst_44 {dimension_numbers = #tpu.dot_dimension_numbers<[1], [0], [0], [1], [0, 0, 1, 1], [], []>} : vector<8x32xf32>, vector<32x128xf32>, vector<8x128xf32> -> vector<8x128xf32>
    %cst_45 = arith.constant dense<0.000000e+00> : vector<8x128xf32>
    %174 = tpu.matmul %134, %14, %cst_45 {dimension_numbers = #tpu.dot_dimension_numbers<[1], [0], [0], [1], [0, 0, 1, 1], [], []>} : vector<8x32xf32>, vector<32x128xf32>, vector<8x128xf32> -> vector<8x128xf32>
    %175 = arith.addf %173, %174 : vector<8x128xf32>
    %176 = arith.addf %175, %20 : vector<8x128xf32>
    %177 = arith.negf %176 : vector<8x128xf32>
    %178 = math.exp %177 : vector<8x128xf32>
    %cst_46 = arith.constant 1.000000e+00 : f32
    %179 = vector.broadcast %cst_46 : f32 to vector<8x128xf32>
    %180 = arith.addf %179, %178 : vector<8x128xf32>
    %181 = arith.divf %179, %180 : vector<8x128xf32>
    %182 = math.tanh %176 : vector<8x128xf32>
    %183 = vector.extract_strided_slice %181 {offsets = [0, 0], sizes = [8, 32], strides = [1, 1]} : vector<8x128xf32> to vector<8x32xf32>
    %184 = vector.extract_strided_slice %181 {offsets = [0, 32], sizes = [8, 32], strides = [1, 1]} : vector<8x128xf32> to vector<8x32xf32>
    %185 = vector.extract_strided_slice %182 {offsets = [0, 64], sizes = [8, 32], strides = [1, 1]} : vector<8x128xf32> to vector<8x32xf32>
    %186 = vector.extract_strided_slice %181 {offsets = [0, 96], sizes = [8, 32], strides = [1, 1]} : vector<8x128xf32> to vector<8x32xf32>
    %187 = arith.mulf %184, %132 : vector<8x32xf32>
    %188 = arith.mulf %183, %185 : vector<8x32xf32>
    %189 = arith.addf %187, %188 : vector<8x32xf32>
    %190 = math.tanh %189 : vector<8x32xf32>
    %191 = arith.mulf %186, %190 : vector<8x32xf32>
    %c16 = arith.constant 16 : index
    %c0_47 = arith.constant 0 : index
    %192 = vector.load %arg15[%c16, %c0_47] : memref<64x32xf32, #tpu.memory_space<vmem>>, vector<8x32xf32>
    tpu.vector_store %arg15[%c16, %c0_47], %191 {strides = array<i32>} : memref<64x32xf32, #tpu.memory_space<vmem>>, vector<8x32xf32>,
    %193 = vector.extract_strided_slice %9 {offsets = [24, 0], sizes = [8, 128], strides = [1, 1]} : vector<64x128xf32> to vector<8x128xf32>
    %cst_48 = arith.constant dense<0.000000e+00> : vector<8x128xf32>
    %194 = tpu.matmul %153, %10, %cst_48 {dimension_numbers = #tpu.dot_dimension_numbers<[1], [0], [0], [1], [0, 0, 1, 1], [], []>} : vector<8x32xf32>, vector<32x128xf32>, vector<8x128xf32> -> vector<8x128xf32>
    %195 = arith.addf %193, %194 : vector<8x128xf32>
    %196 = arith.negf %195 : vector<8x128xf32>
    %197 = math.exp %196 : vector<8x128xf32>
    %cst_49 = arith.constant 1.000000e+00 : f32
    %198 = vector.broadcast %cst_49 : f32 to vector<8x128xf32>
    %199 = arith.addf %198, %197 : vector<8x128xf32>
    %200 = arith.divf %198, %199 : vector<8x128xf32>
    %201 = math.tanh %195 : vector<8x128xf32>
    %202 = vector.extract_strided_slice %200 {offsets = [0, 0], sizes = [8, 32], strides = [1, 1]} : vector<8x128xf32> to vector<8x32xf32>
    %203 = vector.extract_strided_slice %200 {offsets = [0, 32], sizes = [8, 32], strides = [1, 1]} : vector<8x128xf32> to vector<8x32xf32>
    %204 = vector.extract_strided_slice %201 {offsets = [0, 64], sizes = [8, 32], strides = [1, 1]} : vector<8x128xf32> to vector<8x32xf32>
    %205 = vector.extract_strided_slice %200 {offsets = [0, 96], sizes = [8, 32], strides = [1, 1]} : vector<8x128xf32> to vector<8x32xf32>
    %206 = arith.mulf %203, %151 : vector<8x32xf32>
    %207 = arith.mulf %202, %204 : vector<8x32xf32>
    %208 = arith.addf %206, %207 : vector<8x32xf32>
    %209 = math.tanh %208 : vector<8x32xf32>
    %210 = arith.mulf %205, %209 : vector<8x32xf32>
    %cst_50 = arith.constant dense<0.000000e+00> : vector<8x128xf32>
    %211 = tpu.matmul %210, %11, %cst_50 {dimension_numbers = #tpu.dot_dimension_numbers<[1], [0], [0], [1], [0, 0, 1, 1], [], []>} : vector<8x32xf32>, vector<32x128xf32>, vector<8x128xf32> -> vector<8x128xf32>
    %cst_51 = arith.constant dense<0.000000e+00> : vector<8x128xf32>
    %212 = tpu.matmul %172, %12, %cst_51 {dimension_numbers = #tpu.dot_dimension_numbers<[1], [0], [0], [1], [0, 0, 1, 1], [], []>} : vector<8x32xf32>, vector<32x128xf32>, vector<8x128xf32> -> vector<8x128xf32>
    %213 = arith.addf %211, %212 : vector<8x128xf32>
    %214 = arith.addf %213, %17 : vector<8x128xf32>
    %215 = arith.negf %214 : vector<8x128xf32>
    %216 = math.exp %215 : vector<8x128xf32>
    %cst_52 = arith.constant 1.000000e+00 : f32
    %217 = vector.broadcast %cst_52 : f32 to vector<8x128xf32>
    %218 = arith.addf %217, %216 : vector<8x128xf32>
    %219 = arith.divf %217, %218 : vector<8x128xf32>
    %220 = math.tanh %214 : vector<8x128xf32>
    %221 = vector.extract_strided_slice %219 {offsets = [0, 0], sizes = [8, 32], strides = [1, 1]} : vector<8x128xf32> to vector<8x32xf32>
    %222 = vector.extract_strided_slice %219 {offsets = [0, 32], sizes = [8, 32], strides = [1, 1]} : vector<8x128xf32> to vector<8x32xf32>
    %223 = vector.extract_strided_slice %220 {offsets = [0, 64], sizes = [8, 32], strides = [1, 1]} : vector<8x128xf32> to vector<8x32xf32>
    %224 = vector.extract_strided_slice %219 {offsets = [0, 96], sizes = [8, 32], strides = [1, 1]} : vector<8x128xf32> to vector<8x32xf32>
    %225 = arith.mulf %222, %170 : vector<8x32xf32>
    %226 = arith.mulf %221, %223 : vector<8x32xf32>
    %227 = arith.addf %225, %226 : vector<8x32xf32>
    %228 = math.tanh %227 : vector<8x32xf32>
    %229 = arith.mulf %224, %228 : vector<8x32xf32>
    %cst_53 = arith.constant dense<0.000000e+00> : vector<8x128xf32>
    %230 = tpu.matmul %229, %13, %cst_53 {dimension_numbers = #tpu.dot_dimension_numbers<[1], [0], [0], [1], [0, 0, 1, 1], [], []>} : vector<8x32xf32>, vector<32x128xf32>, vector<8x128xf32> -> vector<8x128xf32>
    %cst_54 = arith.constant dense<0.000000e+00> : vector<8x128xf32>
    %231 = tpu.matmul %191, %14, %cst_54 {dimension_numbers = #tpu.dot_dimension_numbers<[1], [0], [0], [1], [0, 0, 1, 1], [], []>} : vector<8x32xf32>, vector<32x128xf32>, vector<8x128xf32> -> vector<8x128xf32>
    %232 = arith.addf %230, %231 : vector<8x128xf32>
    %233 = arith.addf %232, %20 : vector<8x128xf32>
    %234 = arith.negf %233 : vector<8x128xf32>
    %235 = math.exp %234 : vector<8x128xf32>
    %cst_55 = arith.constant 1.000000e+00 : f32
    %236 = vector.broadcast %cst_55 : f32 to vector<8x128xf32>
    %237 = arith.addf %236, %235 : vector<8x128xf32>
    %238 = arith.divf %236, %237 : vector<8x128xf32>
    %239 = math.tanh %233 : vector<8x128xf32>
    %240 = vector.extract_strided_slice %238 {offsets = [0, 0], sizes = [8, 32], strides = [1, 1]} : vector<8x128xf32> to vector<8x32xf32>
    %241 = vector.extract_strided_slice %238 {offsets = [0, 32], sizes = [8, 32], strides = [1, 1]} : vector<8x128xf32> to vector<8x32xf32>
    %242 = vector.extract_strided_slice %239 {offsets = [0, 64], sizes = [8, 32], strides = [1, 1]} : vector<8x128xf32> to vector<8x32xf32>
    %243 = vector.extract_strided_slice %238 {offsets = [0, 96], sizes = [8, 32], strides = [1, 1]} : vector<8x128xf32> to vector<8x32xf32>
    %244 = arith.mulf %241, %189 : vector<8x32xf32>
    %245 = arith.mulf %240, %242 : vector<8x32xf32>
    %246 = arith.addf %244, %245 : vector<8x32xf32>
    %247 = math.tanh %246 : vector<8x32xf32>
    %248 = arith.mulf %243, %247 : vector<8x32xf32>
    %c24 = arith.constant 24 : index
    %c0_56 = arith.constant 0 : index
    %249 = vector.load %arg15[%c24, %c0_56] : memref<64x32xf32, #tpu.memory_space<vmem>>, vector<8x32xf32>
    tpu.vector_store %arg15[%c24, %c0_56], %248 {strides = array<i32>} : memref<64x32xf32, #tpu.memory_space<vmem>>, vector<8x32xf32>,
    %250 = vector.extract_strided_slice %9 {offsets = [32, 0], sizes = [8, 128], strides = [1, 1]} : vector<64x128xf32> to vector<8x128xf32>
    %cst_57 = arith.constant dense<0.000000e+00> : vector<8x128xf32>
    %251 = tpu.matmul %210, %10, %cst_57 {dimension_numbers = #tpu.dot_dimension_numbers<[1], [0], [0], [1], [0, 0, 1, 1], [], []>} : vector<8x32xf32>, vector<32x128xf32>, vector<8x128xf32> -> vector<8x128xf32>
    %252 = arith.addf %250, %251 : vector<8x128xf32>
    %253 = arith.negf %252 : vector<8x128xf32>
    %254 = math.exp %253 : vector<8x128xf32>
    %cst_58 = arith.constant 1.000000e+00 : f32
    %255 = vector.broadcast %cst_58 : f32 to vector<8x128xf32>
    %256 = arith.addf %255, %254 : vector<8x128xf32>
    %257 = arith.divf %255, %256 : vector<8x128xf32>
    %258 = math.tanh %252 : vector<8x128xf32>
    %259 = vector.extract_strided_slice %257 {offsets = [0, 0], sizes = [8, 32], strides = [1, 1]} : vector<8x128xf32> to vector<8x32xf32>
    %260 = vector.extract_strided_slice %257 {offsets = [0, 32], sizes = [8, 32], strides = [1, 1]} : vector<8x128xf32> to vector<8x32xf32>
    %261 = vector.extract_strided_slice %258 {offsets = [0, 64], sizes = [8, 32], strides = [1, 1]} : vector<8x128xf32> to vector<8x32xf32>
    %262 = vector.extract_strided_slice %257 {offsets = [0, 96], sizes = [8, 32], strides = [1, 1]} : vector<8x128xf32> to vector<8x32xf32>
    %263 = arith.mulf %260, %208 : vector<8x32xf32>
    %264 = arith.mulf %259, %261 : vector<8x32xf32>
    %265 = arith.addf %263, %264 : vector<8x32xf32>
    %266 = math.tanh %265 : vector<8x32xf32>
    %267 = arith.mulf %262, %266 : vector<8x32xf32>
    %cst_59 = arith.constant dense<0.000000e+00> : vector<8x128xf32>
    %268 = tpu.matmul %267, %11, %cst_59 {dimension_numbers = #tpu.dot_dimension_numbers<[1], [0], [0], [1], [0, 0, 1, 1], [], []>} : vector<8x32xf32>, vector<32x128xf32>, vector<8x128xf32> -> vector<8x128xf32>
    %cst_60 = arith.constant dense<0.000000e+00> : vector<8x128xf32>
    %269 = tpu.matmul %229, %12, %cst_60 {dimension_numbers = #tpu.dot_dimension_numbers<[1], [0], [0], [1], [0, 0, 1, 1], [], []>} : vector<8x32xf32>, vector<32x128xf32>, vector<8x128xf32> -> vector<8x128xf32>
    %270 = arith.addf %268, %269 : vector<8x128xf32>
    %271 = arith.addf %270, %17 : vector<8x128xf32>
    %272 = arith.negf %271 : vector<8x128xf32>
    %273 = math.exp %272 : vector<8x128xf32>
    %cst_61 = arith.constant 1.000000e+00 : f32
    %274 = vector.broadcast %cst_61 : f32 to vector<8x128xf32>
    %275 = arith.addf %274, %273 : vector<8x128xf32>
    %276 = arith.divf %274, %275 : vector<8x128xf32>
    %277 = math.tanh %271 : vector<8x128xf32>
    %278 = vector.extract_strided_slice %276 {offsets = [0, 0], sizes = [8, 32], strides = [1, 1]} : vector<8x128xf32> to vector<8x32xf32>
    %279 = vector.extract_strided_slice %276 {offsets = [0, 32], sizes = [8, 32], strides = [1, 1]} : vector<8x128xf32> to vector<8x32xf32>
    %280 = vector.extract_strided_slice %277 {offsets = [0, 64], sizes = [8, 32], strides = [1, 1]} : vector<8x128xf32> to vector<8x32xf32>
    %281 = vector.extract_strided_slice %276 {offsets = [0, 96], sizes = [8, 32], strides = [1, 1]} : vector<8x128xf32> to vector<8x32xf32>
    %282 = arith.mulf %279, %227 : vector<8x32xf32>
    %283 = arith.mulf %278, %280 : vector<8x32xf32>
    %284 = arith.addf %282, %283 : vector<8x32xf32>
    %285 = math.tanh %284 : vector<8x32xf32>
    %286 = arith.mulf %281, %285 : vector<8x32xf32>
    %cst_62 = arith.constant dense<0.000000e+00> : vector<8x128xf32>
    %287 = tpu.matmul %286, %13, %cst_62 {dimension_numbers = #tpu.dot_dimension_numbers<[1], [0], [0], [1], [0, 0, 1, 1], [], []>} : vector<8x32xf32>, vector<32x128xf32>, vector<8x128xf32> -> vector<8x128xf32>
    %cst_63 = arith.constant dense<0.000000e+00> : vector<8x128xf32>
    %288 = tpu.matmul %248, %14, %cst_63 {dimension_numbers = #tpu.dot_dimension_numbers<[1], [0], [0], [1], [0, 0, 1, 1], [], []>} : vector<8x32xf32>, vector<32x128xf32>, vector<8x128xf32> -> vector<8x128xf32>
    %289 = arith.addf %287, %288 : vector<8x128xf32>
    %290 = arith.addf %289, %20 : vector<8x128xf32>
    %291 = arith.negf %290 : vector<8x128xf32>
    %292 = math.exp %291 : vector<8x128xf32>
    %cst_64 = arith.constant 1.000000e+00 : f32
    %293 = vector.broadcast %cst_64 : f32 to vector<8x128xf32>
    %294 = arith.addf %293, %292 : vector<8x128xf32>
    %295 = arith.divf %293, %294 : vector<8x128xf32>
    %296 = math.tanh %290 : vector<8x128xf32>
    %297 = vector.extract_strided_slice %295 {offsets = [0, 0], sizes = [8, 32], strides = [1, 1]} : vector<8x128xf32> to vector<8x32xf32>
    %298 = vector.extract_strided_slice %295 {offsets = [0, 32], sizes = [8, 32], strides = [1, 1]} : vector<8x128xf32> to vector<8x32xf32>
    %299 = vector.extract_strided_slice %296 {offsets = [0, 64], sizes = [8, 32], strides = [1, 1]} : vector<8x128xf32> to vector<8x32xf32>
    %300 = vector.extract_strided_slice %295 {offsets = [0, 96], sizes = [8, 32], strides = [1, 1]} : vector<8x128xf32> to vector<8x32xf32>
    %301 = arith.mulf %298, %246 : vector<8x32xf32>
    %302 = arith.mulf %297, %299 : vector<8x32xf32>
    %303 = arith.addf %301, %302 : vector<8x32xf32>
    %304 = math.tanh %303 : vector<8x32xf32>
    %305 = arith.mulf %300, %304 : vector<8x32xf32>
    %c32 = arith.constant 32 : index
    %c0_65 = arith.constant 0 : index
    %306 = vector.load %arg15[%c32, %c0_65] : memref<64x32xf32, #tpu.memory_space<vmem>>, vector<8x32xf32>
    tpu.vector_store %arg15[%c32, %c0_65], %305 {strides = array<i32>} : memref<64x32xf32, #tpu.memory_space<vmem>>, vector<8x32xf32>,
    %307 = vector.extract_strided_slice %9 {offsets = [40, 0], sizes = [8, 128], strides = [1, 1]} : vector<64x128xf32> to vector<8x128xf32>
    %cst_66 = arith.constant dense<0.000000e+00> : vector<8x128xf32>
    %308 = tpu.matmul %267, %10, %cst_66 {dimension_numbers = #tpu.dot_dimension_numbers<[1], [0], [0], [1], [0, 0, 1, 1], [], []>} : vector<8x32xf32>, vector<32x128xf32>, vector<8x128xf32> -> vector<8x128xf32>
    %309 = arith.addf %307, %308 : vector<8x128xf32>
    %310 = arith.negf %309 : vector<8x128xf32>
    %311 = math.exp %310 : vector<8x128xf32>
    %cst_67 = arith.constant 1.000000e+00 : f32
    %312 = vector.broadcast %cst_67 : f32 to vector<8x128xf32>
    %313 = arith.addf %312, %311 : vector<8x128xf32>
    %314 = arith.divf %312, %313 : vector<8x128xf32>
    %315 = math.tanh %309 : vector<8x128xf32>
    %316 = vector.extract_strided_slice %314 {offsets = [0, 0], sizes = [8, 32], strides = [1, 1]} : vector<8x128xf32> to vector<8x32xf32>
    %317 = vector.extract_strided_slice %314 {offsets = [0, 32], sizes = [8, 32], strides = [1, 1]} : vector<8x128xf32> to vector<8x32xf32>
    %318 = vector.extract_strided_slice %315 {offsets = [0, 64], sizes = [8, 32], strides = [1, 1]} : vector<8x128xf32> to vector<8x32xf32>
    %319 = vector.extract_strided_slice %314 {offsets = [0, 96], sizes = [8, 32], strides = [1, 1]} : vector<8x128xf32> to vector<8x32xf32>
    %320 = arith.mulf %317, %265 : vector<8x32xf32>
    %321 = arith.mulf %316, %318 : vector<8x32xf32>
    %322 = arith.addf %320, %321 : vector<8x32xf32>
    %323 = math.tanh %322 : vector<8x32xf32>
    %324 = arith.mulf %319, %323 : vector<8x32xf32>
    %cst_68 = arith.constant dense<0.000000e+00> : vector<8x128xf32>
    %325 = tpu.matmul %324, %11, %cst_68 {dimension_numbers = #tpu.dot_dimension_numbers<[1], [0], [0], [1], [0, 0, 1, 1], [], []>} : vector<8x32xf32>, vector<32x128xf32>, vector<8x128xf32> -> vector<8x128xf32>
    %cst_69 = arith.constant dense<0.000000e+00> : vector<8x128xf32>
    %326 = tpu.matmul %286, %12, %cst_69 {dimension_numbers = #tpu.dot_dimension_numbers<[1], [0], [0], [1], [0, 0, 1, 1], [], []>} : vector<8x32xf32>, vector<32x128xf32>, vector<8x128xf32> -> vector<8x128xf32>
    %327 = arith.addf %325, %326 : vector<8x128xf32>
    %328 = arith.addf %327, %17 : vector<8x128xf32>
    %329 = arith.negf %328 : vector<8x128xf32>
    %330 = math.exp %329 : vector<8x128xf32>
    %cst_70 = arith.constant 1.000000e+00 : f32
    %331 = vector.broadcast %cst_70 : f32 to vector<8x128xf32>
    %332 = arith.addf %331, %330 : vector<8x128xf32>
    %333 = arith.divf %331, %332 : vector<8x128xf32>
    %334 = math.tanh %328 : vector<8x128xf32>
    %335 = vector.extract_strided_slice %333 {offsets = [0, 0], sizes = [8, 32], strides = [1, 1]} : vector<8x128xf32> to vector<8x32xf32>
    %336 = vector.extract_strided_slice %333 {offsets = [0, 32], sizes = [8, 32], strides = [1, 1]} : vector<8x128xf32> to vector<8x32xf32>
    %337 = vector.extract_strided_slice %334 {offsets = [0, 64], sizes = [8, 32], strides = [1, 1]} : vector<8x128xf32> to vector<8x32xf32>
    %338 = vector.extract_strided_slice %333 {offsets = [0, 96], sizes = [8, 32], strides = [1, 1]} : vector<8x128xf32> to vector<8x32xf32>
    %339 = arith.mulf %336, %284 : vector<8x32xf32>
    %340 = arith.mulf %335, %337 : vector<8x32xf32>
    %341 = arith.addf %339, %340 : vector<8x32xf32>
    %342 = math.tanh %341 : vector<8x32xf32>
    %343 = arith.mulf %338, %342 : vector<8x32xf32>
    %cst_71 = arith.constant dense<0.000000e+00> : vector<8x128xf32>
    %344 = tpu.matmul %343, %13, %cst_71 {dimension_numbers = #tpu.dot_dimension_numbers<[1], [0], [0], [1], [0, 0, 1, 1], [], []>} : vector<8x32xf32>, vector<32x128xf32>, vector<8x128xf32> -> vector<8x128xf32>
    %cst_72 = arith.constant dense<0.000000e+00> : vector<8x128xf32>
    %345 = tpu.matmul %305, %14, %cst_72 {dimension_numbers = #tpu.dot_dimension_numbers<[1], [0], [0], [1], [0, 0, 1, 1], [], []>} : vector<8x32xf32>, vector<32x128xf32>, vector<8x128xf32> -> vector<8x128xf32>
    %346 = arith.addf %344, %345 : vector<8x128xf32>
    %347 = arith.addf %346, %20 : vector<8x128xf32>
    %348 = arith.negf %347 : vector<8x128xf32>
    %349 = math.exp %348 : vector<8x128xf32>
    %cst_73 = arith.constant 1.000000e+00 : f32
    %350 = vector.broadcast %cst_73 : f32 to vector<8x128xf32>
    %351 = arith.addf %350, %349 : vector<8x128xf32>
    %352 = arith.divf %350, %351 : vector<8x128xf32>
    %353 = math.tanh %347 : vector<8x128xf32>
    %354 = vector.extract_strided_slice %352 {offsets = [0, 0], sizes = [8, 32], strides = [1, 1]} : vector<8x128xf32> to vector<8x32xf32>
    %355 = vector.extract_strided_slice %352 {offsets = [0, 32], sizes = [8, 32], strides = [1, 1]} : vector<8x128xf32> to vector<8x32xf32>
    %356 = vector.extract_strided_slice %353 {offsets = [0, 64], sizes = [8, 32], strides = [1, 1]} : vector<8x128xf32> to vector<8x32xf32>
    %357 = vector.extract_strided_slice %352 {offsets = [0, 96], sizes = [8, 32], strides = [1, 1]} : vector<8x128xf32> to vector<8x32xf32>
    %358 = arith.mulf %355, %303 : vector<8x32xf32>
    %359 = arith.mulf %354, %356 : vector<8x32xf32>
    %360 = arith.addf %358, %359 : vector<8x32xf32>
    %361 = math.tanh %360 : vector<8x32xf32>
    %362 = arith.mulf %357, %361 : vector<8x32xf32>
    %c40 = arith.constant 40 : index
    %c0_74 = arith.constant 0 : index
    %363 = vector.load %arg15[%c40, %c0_74] : memref<64x32xf32, #tpu.memory_space<vmem>>, vector<8x32xf32>
    tpu.vector_store %arg15[%c40, %c0_74], %362 {strides = array<i32>} : memref<64x32xf32, #tpu.memory_space<vmem>>, vector<8x32xf32>,
    %364 = vector.extract_strided_slice %9 {offsets = [48, 0], sizes = [8, 128], strides = [1, 1]} : vector<64x128xf32> to vector<8x128xf32>
    %cst_75 = arith.constant dense<0.000000e+00> : vector<8x128xf32>
    %365 = tpu.matmul %324, %10, %cst_75 {dimension_numbers = #tpu.dot_dimension_numbers<[1], [0], [0], [1], [0, 0, 1, 1], [], []>} : vector<8x32xf32>, vector<32x128xf32>, vector<8x128xf32> -> vector<8x128xf32>
    %366 = arith.addf %364, %365 : vector<8x128xf32>
    %367 = arith.negf %366 : vector<8x128xf32>
    %368 = math.exp %367 : vector<8x128xf32>
    %cst_76 = arith.constant 1.000000e+00 : f32
    %369 = vector.broadcast %cst_76 : f32 to vector<8x128xf32>
    %370 = arith.addf %369, %368 : vector<8x128xf32>
    %371 = arith.divf %369, %370 : vector<8x128xf32>
    %372 = math.tanh %366 : vector<8x128xf32>
    %373 = vector.extract_strided_slice %371 {offsets = [0, 0], sizes = [8, 32], strides = [1, 1]} : vector<8x128xf32> to vector<8x32xf32>
    %374 = vector.extract_strided_slice %371 {offsets = [0, 32], sizes = [8, 32], strides = [1, 1]} : vector<8x128xf32> to vector<8x32xf32>
    %375 = vector.extract_strided_slice %372 {offsets = [0, 64], sizes = [8, 32], strides = [1, 1]} : vector<8x128xf32> to vector<8x32xf32>
    %376 = vector.extract_strided_slice %371 {offsets = [0, 96], sizes = [8, 32], strides = [1, 1]} : vector<8x128xf32> to vector<8x32xf32>
    %377 = arith.mulf %374, %322 : vector<8x32xf32>
    %378 = arith.mulf %373, %375 : vector<8x32xf32>
    %379 = arith.addf %377, %378 : vector<8x32xf32>
    %380 = math.tanh %379 : vector<8x32xf32>
    %381 = arith.mulf %376, %380 : vector<8x32xf32>
    %cst_77 = arith.constant dense<0.000000e+00> : vector<8x128xf32>
    %382 = tpu.matmul %381, %11, %cst_77 {dimension_numbers = #tpu.dot_dimension_numbers<[1], [0], [0], [1], [0, 0, 1, 1], [], []>} : vector<8x32xf32>, vector<32x128xf32>, vector<8x128xf32> -> vector<8x128xf32>
    %cst_78 = arith.constant dense<0.000000e+00> : vector<8x128xf32>
    %383 = tpu.matmul %343, %12, %cst_78 {dimension_numbers = #tpu.dot_dimension_numbers<[1], [0], [0], [1], [0, 0, 1, 1], [], []>} : vector<8x32xf32>, vector<32x128xf32>, vector<8x128xf32> -> vector<8x128xf32>
    %384 = arith.addf %382, %383 : vector<8x128xf32>
    %385 = arith.addf %384, %17 : vector<8x128xf32>
    %386 = arith.negf %385 : vector<8x128xf32>
    %387 = math.exp %386 : vector<8x128xf32>
    %cst_79 = arith.constant 1.000000e+00 : f32
    %388 = vector.broadcast %cst_79 : f32 to vector<8x128xf32>
    %389 = arith.addf %388, %387 : vector<8x128xf32>
    %390 = arith.divf %388, %389 : vector<8x128xf32>
    %391 = math.tanh %385 : vector<8x128xf32>
    %392 = vector.extract_strided_slice %390 {offsets = [0, 0], sizes = [8, 32], strides = [1, 1]} : vector<8x128xf32> to vector<8x32xf32>
    %393 = vector.extract_strided_slice %390 {offsets = [0, 32], sizes = [8, 32], strides = [1, 1]} : vector<8x128xf32> to vector<8x32xf32>
    %394 = vector.extract_strided_slice %391 {offsets = [0, 64], sizes = [8, 32], strides = [1, 1]} : vector<8x128xf32> to vector<8x32xf32>
    %395 = vector.extract_strided_slice %390 {offsets = [0, 96], sizes = [8, 32], strides = [1, 1]} : vector<8x128xf32> to vector<8x32xf32>
    %396 = arith.mulf %393, %341 : vector<8x32xf32>
    %397 = arith.mulf %392, %394 : vector<8x32xf32>
    %398 = arith.addf %396, %397 : vector<8x32xf32>
    %399 = math.tanh %398 : vector<8x32xf32>
    %400 = arith.mulf %395, %399 : vector<8x32xf32>
    %cst_80 = arith.constant dense<0.000000e+00> : vector<8x128xf32>
    %401 = tpu.matmul %400, %13, %cst_80 {dimension_numbers = #tpu.dot_dimension_numbers<[1], [0], [0], [1], [0, 0, 1, 1], [], []>} : vector<8x32xf32>, vector<32x128xf32>, vector<8x128xf32> -> vector<8x128xf32>
    %cst_81 = arith.constant dense<0.000000e+00> : vector<8x128xf32>
    %402 = tpu.matmul %362, %14, %cst_81 {dimension_numbers = #tpu.dot_dimension_numbers<[1], [0], [0], [1], [0, 0, 1, 1], [], []>} : vector<8x32xf32>, vector<32x128xf32>, vector<8x128xf32> -> vector<8x128xf32>
    %403 = arith.addf %401, %402 : vector<8x128xf32>
    %404 = arith.addf %403, %20 : vector<8x128xf32>
    %405 = arith.negf %404 : vector<8x128xf32>
    %406 = math.exp %405 : vector<8x128xf32>
    %cst_82 = arith.constant 1.000000e+00 : f32
    %407 = vector.broadcast %cst_82 : f32 to vector<8x128xf32>
    %408 = arith.addf %407, %406 : vector<8x128xf32>
    %409 = arith.divf %407, %408 : vector<8x128xf32>
    %410 = math.tanh %404 : vector<8x128xf32>
    %411 = vector.extract_strided_slice %409 {offsets = [0, 0], sizes = [8, 32], strides = [1, 1]} : vector<8x128xf32> to vector<8x32xf32>
    %412 = vector.extract_strided_slice %409 {offsets = [0, 32], sizes = [8, 32], strides = [1, 1]} : vector<8x128xf32> to vector<8x32xf32>
    %413 = vector.extract_strided_slice %410 {offsets = [0, 64], sizes = [8, 32], strides = [1, 1]} : vector<8x128xf32> to vector<8x32xf32>
    %414 = vector.extract_strided_slice %409 {offsets = [0, 96], sizes = [8, 32], strides = [1, 1]} : vector<8x128xf32> to vector<8x32xf32>
    %415 = arith.mulf %412, %360 : vector<8x32xf32>
    %416 = arith.mulf %411, %413 : vector<8x32xf32>
    %417 = arith.addf %415, %416 : vector<8x32xf32>
    %418 = math.tanh %417 : vector<8x32xf32>
    %419 = arith.mulf %414, %418 : vector<8x32xf32>
    %c48 = arith.constant 48 : index
    %c0_83 = arith.constant 0 : index
    %420 = vector.load %arg15[%c48, %c0_83] : memref<64x32xf32, #tpu.memory_space<vmem>>, vector<8x32xf32>
    tpu.vector_store %arg15[%c48, %c0_83], %419 {strides = array<i32>} : memref<64x32xf32, #tpu.memory_space<vmem>>, vector<8x32xf32>,
    %421 = vector.extract_strided_slice %9 {offsets = [56, 0], sizes = [8, 128], strides = [1, 1]} : vector<64x128xf32> to vector<8x128xf32>
    %cst_84 = arith.constant dense<0.000000e+00> : vector<8x128xf32>
    %422 = tpu.matmul %381, %10, %cst_84 {dimension_numbers = #tpu.dot_dimension_numbers<[1], [0], [0], [1], [0, 0, 1, 1], [], []>} : vector<8x32xf32>, vector<32x128xf32>, vector<8x128xf32> -> vector<8x128xf32>
    %423 = arith.addf %421, %422 : vector<8x128xf32>
    %424 = arith.negf %423 : vector<8x128xf32>
    %425 = math.exp %424 : vector<8x128xf32>
    %cst_85 = arith.constant 1.000000e+00 : f32
    %426 = vector.broadcast %cst_85 : f32 to vector<8x128xf32>
    %427 = arith.addf %426, %425 : vector<8x128xf32>
    %428 = arith.divf %426, %427 : vector<8x128xf32>
    %429 = math.tanh %423 : vector<8x128xf32>
    %430 = vector.extract_strided_slice %428 {offsets = [0, 0], sizes = [8, 32], strides = [1, 1]} : vector<8x128xf32> to vector<8x32xf32>
    %431 = vector.extract_strided_slice %428 {offsets = [0, 32], sizes = [8, 32], strides = [1, 1]} : vector<8x128xf32> to vector<8x32xf32>
    %432 = vector.extract_strided_slice %429 {offsets = [0, 64], sizes = [8, 32], strides = [1, 1]} : vector<8x128xf32> to vector<8x32xf32>
    %433 = vector.extract_strided_slice %428 {offsets = [0, 96], sizes = [8, 32], strides = [1, 1]} : vector<8x128xf32> to vector<8x32xf32>
    %434 = arith.mulf %431, %379 : vector<8x32xf32>
    %435 = arith.mulf %430, %432 : vector<8x32xf32>
    %436 = arith.addf %434, %435 : vector<8x32xf32>
    %437 = math.tanh %436 : vector<8x32xf32>
    %438 = arith.mulf %433, %437 : vector<8x32xf32>
    %cst_86 = arith.constant dense<0.000000e+00> : vector<8x128xf32>
    %439 = tpu.matmul %438, %11, %cst_86 {dimension_numbers = #tpu.dot_dimension_numbers<[1], [0], [0], [1], [0, 0, 1, 1], [], []>} : vector<8x32xf32>, vector<32x128xf32>, vector<8x128xf32> -> vector<8x128xf32>
    %cst_87 = arith.constant dense<0.000000e+00> : vector<8x128xf32>
    %440 = tpu.matmul %400, %12, %cst_87 {dimension_numbers = #tpu.dot_dimension_numbers<[1], [0], [0], [1], [0, 0, 1, 1], [], []>} : vector<8x32xf32>, vector<32x128xf32>, vector<8x128xf32> -> vector<8x128xf32>
    %441 = arith.addf %439, %440 : vector<8x128xf32>
    %442 = arith.addf %441, %17 : vector<8x128xf32>
    %443 = arith.negf %442 : vector<8x128xf32>
    %444 = math.exp %443 : vector<8x128xf32>
    %cst_88 = arith.constant 1.000000e+00 : f32
    %445 = vector.broadcast %cst_88 : f32 to vector<8x128xf32>
    %446 = arith.addf %445, %444 : vector<8x128xf32>
    %447 = arith.divf %445, %446 : vector<8x128xf32>
    %448 = math.tanh %442 : vector<8x128xf32>
    %449 = vector.extract_strided_slice %447 {offsets = [0, 0], sizes = [8, 32], strides = [1, 1]} : vector<8x128xf32> to vector<8x32xf32>
    %450 = vector.extract_strided_slice %447 {offsets = [0, 32], sizes = [8, 32], strides = [1, 1]} : vector<8x128xf32> to vector<8x32xf32>
    %451 = vector.extract_strided_slice %448 {offsets = [0, 64], sizes = [8, 32], strides = [1, 1]} : vector<8x128xf32> to vector<8x32xf32>
    %452 = vector.extract_strided_slice %447 {offsets = [0, 96], sizes = [8, 32], strides = [1, 1]} : vector<8x128xf32> to vector<8x32xf32>
    %453 = arith.mulf %450, %398 : vector<8x32xf32>
    %454 = arith.mulf %449, %451 : vector<8x32xf32>
    %455 = arith.addf %453, %454 : vector<8x32xf32>
    %456 = math.tanh %455 : vector<8x32xf32>
    %457 = arith.mulf %452, %456 : vector<8x32xf32>
    %cst_89 = arith.constant dense<0.000000e+00> : vector<8x128xf32>
    %458 = tpu.matmul %457, %13, %cst_89 {dimension_numbers = #tpu.dot_dimension_numbers<[1], [0], [0], [1], [0, 0, 1, 1], [], []>} : vector<8x32xf32>, vector<32x128xf32>, vector<8x128xf32> -> vector<8x128xf32>
    %cst_90 = arith.constant dense<0.000000e+00> : vector<8x128xf32>
    %459 = tpu.matmul %419, %14, %cst_90 {dimension_numbers = #tpu.dot_dimension_numbers<[1], [0], [0], [1], [0, 0, 1, 1], [], []>} : vector<8x32xf32>, vector<32x128xf32>, vector<8x128xf32> -> vector<8x128xf32>
    %460 = arith.addf %458, %459 : vector<8x128xf32>
    %461 = arith.addf %460, %20 : vector<8x128xf32>
    %462 = arith.negf %461 : vector<8x128xf32>
    %463 = math.exp %462 : vector<8x128xf32>
    %cst_91 = arith.constant 1.000000e+00 : f32
    %464 = vector.broadcast %cst_91 : f32 to vector<8x128xf32>
    %465 = arith.addf %464, %463 : vector<8x128xf32>
    %466 = arith.divf %464, %465 : vector<8x128xf32>
    %467 = math.tanh %461 : vector<8x128xf32>
    %468 = vector.extract_strided_slice %466 {offsets = [0, 0], sizes = [8, 32], strides = [1, 1]} : vector<8x128xf32> to vector<8x32xf32>
    %469 = vector.extract_strided_slice %466 {offsets = [0, 32], sizes = [8, 32], strides = [1, 1]} : vector<8x128xf32> to vector<8x32xf32>
    %470 = vector.extract_strided_slice %467 {offsets = [0, 64], sizes = [8, 32], strides = [1, 1]} : vector<8x128xf32> to vector<8x32xf32>
    %471 = vector.extract_strided_slice %466 {offsets = [0, 96], sizes = [8, 32], strides = [1, 1]} : vector<8x128xf32> to vector<8x32xf32>
    %472 = arith.mulf %469, %417 : vector<8x32xf32>
    %473 = arith.mulf %468, %470 : vector<8x32xf32>
    %474 = arith.addf %472, %473 : vector<8x32xf32>
    %475 = math.tanh %474 : vector<8x32xf32>
    %476 = arith.mulf %471, %475 : vector<8x32xf32>
    %c56 = arith.constant 56 : index
    %c0_92 = arith.constant 0 : index
    %477 = vector.load %arg15[%c56, %c0_92] : memref<64x32xf32, #tpu.memory_space<vmem>>, vector<8x32xf32>
    tpu.vector_store %arg15[%c56, %c0_92], %476 {strides = array<i32>} : memref<64x32xf32, #tpu.memory_space<vmem>>, vector<8x32xf32>,
    %c0_i32_93 = arith.constant 0 : i32
    %478 = tpu.memref_slice %arg18[%c0_i32_93] : memref<2x!tpu.dma_semaphore, #tpu.memory_space<semaphore_mem>> -> memref<1x!tpu.dma_semaphore, #tpu.memory_space<semaphore_mem>>
    %479 = tpu.memref_squeeze %478 : memref<1x!tpu.dma_semaphore, #tpu.memory_space<semaphore_mem>> -> memref<!tpu.dma_semaphore, #tpu.memory_space<semaphore_mem>>
    tpu.wait_dma2 semaphore(%479 : memref<!tpu.dma_semaphore, #tpu.memory_space<semaphore_mem>>) src(%arg10 : memref<256x512xf32, #tpu.memory_space<any>>) dst(%arg16 : memref<256x512xf32, #tpu.memory_space<vmem>>)
    %c0_94 = arith.constant 0 : index
    %c0_95 = arith.constant 0 : index
    %480 = vector.load %arg11[%c0_94, %c0_95] : memref<1x512xf32, #tpu.memory_space<vmem>>, vector<1x512xf32>
    %481 = vector.shape_cast %480 : vector<1x512xf32> to vector<1x512xf32>
    %482 = vector.broadcast %481 : vector<1x512xf32> to vector<8x512xf32>
    %c0_96 = arith.constant 0 : index
    %c0_97 = arith.constant 0 : index
    %483 = tpu.strided_load %arg15[%c0_96, %c0_97] {strides = array<i32: 8, 1>} : memref<64x32xf32, #tpu.memory_space<vmem>>, vector<8x32xf32>
    %c0_98 = arith.constant 0 : index
    %c0_99 = arith.constant 0 : index
    %484 = vector.load %arg16[%c0_98, %c0_99] : memref<256x512xf32, #tpu.memory_space<vmem>>, vector<32x512xf32>
    %cst_100 = arith.constant dense<0.000000e+00> : vector<8x512xf32>
    %485 = tpu.matmul %483, %484, %cst_100 {dimension_numbers = #tpu.dot_dimension_numbers<[1], [0], [0], [1], [0, 0, 1, 1], [], []>} : vector<8x32xf32>, vector<32x512xf32>, vector<8x512xf32> -> vector<8x512xf32>
    %486 = arith.addf %482, %485 : vector<8x512xf32>
    %c1 = arith.constant 1 : index
    %c0_101 = arith.constant 0 : index
    %487 = tpu.strided_load %arg15[%c1, %c0_101] {strides = array<i32: 8, 1>} : memref<64x32xf32, #tpu.memory_space<vmem>>, vector<8x32xf32>
    %c32_102 = arith.constant 32 : index
    %c0_103 = arith.constant 0 : index
    %488 = vector.load %arg16[%c32_102, %c0_103] : memref<256x512xf32, #tpu.memory_space<vmem>>, vector<32x512xf32>
    %cst_104 = arith.constant dense<0.000000e+00> : vector<8x512xf32>
    %489 = tpu.matmul %487, %488, %cst_104 {dimension_numbers = #tpu.dot_dimension_numbers<[1], [0], [0], [1], [0, 0, 1, 1], [], []>} : vector<8x32xf32>, vector<32x512xf32>, vector<8x512xf32> -> vector<8x512xf32>
    %490 = arith.addf %486, %489 : vector<8x512xf32>
    %c2 = arith.constant 2 : index
    %c0_105 = arith.constant 0 : index
    %491 = tpu.strided_load %arg15[%c2, %c0_105] {strides = array<i32: 8, 1>} : memref<64x32xf32, #tpu.memory_space<vmem>>, vector<8x32xf32>
    %c64 = arith.constant 64 : index
    %c0_106 = arith.constant 0 : index
    %492 = vector.load %arg16[%c64, %c0_106] : memref<256x512xf32, #tpu.memory_space<vmem>>, vector<32x512xf32>
    %cst_107 = arith.constant dense<0.000000e+00> : vector<8x512xf32>
    %493 = tpu.matmul %491, %492, %cst_107 {dimension_numbers = #tpu.dot_dimension_numbers<[1], [0], [0], [1], [0, 0, 1, 1], [], []>} : vector<8x32xf32>, vector<32x512xf32>, vector<8x512xf32> -> vector<8x512xf32>
    %494 = arith.addf %490, %493 : vector<8x512xf32>
    %c3 = arith.constant 3 : index
    %c0_108 = arith.constant 0 : index
    %495 = tpu.strided_load %arg15[%c3, %c0_108] {strides = array<i32: 8, 1>} : memref<64x32xf32, #tpu.memory_space<vmem>>, vector<8x32xf32>
    %c96 = arith.constant 96 : index
    %c0_109 = arith.constant 0 : index
    %496 = vector.load %arg16[%c96, %c0_109] : memref<256x512xf32, #tpu.memory_space<vmem>>, vector<32x512xf32>
    %cst_110 = arith.constant dense<0.000000e+00> : vector<8x512xf32>
    %497 = tpu.matmul %495, %496, %cst_110 {dimension_numbers = #tpu.dot_dimension_numbers<[1], [0], [0], [1], [0, 0, 1, 1], [], []>} : vector<8x32xf32>, vector<32x512xf32>, vector<8x512xf32> -> vector<8x512xf32>
    %498 = arith.addf %494, %497 : vector<8x512xf32>
    %c4 = arith.constant 4 : index
    %c0_111 = arith.constant 0 : index
    %499 = tpu.strided_load %arg15[%c4, %c0_111] {strides = array<i32: 8, 1>} : memref<64x32xf32, #tpu.memory_space<vmem>>, vector<8x32xf32>
    %c128 = arith.constant 128 : index
    %c0_112 = arith.constant 0 : index
    %500 = vector.load %arg16[%c128, %c0_112] : memref<256x512xf32, #tpu.memory_space<vmem>>, vector<32x512xf32>
    %cst_113 = arith.constant dense<0.000000e+00> : vector<8x512xf32>
    %501 = tpu.matmul %499, %500, %cst_113 {dimension_numbers = #tpu.dot_dimension_numbers<[1], [0], [0], [1], [0, 0, 1, 1], [], []>} : vector<8x32xf32>, vector<32x512xf32>, vector<8x512xf32> -> vector<8x512xf32>
    %502 = arith.addf %498, %501 : vector<8x512xf32>
    %c5 = arith.constant 5 : index
    %c0_114 = arith.constant 0 : index
    %503 = tpu.strided_load %arg15[%c5, %c0_114] {strides = array<i32: 8, 1>} : memref<64x32xf32, #tpu.memory_space<vmem>>, vector<8x32xf32>
    %c160 = arith.constant 160 : index
    %c0_115 = arith.constant 0 : index
    %504 = vector.load %arg16[%c160, %c0_115] : memref<256x512xf32, #tpu.memory_space<vmem>>, vector<32x512xf32>
    %cst_116 = arith.constant dense<0.000000e+00> : vector<8x512xf32>
    %505 = tpu.matmul %503, %504, %cst_116 {dimension_numbers = #tpu.dot_dimension_numbers<[1], [0], [0], [1], [0, 0, 1, 1], [], []>} : vector<8x32xf32>, vector<32x512xf32>, vector<8x512xf32> -> vector<8x512xf32>
    %506 = arith.addf %502, %505 : vector<8x512xf32>
    %c6 = arith.constant 6 : index
    %c0_117 = arith.constant 0 : index
    %507 = tpu.strided_load %arg15[%c6, %c0_117] {strides = array<i32: 8, 1>} : memref<64x32xf32, #tpu.memory_space<vmem>>, vector<8x32xf32>
    %c192 = arith.constant 192 : index
    %c0_118 = arith.constant 0 : index
    %508 = vector.load %arg16[%c192, %c0_118] : memref<256x512xf32, #tpu.memory_space<vmem>>, vector<32x512xf32>
    %cst_119 = arith.constant dense<0.000000e+00> : vector<8x512xf32>
    %509 = tpu.matmul %507, %508, %cst_119 {dimension_numbers = #tpu.dot_dimension_numbers<[1], [0], [0], [1], [0, 0, 1, 1], [], []>} : vector<8x32xf32>, vector<32x512xf32>, vector<8x512xf32> -> vector<8x512xf32>
    %510 = arith.addf %506, %509 : vector<8x512xf32>
    %c7 = arith.constant 7 : index
    %c0_120 = arith.constant 0 : index
    %511 = tpu.strided_load %arg15[%c7, %c0_120] {strides = array<i32: 8, 1>} : memref<64x32xf32, #tpu.memory_space<vmem>>, vector<8x32xf32>
    %c224 = arith.constant 224 : index
    %c0_121 = arith.constant 0 : index
    %512 = vector.load %arg16[%c224, %c0_121] : memref<256x512xf32, #tpu.memory_space<vmem>>, vector<32x512xf32>
    %cst_122 = arith.constant dense<0.000000e+00> : vector<8x512xf32>
    %513 = tpu.matmul %511, %512, %cst_122 {dimension_numbers = #tpu.dot_dimension_numbers<[1], [0], [0], [1], [0, 0, 1, 1], [], []>} : vector<8x32xf32>, vector<32x512xf32>, vector<8x512xf32> -> vector<8x512xf32>
    %514 = arith.addf %510, %513 : vector<8x512xf32>
    %cst_123 = arith.constant 0.000000e+00 : f32
    %515 = vector.broadcast %cst_123 : f32 to vector<8x512xf32>
    %516 = arith.cmpf ogt, %514, %515 : vector<8x512xf32>
    %cst_124 = arith.constant 0.00999999977 : f32
    %517 = vector.broadcast %cst_124 : f32 to vector<8x512xf32>
    %518 = arith.mulf %517, %514 : vector<8x512xf32>
    %519 = arith.select %516, %514, %518 : vector<8x512xi1>, vector<8x512xf32>
    %c1_i32_125 = arith.constant 1 : i32
    %520 = tpu.memref_slice %arg18[%c1_i32_125] : memref<2x!tpu.dma_semaphore, #tpu.memory_space<semaphore_mem>> -> memref<1x!tpu.dma_semaphore, #tpu.memory_space<semaphore_mem>>
    %521 = tpu.memref_squeeze %520 : memref<1x!tpu.dma_semaphore, #tpu.memory_space<semaphore_mem>> -> memref<!tpu.dma_semaphore, #tpu.memory_space<semaphore_mem>>
    tpu.wait_dma2 semaphore(%521 : memref<!tpu.dma_semaphore, #tpu.memory_space<semaphore_mem>>) src(%arg12 : memref<512x128xf32, #tpu.memory_space<any>>) dst(%arg17 : memref<512x128xf32, #tpu.memory_space<vmem>>)
    %c0_126 = arith.constant 0 : index
    %c0_127 = arith.constant 0 : index
    %522 = vector.load %arg17[%c0_126, %c0_127] : memref<512x128xf32, #tpu.memory_space<vmem>>, vector<512x128xf32>
    %cst_128 = arith.constant dense<0.000000e+00> : vector<8x128xf32>
    %523 = tpu.matmul %519, %522, %cst_128 {dimension_numbers = #tpu.dot_dimension_numbers<[1], [0], [0], [1], [0, 0, 1, 1], [], []>} : vector<8x512xf32>, vector<512x128xf32>, vector<8x128xf32> -> vector<8x128xf32>
    %c0_129 = arith.constant 0 : index
    %c0_130 = arith.constant 0 : index
    %524 = vector.load %arg13[%c0_129, %c0_130] : memref<1x128xf32, #tpu.memory_space<vmem>>, vector<1x128xf32>
    %525 = vector.broadcast %524 : vector<1x128xf32> to vector<8x128xf32>
    %526 = arith.addf %523, %525 : vector<8x128xf32>
    %c0_131 = arith.constant 0 : index
    %c0_132 = arith.constant 0 : index
    %527 = vector.load %arg14[%c0_131, %c0_132] : memref<8x128xf32, #tpu.memory_space<vmem>>, vector<8x128xf32>
    tpu.vector_store %arg14[%c0_131, %c0_132], %526 {strides = array<i32>} : memref<8x128xf32, #tpu.memory_space<vmem>>, vector<8x128xf32>,
    return
  }
}

</mosaic_0001>

<bundles_post_ra>
// kernel: music_rnn_forward.1
= control target key start
LH: loop header
LB: loop body
LE: loop exit
PB: predicated region body
PF: predicated region fallthrough
CT: control target
= control target key end

     0   :  { %19 = vsyncpa [#allocation7], 0  ;;  %s3608_s20 = smov [#allocation3]   ;;  %s4806_s0 = inlined_call_operand.vmem [shape: f32[64,32], index: 0, kind: input, shape index: {}]   ;;  %s4807_s1 = inlined_call_operand.vmem [shape: f32[32,128], index: 1, kind: input, shape index: {}]   ;;  %s4808_s2 = inlined_call_operand.vmem [shape: f32[32,128], index: 2, kind: input, shape index: {}]   ;;  %s4809_s3 = inlined_call_operand.vmem [shape: f32[1,128], index: 3, kind: input, shape index: {}]   ;;  %s4810_s4 = inlined_call_operand.vmem [shape: f32[32,128], index: 4, kind: input, shape index: {}]   ;;  %s4811_s5 = inlined_call_operand.vmem [shape: f32[32,128], index: 5, kind: input, shape index: {}]   ;;  %s4812_s6 = inlined_call_operand.vmem [shape: f32[1,128], index: 6, kind: input, shape index: {}]   ;;  %s4813_s7 = inlined_call_operand.vmem [shape: f32[32,128], index: 7, kind: input, shape index: {}]   ;;  %s4814_s8 = inlined_call_operand.vmem [shape: f32[32,128], index: 8, kind: input, shape index: {}]   ;;  %s4815_s9 = inlined_call_operand.vmem [shape: f32[1,128], index: 9, kind: input, shape index: {}]   ;;  %s4816_s10 = inlined_call_operand.hbm [shape: f32[256,512], index: 10, kind: input, shape index: {}]   ;;  %s4817_s11 = inlined_call_operand.vmem [shape: f32[1,512], index: 11, kind: input, shape index: {}]   ;;  %s4818_s12 = inlined_call_operand.vmem [shape: f32[512,128], index: 12, kind: input, shape index: {}]   ;;  %s4819_s13 = inlined_call_operand.vmem [shape: f32[1,128], index: 13, kind: input, shape index: {}]   ;;  %s4820_s14 = inlined_call_operand.hbm [shape: f32[8,128], index: 14, kind: output, shape index: {}]  }
   0x1   :  { %s51_s15 = sshll.u32 %s4816_s10, 4  ;;  %v3694_v0 = vld [vmem:[%s4818_s12] sm:$0xff]  ;;  %v3699_v1 = vld [vmem:[%s4818_s12 + $0x8] sm:$0xff]  ;;  %s53_s21 = sshll.u32 %s3608_s20, 4  ;;  %v3704_v2 = vld [vmem:[%s4818_s12 + $0x10] sm:$0xff]  ;;  %s52_s15 = int_to_ptr.hbm [resolvable:$true] %s51_s15  ;;  %s54_s21 = int_to_ptr.vmem [resolvable:$true] %s53_s21 }
   0x2   :  { %4823 = vst [vmem:[#allocation16_spill] sm:$0xff] %v3694_v0  ;;  %v3709_v3 = vld [vmem:[%s4818_s12 + $0x18] sm:$0xff]  ;;  %v3714_v4 = vld [vmem:[%s4818_s12 + $0x20] sm:$0xff]  ;;  %v3719_v5 = vld [vmem:[%s4818_s12 + $0x28] sm:$0xff]  ;;  %56 = dma.hbm_to_vmem [thread:$0]  %s52_s15, 16384, %s54_s21, [#allocation5] }
   0x3   :  { %4824 = vst [vmem:[#allocation17_spill] sm:$0xff] %v3699_v1  ;;  %v3724_v6 = vld [vmem:[%s4818_s12 + $0x30] sm:$0xff]  ;;  %v3729_v7 = vld [vmem:[%s4818_s12 + $0x38] sm:$0xff]  ;;  %v3734_v8 = vld [vmem:[%s4818_s12 + $0x40] sm:$0xff] }
   0x4   :  { %4825 = vst [vmem:[#allocation18_spill] sm:$0xff] %v3704_v2  ;;  %v3739_v9 = vld [vmem:[%s4818_s12 + $0x48] sm:$0xff]  ;;  %v3744_v10 = vld [vmem:[%s4818_s12 + $0x50] sm:$0xff]  ;;  %v3749_v11 = vld [vmem:[%s4818_s12 + $0x58] sm:$0xff] }
   0x5   :  { %4826 = vst [vmem:[#allocation19_spill] sm:$0xff] %v3709_v3  ;;  %v3754_v12 = vld [vmem:[%s4818_s12 + $0x60] sm:$0xff]  ;;  %v3759_v13 = vld [vmem:[%s4818_s12 + $0x68] sm:$0xff]  ;;  %v3764_v14 = vld [vmem:[%s4818_s12 + $0x70] sm:$0xff] }
   0x6   :  { %4827 = vst [vmem:[#allocation20_spill] sm:$0xff] %v3714_v4  ;;  %v3769_v15 = vld [vmem:[%s4818_s12 + $0x78] sm:$0xff]  ;;  %v3774_v16 = vld [vmem:[%s4818_s12 + $0x80] sm:$0xff]  ;;  %v3779_v17 = vld [vmem:[%s4818_s12 + $0x88] sm:$0xff] }
   0x7   :  { %4828 = vst [vmem:[#allocation21_spill] sm:$0xff] %v3719_v5  ;;  %v3784_v18 = vld [vmem:[%s4818_s12 + $0x90] sm:$0xff]  ;;  %v3789_v19 = vld [vmem:[%s4818_s12 + $0x98] sm:$0xff]  ;;  %v3794_v20 = vld [vmem:[%s4818_s12 + $0xa0] sm:$0xff] }
   0x8   :  { %4829 = vst [vmem:[#allocation22_spill] sm:$0xff] %v3724_v6  ;;  %v3799_v21 = vld [vmem:[%s4818_s12 + $0xa8] sm:$0xff]  ;;  %v3804_v22 = vld [vmem:[%s4818_s12 + $0xb0] sm:$0xff]  ;;  %v3809_v23 = vld [vmem:[%s4818_s12 + $0xb8] sm:$0xff] }
   0x9   :  { %4830 = vst [vmem:[#allocation23_spill] sm:$0xff] %v3729_v7  ;;  %v3814_v24 = vld [vmem:[%s4818_s12 + $0xc0] sm:$0xff]  ;;  %v3819_v25 = vld [vmem:[%s4818_s12 + $0xc8] sm:$0xff]  ;;  %v3824_v26 = vld [vmem:[%s4818_s12 + $0xd0] sm:$0xff] }
   0xa   :  { %4831 = vst [vmem:[#allocation24_spill] sm:$0xff] %v3734_v8  ;;  %v3829_v27 = vld [vmem:[%s4818_s12 + $0xd8] sm:$0xff]  ;;  %v3834_v28 = vld [vmem:[%s4818_s12 + $0xe0] sm:$0xff]  ;;  %v3839_v29 = vld [vmem:[%s4818_s12 + $0xe8] sm:$0xff] }
   0xb   :  { %4832 = vst [vmem:[#allocation25_spill] sm:$0xff] %v3739_v9  ;;  %v3844_v30 = vld [vmem:[%s4818_s12 + $0xf0] sm:$0xff]  ;;  %v3849_v31 = vld [vmem:[%s4818_s12 + $0xf8] sm:$0xff]  ;;  %v3854_v32 = vld [vmem:[%s4818_s12 + $0x100] sm:$0xff] }
   0xc   :  { %4833 = vst [vmem:[#allocation26_spill] sm:$0xff] %v3744_v10  ;;  %v3859_v33 = vld [vmem:[%s4818_s12 + $0x108] sm:$0xff]  ;;  %v3864_v34 = vld [vmem:[%s4818_s12 + $0x110] sm:$0xff]  ;;  %v3869_v35 = vld [vmem:[%s4818_s12 + $0x118] sm:$0xff] }
   0xd   :  { %4834 = vst [vmem:[#allocation27_spill] sm:$0xff] %v3749_v11  ;;  %v3874_v36 = vld [vmem:[%s4818_s12 + $0x120] sm:$0xff]  ;;  %v3879_v37 = vld [vmem:[%s4818_s12 + $0x128] sm:$0xff]  ;;  %v3884_v38 = vld [vmem:[%s4818_s12 + $0x130] sm:$0xff] }
   0xe   :  { %4835 = vst [vmem:[#allocation28_spill] sm:$0xff] %v3774_v16  ;;  %v3889_v39 = vld [vmem:[%s4818_s12 + $0x138] sm:$0xff]  ;;  %v3894_v40 = vld [vmem:[%s4818_s12 + $0x140] sm:$0xff]  ;;  %v3899_v41 = vld [vmem:[%s4818_s12 + $0x148] sm:$0xff] }
   0xf   :  { %4836 = vst [vmem:[#allocation29_spill] sm:$0xff] %v3779_v17  ;;  %v3904_v42 = vld [vmem:[%s4818_s12 + $0x150] sm:$0xff]  ;;  %v3909_v43 = vld [vmem:[%s4818_s12 + $0x158] sm:$0xff]  ;;  %v3914_v44 = vld [vmem:[%s4818_s12 + $0x160] sm:$0xff] }
  0x10   :  { %4837 = vst [vmem:[#allocation30_spill] sm:$0xff] %v3784_v18  ;;  %v3919_v45 = vld [vmem:[%s4818_s12 + $0x168] sm:$0xff]  ;;  %v3924_v46 = vld [vmem:[%s4818_s12 + $0x170] sm:$0xff]  ;;  %v3929_v47 = vld [vmem:[%s4818_s12 + $0x178] sm:$0xff] }
  0x11   :  { %4838 = vst [vmem:[#allocation31_spill] sm:$0xff] %v3789_v19  ;;  %v3934_v48 = vld [vmem:[%s4818_s12 + $0x180] sm:$0xff]  ;;  %v3939_v49 = vld [vmem:[%s4818_s12 + $0x188] sm:$0xff]  ;;  %v3944_v50 = vld [vmem:[%s4818_s12 + $0x190] sm:$0xff] }
  0x12   :  { %4839 = vst [vmem:[#allocation32_spill] sm:$0xff] %v3794_v20  ;;  %v3949_v51 = vld [vmem:[%s4818_s12 + $0x198] sm:$0xff]  ;;  %v3954_v52 = vld [vmem:[%s4818_s12 + $0x1a0] sm:$0xff]  ;;  %v3959_v53 = vld [vmem:[%s4818_s12 + $0x1a8] sm:$0xff] }
  0x13   :  { %4840 = vst [vmem:[#allocation33_spill] sm:$0xff] %v3799_v21  ;;  %v3964_v54 = vld [vmem:[%s4818_s12 + $0x1b0] sm:$0xff]  ;;  %v3969_v55 = vld [vmem:[%s4818_s12 + $0x1b8] sm:$0xff]  ;;  %v3974_v56 = vld [vmem:[%s4818_s12 + $0x1c0] sm:$0xff] }
  0x14   :  { %4841 = vst [vmem:[#allocation34_spill] sm:$0xff] %v3804_v22  ;;  %v3979_v57 = vld [vmem:[%s4818_s12 + $0x1c8] sm:$0xff]  ;;  %v3984_v58 = vld [vmem:[%s4818_s12 + $0x1d0] sm:$0xff]  ;;  %v3989_v59 = vld [vmem:[%s4818_s12 + $0x1d8] sm:$0xff] }
  0x15   :  { %4842 = vst [vmem:[#allocation35_spill] sm:$0xff] %v3809_v23  ;;  %v3994_v60 = vld [vmem:[%s4818_s12 + $0x1e0] sm:$0xff]  ;;  %v3999_v61 = vld [vmem:[%s4818_s12 + $0x1e8] sm:$0xff]  ;;  %v4004_v62 = vld [vmem:[%s4818_s12 + $0x1f0] sm:$0xff] }
  0x16   :  { %4843 = vst [vmem:[#allocation36_spill] sm:$0xff] %v3814_v24  ;;  %v4009_v63 = vld [vmem:[%s4818_s12 + $0x1f8] sm:$0xff] }
  0x17   :  { %4844 = vst [vmem:[#allocation37_spill] sm:$0xff] %v3819_v25 }
  0x18   :  { %4845 = vst [vmem:[#allocation38_spill] sm:$0xff] %v3824_v26 }
  0x19   :  { %4846 = vst [vmem:[#allocation39_spill] sm:$0xff] %v3829_v27 }
  0x1a   :  { %4847 = vst [vmem:[#allocation40_spill] sm:$0xff] %v3854_v32 }
  0x1b   :  { %4848 = vst [vmem:[#allocation41_spill] sm:$0xff] %v3859_v33 }
  0x1c   :  { %4849 = vst [vmem:[#allocation42_spill] sm:$0xff] %v3864_v34 }
  0x1d   :  { %4850 = vst [vmem:[#allocation43_spill] sm:$0xff] %v3869_v35 }
  0x1e   :  { %4851 = vst [vmem:[#allocation44_spill] sm:$0xff] %v3874_v36 }
  0x1f   :  { %4852 = vst [vmem:[#allocation45_spill] sm:$0xff] %v3879_v37 }
  0x20   :  { %4853 = vst [vmem:[#allocation46_spill] sm:$0xff] %v3884_v38 }
  0x21   :  { %4854 = vst [vmem:[#allocation47_spill] sm:$0xff] %v3889_v39 }
  0x22   :  { %4855 = vst [vmem:[#allocation48_spill] sm:$0xff] %v3894_v40 }
  0x23   :  { %4856 = vst [vmem:[#allocation49_spill] sm:$0xff] %v3899_v41 }
  0x24   :  { %4857 = vst [vmem:[#allocation50_spill] sm:$0xff] %v3904_v42 }
  0x25   :  { %4858 = vst [vmem:[#allocation51_spill] sm:$0xff] %v3909_v43 }
  0x26   :  { %4859 = vst [vmem:[#allocation52_spill] sm:$0xff] %v3934_v48 }
  0x27   :  { %4860 = vst [vmem:[#allocation53_spill] sm:$0xff] %v3939_v49 }
  0x28   :  { %4861 = vst [vmem:[#allocation54_spill] sm:$0xff] %v3944_v50 }
  0x29   :  { %4862 = vst [vmem:[#allocation55_spill] sm:$0xff] %v3949_v51 }
  0x2a   :  { %4863 = vst [vmem:[#allocation56_spill] sm:$0xff] %v3954_v52 }
  0x2b   :  { %4864 = vst [vmem:[#allocation57_spill] sm:$0xff] %v3959_v53 }
  0x2c   :  { %4865 = vst [vmem:[#allocation58_spill] sm:$0xff] %v3964_v54 }
  0x2d   :  { %4866 = vst [vmem:[#allocation59_spill] sm:$0xff] %v3969_v55 }
  0x2e   :  { %4867 = vst [vmem:[#allocation60_spill] sm:$0xff] %v3974_v56 }
  0x2f   :  { %4868 = vst [vmem:[#allocation61_spill] sm:$0xff] %v3979_v57 }
  0x30   :  { %4869 = vst [vmem:[#allocation62_spill] sm:$0xff] %v3984_v58 }
  0x31   :  { %4870 = vst [vmem:[#allocation63_spill] sm:$0xff] %v3989_v59 }
  0x32   :  { %201 = vsyncadd [#allocation5 + $0x1], 8192  ;;  %v213_v16 = vld [vmem:[%s4807_s1 + $0x18] sm:$0xff]  ;;  %v212_v48 = vld [vmem:[%s4807_s1 + $0x10] sm:$0xff]  ;;  %vm218_vm0 = vcmask 261120   ;;  %v4821_v33 = vmov 0.0  }
  0x33   :  { %255 = vmatpush.msra.mxu0 %v213_v16  ;;  %v4020_v0 = vld [vmem:[%s4808_s2 + $0x18] sm:$0xff]  ;;  %v4025_v32 = vld [vmem:[%s4808_s2 + $0x10] sm:$0xff]  ;;  %v211_v17 = vld [vmem:[%s4807_s1 + $0x8] sm:$0xff]  ;;  %s3610_s27 = smov 64   ;;  %s3611_s28 = smov 32  }
  0x34   :  { %327 = vmatpush.msra.mxu1 %v4020_v0  ;;  %v4034_v16 = vld [vmem:[%s4808_s2 + $0x8] sm:$0xff]  ;;  %v210_v49 = vld [vmem:[%s4807_s1] sm:$0xff] }
  0x35   :  { %256 = vmatpush.msra.mxu0 %v212_v48  ;;  %v202_v1 = vld [vmem:[%s4806_s0] sm:$0xff] }
  0x36   :  { %328 = vmatpush.msra.mxu1 %v4025_v32  ;;  %v4046_v48 = vld [vmem:[%s4808_s2] sm:$0xff] }
  0x37   :  { %257 = vmatpush.msra.mxu0 %v211_v17  ;;  %v4055_v17 = vld [vmem:[%s4809_s3] ss:$0 sm:$0xff] }
  0x38   :  { %329 = vmatpush.msra.mxu1 %v4034_v16  ;;  %v4127_v53 = vld [vmem:[%s4812_s6] ss:$0 sm:$0xff] }
  0x39   :  { %258 = vmatpush.msra.mxu0 %v210_v49 }
  0x3a   :  { %3227 = vmatmul.msk.f32.vlgmr.msra.gmra.mxu0 %vm218_vm0, %v202_v1  ;;  %330 = vmatpush.msra.mxu1 %v4046_v48 }
  0x3b   :  { %331 = vmatmul.f32.vlgmr.msra.gmra.mxu1 %v4821_v33 }
  0xb7   :  { %v260_v18 = vpop.f32.mrf.mxu0 }
  0xb8   :  { %v261_v50 = vadd.f32 %v4055_v17, %v260_v18  ;;  %v332_v2 = vpop.f32.mrf.mxu1 }
  0xba   :  { %v335_v34 = vadd.f32 %v332_v2, %v261_v50 }
  0xbc   :  { %3338 = vtanh.f32 %v335_v34  ;;  %v3235_v1 = vmul.f32 -1.442695, %v335_v34 }
  0xbe   :  { %3340 = vpow2.f32 %v3235_v1 }
  0xc2   :  { %v3339_v19 = vpop.eup %3338 }
  0xc3   :  { %358 = vrot.lane.b32.xlu0 %v3339_v19, %s3610_s27 }
  0xc4   :  { %v3341_v49 = vpop.eup %3340 }
  0xc5   :  { %v339_v51 = vadd.f32 1.0, %v3341_v49 }
  0xc7   :  { %3342 = vrcp.f32 %v339_v51  ;;  %v351_v4 = vand.u32 2147483648, %v339_v51  ;;  %vm345_vm2 = vweird.f32 %v339_v51  ;;  %v349_v18 = vand.u32 2147483647, %v339_v51 }
  0xc9   :  { %v352_v50 = vor.u32 1.1754944e-38, %v351_v4  ;;  %vm350_vm4 = vcmp.eq.f32.partialorder %v349_v18, 8.507059e+37  ;;  %v4067_v4 = vld [vmem:[%s4811_s5 + $0x18] sm:$0xff]  ;;  %v4106_v18 = vld [vmem:[%s4810_s4] sm:$0xff] }
  0xca   :  { %385 = vmatpush.msra.mxu2 %v4067_v4 }
  0xcd   :  { %v3343_v33 = vpop.eup %3342 }
  0xce   :  { %v341_v3 = vmul.f32 %v3343_v33, %v339_v51  ;;  %vm346_vm1 = vweird.f32 %v3343_v33  ;;  %v4094_v51 = vld [vmem:[%s4810_s4 + $0x8] sm:$0xff] }
  0xcf   :  { %vm347_vm3 = vmor %vm345_vm2, %vm346_vm1 }
  0xd0   :  { %v342_v35 = vsub.f32 1.0, %v341_v3 }
  0xd2   :  { %v343_v20 = vmul.f32 %v3343_v33, %v342_v35  ;;  %v4084_v35 = vld [vmem:[%s4810_s4 + $0x10] sm:$0xff] }
  0xd4   :  { %v344_v52 = vadd.f32 %v3343_v33, %v343_v20  ;;  %v4072_v20 = vld [vmem:[%s4810_s4 + $0x18] sm:$0xff] }
  0xd5   :  { %410 = vmatpush.msra.mxu3 %v4072_v20 }
  0xd6   :  { %v348_v2 = vsel %vm347_vm3, %v3343_v33, %v344_v52  ;;  %v4077_v33 = vld [vmem:[%s4811_s5 + $0x10] sm:$0xff]  ;;  %v4101_v52 = vld [vmem:[%s4811_s5] sm:$0xff] }
  0xd7   :  { %v353_v19 = vsel %vm350_vm4, %v352_v50, %v348_v2  ;;  %386 = vmatpush.msra.mxu2 %v4077_v33  ;;  %411 = vmatpush.msra.mxu3 %v4084_v35  ;;  %v4871_v2 = vmov 0.0  }
  0xd8   :  { %v356_v1 = vmul.f32 0.0, %v353_v19 }
  0xd9   :  { %412 = vmatpush.msra.mxu3 %v4094_v51 }
  0xdb   :  { %413 = vmatpush.msra.mxu3 %v4106_v18 }
  0xdd   :  { %556 = vmatpush.msrb.mxu3 %v4020_v0 }
  0xdf   :  { %557 = vmatpush.msrb.mxu3 %v4025_v32 }
  0xe1   :  { %558 = vmatpush.msrb.mxu3 %v4034_v16 }
  0xe3   :  { %559 = vmatpush.msrb.mxu3 %v4046_v48 }
 0x135   :  { %v359_v36 = vpop.permute.xlu0 %358 }
 0x136   :  { %v361_v34 = vmul.f32 %v359_v36, %v353_v19  ;;  %v4089_v36 = vld [vmem:[%s4811_s5 + $0x8] sm:$0xff] }
 0x137   :  { %387 = vmatpush.msra.mxu2 %v4089_v36 }
 0x138   :  { %363 = vrot.lane.b32.xlu0 %v361_v34, %s3611_s28 }
 0x139   :  { %388 = vmatpush.msra.mxu2 %v4101_v52 }
 0x13a   :  { %389 = vmatmul.f32.vlgmr.msra.gmra.mxu2 %v4871_v2 }
 0x1aa   :  { %v364_v49 = vpop.permute.xlu0 %363 }
 0x1ab   :  { %v4060_v21 = vadd.f32 %v364_v49, %v356_v1  ;;  %v203_v1 = vld [vmem:[%s4806_s0 + $0x8] sm:$0xff] }
 0x1ac   :  { %3228 = vmatmul.msk.f32.gmra.mxu0 %vm218_vm0, %v203_v1 }
 0x1ad   :  { %3344 = vtanh.f32 %v4060_v21 }
 0x1b3   :  { %v3345_v3 = vpop.eup %3344 }
 0x1b4   :  { %369 = vrot.lane.b32.xlu1 %v3345_v3, %s3610_s27 }
 0x1bd   :  { %v390_v3 = vpop.f32.mrf.mxu2 }
 0x226   :  { %v370_v50 = vpop.permute.xlu1 %369 }
 0x227   :  { %v372_v34 = vmul.f32 %v370_v50, %v353_v19 }
 0x229   :  { %394 = vrot.lane.b32.xlu1 %v372_v34, %s3611_s28  ;;  %v263_v34 = vpop.f32.mrf.mxu0 }
 0x22a   :  { %v264_v37 = vadd.f32 %v4055_v17, %v263_v34 }
 0x29b   :  { %v395_v49 = vpop.permute.xlu1 %394 }
 0x29c   :  { %3236 = vmatmul.msk.f32.vlgmr.msra.gmra.mxu3 %vm218_vm0, %v395_v49 }
 0x2a4   :  { %3240 = vmatmul.msk.f32.vlgmr.msrb.gmra.mxu3 %vm218_vm0, %v395_v49 }
 0x31f   :  { %v415_v19 = vpop.f32.mrf.mxu3 }
 0x320   :  { %v416_v50 = vadd.f32 %v415_v19, %v390_v3 }
 0x322   :  { %v418_v5 = vadd.f32 %v4127_v53, %v416_v50 }
 0x324   :  { %3346 = vtanh.f32 %v418_v5  ;;  %v3237_v6 = vmul.f32 -1.442695, %v418_v5 }
 0x327   :  { %v561_v1 = vpop.f32.mrf.mxu3 }
 0x328   :  { %v564_v22 = vadd.f32 %v561_v1, %v264_v37 }
 0x32a   :  { %v3347_v54 = vpop.eup %3346  ;;  %3348 = vtanh.f32 %v564_v22  ;;  %v3241_v38 = vmul.f32 -1.442695, %v564_v22 }
 0x32b   :  { %441 = vrot.lane.b32.xlu2 %v3347_v54, %s3610_s27  ;;  %3350 = vpow2.f32 %v3237_v6 }
 0x32c   :  { %3352 = vpow2.f32 %v3241_v38 }
 0x330   :  { %v3349_v49 = vpop.eup %3348 }
 0x331   :  { %v3351_v23 = vpop.eup %3350 }
 0x332   :  { %v422_v3 = vadd.f32 1.0, %v3351_v23  ;;  %v3353_v19 = vpop.eup %3352 }
 0x333   :  { %587 = vrot.lane.b32.xlu2 %v3349_v49, %s3610_s27  ;;  %v568_v50 = vadd.f32 1.0, %v3353_v19 }
 0x334   :  { %3354 = vrcp.f32 %v422_v3  ;;  %v434_v49 = vand.u32 2147483648, %v422_v3  ;;  %vm428_vm6 = vweird.f32 %v422_v3  ;;  %v432_v5 = vand.u32 2147483647, %v422_v3 }
 0x335   :  { %3356 = vrcp.f32 %v568_v50  ;;  %vm574_vm10 = vweird.f32 %v568_v50 }
 0x336   :  { %v435_v23 = vor.u32 1.1754944e-38, %v434_v49  ;;  %vm433_vm8 = vcmp.eq.f32.partialorder %v432_v5, 8.507059e+37 }
 0x33a   :  { %v3355_v55 = vpop.eup %3354 }
 0x33b   :  { %v424_v34 = vmul.f32 %v3355_v55, %v422_v3  ;;  %v3357_v1 = vpop.eup %3356  ;;  %vm429_vm5 = vweird.f32 %v3355_v55 }
 0x33c   :  { %v570_v54 = vmul.f32 %v3357_v1, %v568_v50  ;;  %vm430_vm7 = vmor %vm428_vm6, %vm429_vm5  ;;  %vm575_vm9 = vweird.f32 %v3357_v1 }
 0x33d   :  { %v425_v37 = vsub.f32 1.0, %v424_v34  ;;  %v580_v34 = vand.u32 2147483648, %v568_v50  ;;  %vm576_vm11 = vmor %vm574_vm10, %vm575_vm9 }
 0x33e   :  { %v571_v24 = vsub.f32 1.0, %v570_v54 }
 0x33f   :  { %v426_v7 = vmul.f32 %v3355_v55, %v425_v37  ;;  %v581_v54 = vor.u32 1.1754944e-38, %v580_v34  ;;  %v4163_v34 = vld [vmem:[%s4813_s7 + $0x18] sm:$0xff] }
 0x340   :  { %v572_v22 = vmul.f32 %v3357_v1, %v571_v24  ;;  %493 = vmatpush.msrb.mxu2 %v4163_v34  ;;  %1417 = vmatpush.msrb.mxu0 %v4163_v34 }
 0x341   :  { %v427_v39 = vadd.f32 %v3355_v55, %v426_v7  ;;  %v578_v7 = vand.u32 2147483647, %v568_v50 }
 0x342   :  { %v573_v8 = vadd.f32 %v3357_v1, %v572_v22 }
 0x343   :  { %v431_v6 = vsel %vm430_vm7, %v3355_v55, %v427_v39  ;;  %vm579_vm12 = vcmp.eq.f32.partialorder %v578_v7, 8.507059e+37  ;;  %v4174_v7 = vld [vmem:[%s4814_s8 + $0x8] sm:$0xff] }
 0x344   :  { %v436_v19 = vsel %vm433_vm8, %v435_v23, %v431_v6  ;;  %v577_v37 = vsel %vm576_vm11, %v3357_v1, %v573_v8 }
 0x345   :  { %v4134_v3 = vsel %vm579_vm12, %v581_v54, %v577_v37  ;;  %v439_v55 = vmul.f32 0.0, %v436_v19  ;;  %v4182_v37 = vld [vmem:[%s4813_s7 + $0x8] sm:$0xff]  ;;  %v4188_v54 = vld [vmem:[%s4814_s8] sm:$0xff] }
 0x385   :  { %v442_v38 = vpop.permute.xlu2 %441 }
 0x386   :  { %v444_v56 = vmul.f32 %v442_v38, %v436_v19  ;;  %v4152_v38 = vld [vmem:[%s4814_s8 + $0x18] sm:$0xff] }
 0x387   :  { %468 = vmatpush.msrb.mxu1 %v4152_v38  ;;  %699 = vmatpush.msra.mxu3 %v4152_v38 }
 0x388   :  { %446 = vrot.lane.b32.xlu0 %v444_v56, %s3611_s28  ;;  %v585_v56 = vmul.f32 %v4134_v3, %v4060_v21  ;;  %v4157_v21 = vld [vmem:[%s4814_s8 + $0x10] sm:$0xff] }
 0x389   :  { %469 = vmatpush.msrb.mxu1 %v4157_v21  ;;  %700 = vmatpush.msra.mxu3 %v4157_v21 }
 0x38b   :  { %470 = vmatpush.msrb.mxu1 %v4174_v7  ;;  %701 = vmatpush.msra.mxu3 %v4174_v7 }
 0x38d   :  { %v588_v39 = vpop.permute.xlu2 %587  ;;  %471 = vmatpush.msrb.mxu1 %v4188_v54  ;;  %702 = vmatpush.msra.mxu3 %v4188_v54 }
 0x38e   :  { %v590_v24 = vmul.f32 %v588_v39, %v4134_v3  ;;  %v4196_v39 = vld [vmem:[%s4813_s7] sm:$0xff]  ;;  %472 = vmatmul.f32.vlgmr.msrb.gmra.mxu1 %v4871_v2 }
 0x38f   :  { %614 = vmatpush.msra.mxu1 %v4067_v4  ;;  %845 = vmatpush.msrb.mxu3 %v4067_v4 }
 0x390   :  { %592 = vrot.lane.b32.xlu1 %v590_v24, %s3611_s28 }
 0x391   :  { %615 = vmatpush.msra.mxu1 %v4077_v33  ;;  %846 = vmatpush.msrb.mxu3 %v4077_v33 }
 0x393   :  { %616 = vmatpush.msra.mxu1 %v4089_v36  ;;  %847 = vmatpush.msrb.mxu3 %v4089_v36 }
 0x395   :  { %617 = vmatpush.msra.mxu1 %v4101_v52  ;;  %848 = vmatpush.msrb.mxu3 %v4101_v52 }
 0x397   :  { %724 = vmatpush.msrb.mxu1 %v4163_v34 }
 0x3fa   :  { %v447_v49 = vpop.permute.xlu0 %446 }
 0x3fb   :  { %v4138_v5 = vadd.f32 %v447_v49, %v439_v55  ;;  %v204_v55 = vld [vmem:[%s4806_s0 + $0x10] sm:$0xff] }
 0x3fc   :  { %3229 = vmatmul.msk.f32.gmra.mxu0 %vm218_vm0, %v204_v55 }
 0x3fd   :  { %3358 = vtanh.f32 %v4138_v5 }
 0x402   :  { %v593_v50 = vpop.permute.xlu1 %592 }
 0x403   :  { %v3359_v8 = vpop.eup %3358  ;;  %v4143_v1 = vadd.f32 %v593_v50, %v585_v56  ;;  %v4255_v50 = vld [vmem:[%s4815_s9] ss:$0 sm:$0xff] }
 0x404   :  { %452 = vrot.lane.b32.xlu2 %v3359_v8, %s3610_s27 }
 0x405   :  { %3360 = vtanh.f32 %v4143_v1 }
 0x40b   :  { %v3361_v6 = vpop.eup %3360  ;;  %v473_v56 = vpop.f32.mrf.mxu1 }
 0x40c   :  { %598 = vrot.lane.b32.xlu0 %v3361_v6, %s3610_s27 }
 0x45e   :  { %v453_v22 = vpop.permute.xlu2 %452 }
 0x45f   :  { %v455_v23 = vmul.f32 %v453_v22, %v436_v19  ;;  %v4168_v19 = vld [vmem:[%s4813_s7 + $0x10] sm:$0xff] }
 0x460   :  { %494 = vmatpush.msrb.mxu2 %v4168_v19  ;;  %1418 = vmatpush.msrb.mxu0 %v4168_v19 }
 0x461   :  { %477 = vrot.lane.b32.xlu1 %v455_v23, %s3611_s28  ;;  %725 = vmatpush.msrb.mxu1 %v4168_v19 }
 0x462   :  { %495 = vmatpush.msrb.mxu2 %v4182_v37  ;;  %1419 = vmatpush.msrb.mxu0 %v4182_v37 }
 0x463   :  { %726 = vmatpush.msrb.mxu1 %v4182_v37 }
 0x464   :  { %496 = vmatpush.msrb.mxu2 %v4196_v39  ;;  %1420 = vmatpush.msrb.mxu0 %v4196_v39 }
 0x465   :  { %727 = vmatpush.msrb.mxu1 %v4196_v39 }
 0x466   :  { %639 = vmatpush.msra.mxu2 %v4072_v20  ;;  %1623 = vmatpush.msra.mxu0 %v4152_v38 }
 0x468   :  { %640 = vmatpush.msra.mxu2 %v4084_v35  ;;  %1624 = vmatpush.msra.mxu0 %v4157_v21 }
 0x46a   :  { %641 = vmatpush.msra.mxu2 %v4094_v51  ;;  %1625 = vmatpush.msra.mxu0 %v4174_v7 }
 0x46c   :  { %642 = vmatpush.msra.mxu2 %v4106_v18  ;;  %1626 = vmatpush.msra.mxu0 %v4188_v54 }
 0x479   :  { %v266_v55 = vpop.f32.mrf.mxu0 }
 0x47a   :  { %v267_v40 = vadd.f32 %v4055_v17, %v266_v55 }
 0x47e   :  { %v599_v2 = vpop.permute.xlu0 %598 }
 0x47f   :  { %v601_v24 = vmul.f32 %v599_v2, %v4134_v3 }
 0x481   :  { %623 = vrot.lane.b32.xlu2 %v601_v24, %s3611_s28 }
 0x4d3   :  { %v478_v49 = vpop.permute.xlu1 %477 }
 0x4d4   :  { %3238 = vmatmul.msk.f32.vlgmr.msrb.gmra.mxu2 %vm218_vm0, %v478_v49  ;;  %3242 = vmatmul.msk.f32.vlgmr.msra.gmra.mxu1 %vm218_vm0, %v478_v49 }
 0x4d5   :  { %787 = vmatpush.msrb.mxu2 %v4020_v0  ;;  %870 = vmatpush.msra.mxu1 %v4072_v20 }
 0x4d7   :  { %788 = vmatpush.msrb.mxu2 %v4025_v32  ;;  %871 = vmatpush.msra.mxu1 %v4084_v35 }
 0x4d9   :  { %789 = vmatpush.msrb.mxu2 %v4034_v16  ;;  %872 = vmatpush.msra.mxu1 %v4094_v51 }
 0x4db   :  { %v624_v3 = vpop.permute.xlu2 %623  ;;  %790 = vmatpush.msrb.mxu2 %v4046_v48  ;;  %873 = vmatpush.msra.mxu1 %v4106_v18 }
 0x4dc   :  { %3243 = vmatmul.msk.f32.vlgmr.msra.gmra.mxu2 %vm218_vm0, %v624_v3 }
 0x4dd   :  { %930 = vmatpush.msra.mxu2 %v4152_v38 }
 0x4df   :  { %931 = vmatpush.msra.mxu2 %v4157_v21 }
 0x4e1   :  { %932 = vmatpush.msra.mxu2 %v4174_v7 }
 0x4e3   :  { %933 = vmatpush.msra.mxu2 %v4188_v54 }
 0x4e4   :  { %3248 = vmatmul.msk.f32.vlgmr.msrb.gmra.mxu2 %vm218_vm0, %v624_v3 }
 0x4e5   :  { %1076 = vmatpush.msrb.mxu2 %v4067_v4 }
 0x4e7   :  { %1077 = vmatpush.msrb.mxu2 %v4077_v33 }
 0x4e9   :  { %1078 = vmatpush.msrb.mxu2 %v4089_v36 }
 0x4eb   :  { %1079 = vmatpush.msrb.mxu2 %v4101_v52 }
 0x551   :  { %v619_v23 = vpop.f32.mrf.mxu1 }
 0x557   :  { %v498_v8 = vpop.f32.mrf.mxu2 }
 0x558   :  { %v499_v6 = vadd.f32 %v498_v8, %v473_v56 }
 0x55a   :  { %v501_v22 = vadd.f32 %v4255_v50, %v499_v6 }
 0x55c   :  { %3362 = vtanh.f32 %v501_v22 }
 0x55f   :  { %v644_v2 = vpop.f32.mrf.mxu2 }
 0x560   :  { %v645_v24 = vadd.f32 %v644_v2, %v619_v23  ;;  %v3239_v23 = vmul.f32 -1.442695, %v501_v22 }
 0x562   :  { %v3363_v49 = vpop.eup %3362  ;;  %v647_v3 = vadd.f32 %v4127_v53, %v645_v24 }
 0x563   :  { %524 = vrot.lane.b32.xlu0 %v3363_v49, %s3610_s27 }
 0x564   :  { %3364 = vtanh.f32 %v647_v3  ;;  %v3244_v24 = vmul.f32 -1.442695, %v647_v3 }
 0x567   :  { %v792_v25 = vpop.f32.mrf.mxu2 }
 0x568   :  { %v795_v57 = vadd.f32 %v792_v25, %v267_v40 }
 0x56a   :  { %v3365_v9 = vpop.eup %3364  ;;  %3366 = vtanh.f32 %v795_v57  ;;  %v3249_v8 = vmul.f32 -1.442695, %v795_v57 }
 0x56b   :  { %670 = vrot.lane.b32.xlu1 %v3365_v9, %s3610_s27 }
 0x56c   :  { %3368 = vpow2.f32 %v3249_v8 }
 0x56d   :  { %3370 = vpow2.f32 %v3239_v23 }
 0x570   :  { %v3367_v56 = vpop.eup %3366 }
 0x571   :  { %818 = vrot.lane.b32.xlu2 %v3367_v56, %s3610_s27 }
 0x572   :  { %v3369_v6 = vpop.eup %3368 }
 0x573   :  { %v799_v2 = vadd.f32 1.0, %v3369_v6  ;;  %v3371_v49 = vpop.eup %3370 }
 0x574   :  { %v505_v41 = vadd.f32 1.0, %v3371_v49 }
 0x575   :  { %3372 = vrcp.f32 %v799_v2  ;;  %v811_v22 = vand.u32 2147483648, %v799_v2  ;;  %vm805_vm14 = vweird.f32 %v799_v2  ;;  %v809_v8 = vand.u32 2147483647, %v799_v2 }
 0x576   :  { %3374 = vpow2.f32 %v3244_v24  ;;  %v517_v59 = vand.u32 2147483648, %v505_v41  ;;  %vm511_vm3 = vweird.f32 %v505_v41  ;;  %v515_v11 = vand.u32 2147483647, %v505_v41 }
 0x577   :  { %3376 = vrcp.f32 %v505_v41  ;;  %v812_v24 = vor.u32 1.1754944e-38, %v811_v22  ;;  %vm810_vm1 = vcmp.eq.f32.partialorder %v809_v8, 8.507059e+37 }
 0x578   :  { %v518_v43 = vor.u32 1.1754944e-38, %v517_v59  ;;  %vm516_vm5 = vcmp.eq.f32.partialorder %v515_v11, 8.507059e+37 }
 0x57b   :  { %v3373_v55 = vpop.eup %3372 }
 0x57c   :  { %v801_v25 = vmul.f32 %v3373_v55, %v799_v2  ;;  %v3375_v40 = vpop.eup %3374  ;;  %vm806_vm13 = vweird.f32 %v3373_v55 }
 0x57d   :  { %v651_v9 = vadd.f32 1.0, %v3375_v40  ;;  %v3377_v58 = vpop.eup %3376  ;;  %vm807_vm15 = vmor %vm805_vm14, %vm806_vm13 }
 0x57e   :  { %v802_v26 = vsub.f32 1.0, %v801_v25  ;;  %v507_v57 = vmul.f32 %v3377_v58, %v505_v41  ;;  %vm512_vm2 = vweird.f32 %v3377_v58 }
 0x57f   :  { %3378 = vrcp.f32 %v651_v9  ;;  %vm513_vm4 = vmor %vm511_vm3, %vm512_vm2  ;;  %vm657_vm7 = vweird.f32 %v651_v9 }
 0x580   :  { %v803_v10 = vmul.f32 %v3373_v55, %v802_v26  ;;  %v508_v6 = vsub.f32 1.0, %v507_v57 }
 0x582   :  { %v804_v56 = vadd.f32 %v3373_v55, %v803_v10  ;;  %v509_v49 = vmul.f32 %v3377_v58, %v508_v6  ;;  %v663_v6 = vand.u32 2147483648, %v651_v9 }
 0x584   :  { %v808_v23 = vsel %vm807_vm15, %v3373_v55, %v804_v56  ;;  %v510_v26 = vadd.f32 %v3377_v58, %v509_v49 }
 0x585   :  { %v3379_v3 = vpop.eup %3378  ;;  %v813_v25 = vsel %vm810_vm1, %v812_v24, %v808_v23  ;;  %v664_v23 = vor.u32 1.1754944e-38, %v663_v6 }
 0x586   :  { %v653_v42 = vmul.f32 %v3379_v3, %v651_v9  ;;  %v514_v2 = vsel %vm513_vm4, %v3377_v58, %v510_v26  ;;  %vm658_vm6 = vweird.f32 %v3379_v3  ;;  %v816_v11 = vmul.f32 %v813_v25, %v4143_v1 }
 0x587   :  { %v519_v56 = vsel %vm516_vm5, %v518_v43, %v514_v2  ;;  %vm659_vm8 = vmor %vm657_vm7, %vm658_vm6 }
 0x588   :  { %v654_v10 = vsub.f32 1.0, %v653_v42 }
 0x58a   :  { %v655_v57 = vmul.f32 %v3379_v3, %v654_v10 }
 0x58c   :  { %v656_v8 = vadd.f32 %v3379_v3, %v655_v57 }
 0x58e   :  { %v660_v42 = vsel %vm659_vm8, %v3379_v3, %v656_v8 }
 0x5cb   :  { %v819_v27 = vpop.permute.xlu2 %818 }
 0x5cc   :  { %v821_v40 = vmul.f32 %v819_v27, %v813_v25  ;;  %v661_v27 = vand.u32 2147483647, %v651_v9  ;;  %v522_v9 = vmul.f32 0.0, %v519_v56 }
 0x5ce   :  { %823 = vrot.lane.b32.xlu2 %v821_v40, %s3611_s28  ;;  %vm662_vm9 = vcmp.eq.f32.partialorder %v661_v27, 8.507059e+37 }
 0x5cf   :  { %v665_v24 = vsel %vm662_vm9, %v664_v23, %v660_v42  ;;  %v205_v42 = vld [vmem:[%s4806_s0 + $0x18] sm:$0xff] }
 0x5d0   :  { %v668_v26 = vmul.f32 %v665_v24, %v4138_v5  ;;  %3230 = vmatmul.msk.f32.gmra.mxu0 %vm218_vm0, %v205_v42 }
 0x5d5   :  { %v525_v55 = vpop.permute.xlu0 %524 }
 0x5d6   :  { %v527_v22 = vmul.f32 %v525_v55, %v519_v56 }
 0x5d8   :  { %529 = vrot.lane.b32.xlu0 %v527_v22, %s3611_s28 }
 0x5dd   :  { %v671_v41 = vpop.permute.xlu1 %670 }
 0x5de   :  { %v673_v58 = vmul.f32 %v671_v41, %v665_v24 }
 0x5e0   :  { %675 = vrot.lane.b32.xlu1 %v673_v58, %s3611_s28 }
 0x628   :  { %v824_v43 = vpop.permute.xlu2 %823 }
 0x629   :  { %v4267_v59 = vadd.f32 %v824_v43, %v816_v11 }
 0x62b   :  { %3380 = vtanh.f32 %v4267_v59 }
 0x631   :  { %v3381_v49 = vpop.eup %3380 }
 0x632   :  { %829 = vrot.lane.b32.xlu2 %v3381_v49, %s3610_s27 }
 0x64a   :  { %v530_v40 = vpop.permute.xlu0 %529 }
 0x64b   :  { %v4271_v3 = vadd.f32 %v530_v40, %v522_v9 }
 0x64d   :  { %3382 = vtanh.f32 %v4271_v3  ;;  %v269_v40 = vpop.f32.mrf.mxu0 }
 0x652   :  { %v676_v10 = vpop.permute.xlu1 %675 }
 0x653   :  { %v3383_v2 = vpop.eup %3382  ;;  %v4275_v57 = vadd.f32 %v676_v10, %v668_v26 }
 0x654   :  { %535 = vrot.lane.b32.xlu0 %v3383_v2, %s3610_s27 }
 0x655   :  { %3384 = vtanh.f32 %v4275_v57 }
 0x65b   :  { %v3385_v1 = vpop.eup %3384 }
 0x65c   :  { %681 = vrot.lane.b32.xlu1 %v3385_v1, %s3610_s27 }
 0x68c   :  { %v830_v55 = vpop.permute.xlu2 %829 }
 0x68d   :  { %v832_v22 = vmul.f32 %v830_v55, %v813_v25 }
 0x68f   :  { %854 = vrot.lane.b32.xlu2 %v832_v22, %s3611_s28 }
 0x6c6   :  { %v536_v8 = vpop.permute.xlu0 %535 }
 0x6c7   :  { %v538_v6 = vmul.f32 %v536_v8, %v519_v56 }
 0x6c9   :  { %540 = vrot.lane.b32.xlu0 %v538_v6, %s3611_s28 }
 0x6ce   :  { %v682_v5 = vpop.permute.xlu1 %681 }
 0x6cf   :  { %v684_v27 = vmul.f32 %v682_v5, %v665_v24 }
 0x6d1   :  { %708 = vrot.lane.b32.xlu1 %v684_v27, %s3611_s28 }
 0x6e9   :  { %v855_v56 = vpop.permute.xlu2 %854 }
 0x73b   :  { %v541_v23 = vpop.permute.xlu0 %540 }
 0x73c   :  { %543 = vst.msk [vmem:[#allocation2] sm:$0xff] %vm218_vm0, %v541_v23  ;;  %3245 = vmatmul.msk.f32.vlgmr.msra.gmra.mxu3 %vm218_vm0, %v541_v23 }
 0x73d   :  { %955 = vmatpush.msra.mxu3 %v4163_v34 }
 0x73f   :  { %956 = vmatpush.msra.mxu3 %v4168_v19 }
 0x741   :  { %957 = vmatpush.msra.mxu3 %v4182_v37 }
 0x743   :  { %v709_v25 = vpop.permute.xlu1 %708  ;;  %958 = vmatpush.msra.mxu3 %v4196_v39 }
 0x744   :  { %3246 = vmatmul.msk.f32.vlgmr.msrb.gmra.mxu1 %vm218_vm0, %v709_v25  ;;  %3250 = vmatmul.msk.f32.vlgmr.msrb.gmra.mxu3 %vm218_vm0, %v709_v25 }
 0x745   :  { %1018 = vmatpush.msrb.mxu1 %v4020_v0  ;;  %1101 = vmatpush.msrb.mxu3 %v4072_v20 }
 0x747   :  { %1019 = vmatpush.msrb.mxu1 %v4025_v32  ;;  %1102 = vmatpush.msrb.mxu3 %v4084_v35 }
 0x749   :  { %1020 = vmatpush.msrb.mxu1 %v4034_v16  ;;  %1103 = vmatpush.msrb.mxu3 %v4094_v51 }
 0x74b   :  { %1021 = vmatpush.msrb.mxu1 %v4046_v48  ;;  %1104 = vmatpush.msrb.mxu3 %v4106_v18 }
 0x74c   :  { %3251 = vmatmul.msk.f32.vlgmr.msra.gmra.mxu1 %vm218_vm0, %v855_v56 }
 0x74d   :  { %1161 = vmatpush.msra.mxu1 %v4152_v38 }
 0x74f   :  { %1162 = vmatpush.msra.mxu1 %v4157_v21 }
 0x751   :  { %1163 = vmatpush.msra.mxu1 %v4174_v7 }
 0x753   :  { %1164 = vmatpush.msra.mxu1 %v4188_v54 }
 0x754   :  { %3256 = vmatmul.msk.f32.vlgmr.msrb.gmra.mxu1 %vm218_vm0, %v855_v56 }
 0x755   :  { %1307 = vmatpush.msrb.mxu1 %v4067_v4  ;;  %v270_v4 = vadd.f32 %v4055_v17, %v269_v40 }
 0x757   :  { %1308 = vmatpush.msrb.mxu1 %v4077_v33 }
 0x759   :  { %1309 = vmatpush.msrb.mxu1 %v4089_v36 }
 0x75b   :  { %1310 = vmatpush.msrb.mxu1 %v4101_v52 }
 0x7bf   :  { %v704_v41 = vpop.f32.mrf.mxu3 }
 0x7c1   :  { %v729_v24 = vpop.f32.mrf.mxu1 }
 0x7c2   :  { %v730_v58 = vadd.f32 %v729_v24, %v704_v41 }
 0x7c4   :  { %v732_v11 = vadd.f32 %v4255_v50, %v730_v58 }
 0x7c6   :  { %3386 = vtanh.f32 %v732_v11  ;;  %v3247_v22 = vmul.f32 -1.442695, %v732_v11 }
 0x7c7   :  { %v850_v43 = vpop.f32.mrf.mxu3 }
 0x7c9   :  { %v875_v49 = vpop.f32.mrf.mxu1 }
 0x7ca   :  { %v876_v9 = vadd.f32 %v875_v49, %v850_v43 }
 0x7cc   :  { %v3387_v26 = vpop.eup %3386  ;;  %v878_v10 = vadd.f32 %v4127_v53, %v876_v9 }
 0x7cd   :  { %755 = vrot.lane.b32.xlu0 %v3387_v26, %s3610_s27 }
 0x7ce   :  { %3388 = vtanh.f32 %v878_v10  ;;  %v3252_v6 = vmul.f32 -1.442695, %v878_v10 }
 0x7d1   :  { %v1023_v33 = vpop.f32.mrf.mxu1 }
 0x7d2   :  { %v1026_v36 = vadd.f32 %v1023_v33, %v270_v4 }
 0x7d4   :  { %v3389_v52 = vpop.eup %3388  ;;  %3390 = vtanh.f32 %v1026_v36  ;;  %v3257_v1 = vmul.f32 -1.442695, %v1026_v36 }
 0x7d5   :  { %901 = vrot.lane.b32.xlu1 %v3389_v52, %s3610_s27 }
 0x7d6   :  { %3392 = vpow2.f32 %v3257_v1 }
 0x7d7   :  { %3394 = vpow2.f32 %v3247_v22 }
 0x7da   :  { %v3391_v2 = vpop.eup %3390 }
 0x7db   :  { %1049 = vrot.lane.b32.xlu2 %v3391_v2, %s3610_s27 }
 0x7dc   :  { %v3393_v55 = vpop.eup %3392 }
 0x7dd   :  { %v1030_v8 = vadd.f32 1.0, %v3393_v55  ;;  %v3395_v5 = vpop.eup %3394 }
 0x7de   :  { %v736_v27 = vadd.f32 1.0, %v3395_v5 }
 0x7df   :  { %3396 = vrcp.f32 %v1030_v8  ;;  %v1042_v11 = vand.u32 2147483648, %v1030_v8  ;;  %vm1036_vm11 = vweird.f32 %v1030_v8  ;;  %v1040_v49 = vand.u32 2147483647, %v1030_v8 }
 0x7e0   :  { %3398 = vpow2.f32 %v3252_v6  ;;  %v748_v22 = vand.u32 2147483648, %v736_v27  ;;  %vm742_vm15 = vweird.f32 %v736_v27  ;;  %v746_v6 = vand.u32 2147483647, %v736_v27 }
 0x7e1   :  { %3400 = vrcp.f32 %v736_v27  ;;  %v1043_v10 = vor.u32 1.1754944e-38, %v1042_v11  ;;  %vm1041_vm13 = vcmp.eq.f32.partialorder %v1040_v49, 8.507059e+37 }
 0x7e2   :  { %vm747_vm2 = vcmp.eq.f32.partialorder %v746_v6, 8.507059e+37 }
 0x7e5   :  { %v3397_v17 = vpop.eup %3396 }
 0x7e6   :  { %v1032_v42 = vmul.f32 %v3397_v17, %v1030_v8  ;;  %v3399_v23 = vpop.eup %3398  ;;  %vm1037_vm10 = vweird.f32 %v3397_v17 }
 0x7e7   :  { %v882_v56 = vadd.f32 1.0, %v3399_v23  ;;  %v3401_v41 = vpop.eup %3400  ;;  %vm1038_vm12 = vmor %vm1036_vm11, %vm1037_vm10 }
 0x7e8   :  { %v1033_v25 = vsub.f32 1.0, %v1032_v42  ;;  %v738_v58 = vmul.f32 %v3401_v41, %v736_v27  ;;  %vm743_vm14 = vweird.f32 %v3401_v41  ;;  %v749_v42 = vor.u32 1.1754944e-38, %v748_v22 }
 0x7e9   :  { %3402 = vrcp.f32 %v882_v56  ;;  %vm744_vm1 = vmor %vm742_vm15, %vm743_vm14  ;;  %vm888_vm4 = vweird.f32 %v882_v56 }
 0x7ea   :  { %v1034_v24 = vmul.f32 %v3397_v17, %v1033_v25  ;;  %v739_v9 = vsub.f32 1.0, %v738_v58  ;;  %v894_v58 = vand.u32 2147483648, %v882_v56 }
 0x7ec   :  { %v1035_v43 = vadd.f32 %v3397_v17, %v1034_v24  ;;  %v740_v4 = vmul.f32 %v3401_v41, %v739_v9  ;;  %v895_v49 = vor.u32 1.1754944e-38, %v894_v58 }
 0x7ee   :  { %v1039_v26 = vsel %vm1038_vm12, %v3397_v17, %v1035_v43  ;;  %v741_v1 = vadd.f32 %v3401_v41, %v740_v4  ;;  %v892_v43 = vand.u32 2147483647, %v882_v56 }
 0x7ef   :  { %v3403_v40 = vpop.eup %3402  ;;  %v1044_v52 = vsel %vm1041_vm13, %v1043_v10, %v1039_v26 }
 0x7f0   :  { %v884_v33 = vmul.f32 %v3403_v40, %v882_v56  ;;  %v745_v8 = vsel %vm744_vm1, %v3401_v41, %v741_v1  ;;  %vm889_vm3 = vweird.f32 %v3403_v40  ;;  %vm893_vm6 = vcmp.eq.f32.partialorder %v892_v43, 8.507059e+37 }
 0x7f1   :  { %v750_v23 = vsel %vm747_vm2, %v749_v42, %v745_v8  ;;  %vm890_vm5 = vmor %vm888_vm4, %vm889_vm3  ;;  %v1047_v26 = vmul.f32 %v1044_v52, %v4267_v59 }
 0x7f2   :  { %v885_v55 = vsub.f32 1.0, %v884_v33  ;;  %v753_v56 = vmul.f32 %v750_v23, %v4271_v3 }
 0x7f4   :  { %v886_v5 = vmul.f32 %v3403_v40, %v885_v55 }
 0x7f6   :  { %v887_v24 = vadd.f32 %v3403_v40, %v886_v5 }
 0x7f8   :  { %v891_v11 = vsel %vm890_vm5, %v3403_v40, %v887_v24 }
 0x7f9   :  { %v896_v9 = vsel %vm893_vm6, %v895_v49, %v891_v11 }
 0x835   :  { %v1050_v36 = vpop.permute.xlu2 %1049 }
 0x836   :  { %v1052_v2 = vmul.f32 %v1050_v36, %v1044_v52 }
 0x838   :  { %1054 = vrot.lane.b32.xlu2 %v1052_v2, %s3611_s28  ;;  %v899_v2 = vmul.f32 %v896_v9, %v4275_v57 }
 0x83f   :  { %v756_v17 = vpop.permute.xlu0 %755 }
 0x840   :  { %v758_v25 = vmul.f32 %v756_v17, %v750_v23  ;;  %v206_v17 = vld [vmem:[%s4806_s0 + $0x20] sm:$0xff] }
 0x841   :  { %3231 = vmatmul.msk.f32.gmra.mxu0 %vm218_vm0, %v206_v17 }
 0x842   :  { %760 = vrot.lane.b32.xlu0 %v758_v25, %s3611_s28 }
 0x847   :  { %v902_v27 = vpop.permute.xlu1 %901 }
 0x848   :  { %v904_v41 = vmul.f32 %v902_v27, %v896_v9 }
 0x84a   :  { %906 = vrot.lane.b32.xlu1 %v904_v41, %s3611_s28 }
 0x892   :  { %v1055_v10 = vpop.permute.xlu2 %1054 }
 0x893   :  { %v4323_v4 = vadd.f32 %v1055_v10, %v1047_v26 }
 0x895   :  { %3404 = vtanh.f32 %v4323_v4 }
 0x89b   :  { %v3405_v33 = vpop.eup %3404 }
 0x89c   :  { %1060 = vrot.lane.b32.xlu2 %v3405_v33, %s3610_s27 }
 0x8b4   :  { %v761_v40 = vpop.permute.xlu0 %760 }
 0x8b5   :  { %v4328_v36 = vadd.f32 %v761_v40, %v753_v56 }
 0x8b7   :  { %3406 = vtanh.f32 %v4328_v36 }
 0x8bc   :  { %v907_v1 = vpop.permute.xlu1 %906 }
 0x8bd   :  { %v3407_v55 = vpop.eup %3406  ;;  %v4332_v59 = vadd.f32 %v907_v1, %v899_v2 }
 0x8be   :  { %766 = vrot.lane.b32.xlu0 %v3407_v55, %s3610_s27  ;;  %v272_v11 = vpop.f32.mrf.mxu0 }
 0x8bf   :  { %3408 = vtanh.f32 %v4332_v59 }
 0x8c5   :  { %v3409_v22 = vpop.eup %3408 }
 0x8c6   :  { %912 = vrot.lane.b32.xlu1 %v3409_v22, %s3610_s27 }
 0x8f6   :  { %v1061_v6 = vpop.permute.xlu2 %1060 }
 0x8f7   :  { %v1063_v3 = vmul.f32 %v1061_v6, %v1044_v52 }
 0x8f9   :  { %1085 = vrot.lane.b32.xlu2 %v1063_v3, %s3611_s28 }
 0x930   :  { %v767_v8 = vpop.permute.xlu0 %766 }
 0x931   :  { %v769_v5 = vmul.f32 %v767_v8, %v750_v23 }
 0x933   :  { %771 = vrot.lane.b32.xlu0 %v769_v5, %s3611_s28 }
 0x938   :  { %v913_v57 = vpop.permute.xlu1 %912 }
 0x939   :  { %v915_v42 = vmul.f32 %v913_v57, %v896_v9 }
 0x93b   :  { %939 = vrot.lane.b32.xlu1 %v915_v42, %s3611_s28 }
 0x953   :  { %v1086_v23 = vpop.permute.xlu2 %1085 }
 0x9a5   :  { %v772_v25 = vpop.permute.xlu0 %771 }
 0x9a6   :  { %774 = vst.msk [vmem:[#allocation2 + $0x8] sm:$0xff] %vm218_vm0, %v772_v25  ;;  %3253 = vmatmul.msk.f32.vlgmr.msra.gmra.mxu2 %vm218_vm0, %v772_v25 }
 0x9a7   :  { %1186 = vmatpush.msra.mxu2 %v4163_v34 }
 0x9a9   :  { %1187 = vmatpush.msra.mxu2 %v4168_v19 }
 0x9ab   :  { %1188 = vmatpush.msra.mxu2 %v4182_v37 }
 0x9ad   :  { %v940_v52 = vpop.permute.xlu1 %939  ;;  %1189 = vmatpush.msra.mxu2 %v4196_v39 }
 0x9ae   :  { %3254 = vmatmul.msk.f32.vlgmr.msra.gmra.mxu3 %vm218_vm0, %v940_v52  ;;  %3258 = vmatmul.msk.f32.vlgmr.msrb.gmra.mxu2 %vm218_vm0, %v940_v52 }
 0x9af   :  { %1249 = vmatpush.msra.mxu3 %v4020_v0  ;;  %1332 = vmatpush.msrb.mxu2 %v4072_v20 }
 0x9b1   :  { %1250 = vmatpush.msra.mxu3 %v4025_v32  ;;  %1333 = vmatpush.msrb.mxu2 %v4084_v35 }
 0x9b3   :  { %1251 = vmatpush.msra.mxu3 %v4034_v16  ;;  %1334 = vmatpush.msrb.mxu2 %v4094_v51 }
 0x9b5   :  { %1252 = vmatpush.msra.mxu3 %v4046_v48  ;;  %1335 = vmatpush.msrb.mxu2 %v4106_v18 }
 0x9b6   :  { %3259 = vmatmul.msk.f32.vlgmr.msrb.gmra.mxu3 %vm218_vm0, %v1086_v23 }
 0x9b7   :  { %1392 = vmatpush.msrb.mxu3 %v4152_v38 }
 0x9b9   :  { %1393 = vmatpush.msrb.mxu3 %v4157_v21 }
 0x9bb   :  { %1394 = vmatpush.msrb.mxu3 %v4174_v7 }
 0x9bd   :  { %1395 = vmatpush.msrb.mxu3 %v4188_v54 }
 0x9be   :  { %3264 = vmatmul.msk.f32.vlgmr.msra.gmra.mxu3 %vm218_vm0, %v1086_v23 }
 0x9bf   :  { %1563 = vmatpush.msra.mxu3 %v4072_v20  ;;  %v4376_v20 = vld [vmem:[%s4809_s3] ss:$0 sm:$0xff] }
 0x9c1   :  { %1564 = vmatpush.msra.mxu3 %v4084_v35  ;;  %v273_v35 = vadd.f32 %v4376_v20, %v272_v11 }
 0x9c3   :  { %1565 = vmatpush.msra.mxu3 %v4094_v51 }
 0x9c5   :  { %1566 = vmatpush.msra.mxu3 %v4106_v18 }
 0xa29   :  { %v935_v0 = vpop.f32.mrf.mxu2 }
 0xa31   :  { %v960_v32 = vpop.f32.mrf.mxu3  ;;  %v1081_v24 = vpop.f32.mrf.mxu2 }
 0xa32   :  { %v961_v16 = vadd.f32 %v960_v32, %v935_v0 }
 0xa34   :  { %v963_v48 = vadd.f32 %v4255_v50, %v961_v16 }
 0xa36   :  { %3410 = vtanh.f32 %v963_v48  ;;  %v3255_v10 = vmul.f32 -1.442695, %v963_v48 }
 0xa39   :  { %v1106_v58 = vpop.f32.mrf.mxu3 }
 0xa3a   :  { %v1107_v43 = vadd.f32 %v1106_v58, %v1081_v24 }
 0xa3c   :  { %v3411_v49 = vpop.eup %3410  ;;  %v1109_v27 = vadd.f32 %v4127_v53, %v1107_v43 }
 0xa3d   :  { %986 = vrot.lane.b32.xlu0 %v3411_v49, %s3610_s27 }
 0xa3e   :  { %3412 = vtanh.f32 %v1109_v27  ;;  %v3260_v56 = vmul.f32 -1.442695, %v1109_v27 }
 0xa41   :  { %v1254_v51 = vpop.f32.mrf.mxu3 }
 0xa42   :  { %v1257_v18 = vadd.f32 %v1254_v51, %v273_v35 }
 0xa44   :  { %v3413_v9 = vpop.eup %3412  ;;  %3414 = vtanh.f32 %v1257_v18  ;;  %v3265_v53 = vmul.f32 -1.442695, %v1257_v18 }
 0xa45   :  { %1132 = vrot.lane.b32.xlu1 %v3413_v9, %s3610_s27 }
 0xa46   :  { %3416 = vpow2.f32 %v3265_v53 }
 0xa47   :  { %3418 = vpow2.f32 %v3255_v10 }
 0xa4a   :  { %v3415_v41 = vpop.eup %3414 }
 0xa4b   :  { %1280 = vrot.lane.b32.xlu2 %v3415_v41, %s3610_s27 }
 0xa4c   :  { %v3417_v26 = vpop.eup %3416 }
 0xa4d   :  { %v1261_v33 = vadd.f32 1.0, %v3417_v26  ;;  %v3419_v40 = vpop.eup %3418 }
 0xa4e   :  { %v967_v1 = vadd.f32 1.0, %v3419_v40 }
 0xa4f   :  { %3420 = vrcp.f32 %v1261_v33  ;;  %v1273_v17 = vand.u32 2147483648, %v1261_v33  ;;  %vm1267_vm8 = vweird.f32 %v1261_v33  ;;  %v1271_v25 = vand.u32 2147483647, %v1261_v33 }
 0xa50   :  { %3422 = vpow2.f32 %v3260_v56  ;;  %v979_v27 = vand.u32 2147483648, %v967_v1  ;;  %vm973_vm12 = vweird.f32 %v967_v1  ;;  %v977_v35 = vand.u32 2147483647, %v967_v1 }
 0xa51   :  { %3424 = vrcp.f32 %v967_v1  ;;  %v1274_v32 = vor.u32 1.1754944e-38, %v1273_v17  ;;  %vm1272_vm10 = vcmp.eq.f32.partialorder %v1271_v25, 8.507059e+37 }
 0xa52   :  { %v980_v9 = vor.u32 1.1754944e-38, %v979_v27  ;;  %vm978_vm14 = vcmp.eq.f32.partialorder %v977_v35, 8.507059e+37  ;;  %v4423_v27 = vld [vmem:[%s4808_s2 + $0x8] sm:$0xff] }
 0xa55   :  { %v3421_v2 = vpop.eup %3420 }
 0xa56   :  { %v1263_v55 = vmul.f32 %v3421_v2, %v1261_v33  ;;  %v3423_v22 = vpop.eup %3422  ;;  %vm1268_vm7 = vweird.f32 %v3421_v2 }
 0xa57   :  { %v1113_v3 = vadd.f32 1.0, %v3423_v22  ;;  %v3425_v8 = vpop.eup %3424  ;;  %vm1269_vm9 = vmor %vm1267_vm8, %vm1268_vm7 }
 0xa58   :  { %v1264_v6 = vsub.f32 1.0, %v1263_v55  ;;  %v969_v57 = vmul.f32 %v3425_v8, %v967_v1  ;;  %vm974_vm11 = vweird.f32 %v3425_v8 }
 0xa59   :  { %3426 = vrcp.f32 %v1113_v3  ;;  %vm975_vm13 = vmor %vm973_vm12, %vm974_vm11  ;;  %v1125_v33 = vand.u32 2147483648, %v1113_v3  ;;  %vm1119_vm1 = vweird.f32 %v1113_v3  ;;  %v1123_v56 = vand.u32 2147483647, %v1113_v3 }
 0xa5a   :  { %v1265_v5 = vmul.f32 %v3421_v2, %v1264_v6  ;;  %v970_v52 = vsub.f32 1.0, %v969_v57 }
 0xa5b   :  { %vm1124_vm3 = vcmp.eq.f32.partialorder %v1123_v56, 8.507059e+37 }
 0xa5c   :  { %v1266_v42 = vadd.f32 %v3421_v2, %v1265_v5  ;;  %v971_v16 = vmul.f32 %v3425_v8, %v970_v52 }
 0xa5e   :  { %v1270_v0 = vsel %vm1269_vm9, %v3421_v2, %v1266_v42  ;;  %v972_v11 = vadd.f32 %v3425_v8, %v971_v16  ;;  %v1126_v2 = vor.u32 1.1754944e-38, %v1125_v33 }
 0xa5f   :  { %v3427_v23 = vpop.eup %3426  ;;  %v1275_v58 = vsel %vm1272_vm10, %v1274_v32, %v1270_v0 }
 0xa60   :  { %v1115_v48 = vmul.f32 %v3427_v23, %v1113_v3  ;;  %v976_v51 = vsel %vm975_vm13, %v3425_v8, %v972_v11  ;;  %vm1120_vm15 = vweird.f32 %v3427_v23  ;;  %v1278_v6 = vmul.f32 %v1275_v58, %v4323_v4 }
 0xa61   :  { %v981_v53 = vsel %vm978_vm14, %v980_v9, %v976_v51  ;;  %vm1121_vm2 = vmor %vm1119_vm1, %vm1120_vm15  ;;  %v4429_v51 = vld [vmem:[%s4808_s2] sm:$0xff]  ;;  %v4444_v9 = vld [vmem:[%s4811_s5 + $0x10] sm:$0xff] }
 0xa62   :  { %v1116_v49 = vsub.f32 1.0, %v1115_v48  ;;  %v984_v3 = vmul.f32 %v981_v53, %v4328_v36 }
 0xa64   :  { %v1117_v18 = vmul.f32 %v3427_v23, %v1116_v49  ;;  %v4417_v49 = vld [vmem:[%s4808_s2 + $0x10] sm:$0xff] }
 0xa66   :  { %v1118_v10 = vadd.f32 %v3427_v23, %v1117_v18  ;;  %v4437_v18 = vld [vmem:[%s4811_s5 + $0x18] sm:$0xff] }
 0xa68   :  { %v1122_v40 = vsel %vm1121_vm2, %v3427_v23, %v1118_v10 }
 0xa69   :  { %v1127_v55 = vsel %vm1124_vm3, %v1126_v2, %v1122_v40 }
 0xa6a   :  { %v1130_v25 = vmul.f32 %v1127_v55, %v4332_v59 }
 0xaa5   :  { %v1281_v24 = vpop.permute.xlu2 %1280 }
 0xaa6   :  { %v1283_v43 = vmul.f32 %v1281_v24, %v1275_v58 }
 0xaa8   :  { %1285 = vrot.lane.b32.xlu2 %v1283_v43, %s3611_s28  ;;  %v207_v43 = vld [vmem:[%s4806_s0 + $0x28] sm:$0xff] }
 0xaa9   :  { %3232 = vmatmul.msk.f32.gmra.mxu0 %vm218_vm0, %v207_v43 }
 0xaaf   :  { %v987_v41 = vpop.permute.xlu0 %986 }
 0xab0   :  { %v989_v26 = vmul.f32 %v987_v41, %v981_v53  ;;  %v4451_v41 = vld [vmem:[%s4811_s5 + $0x8] sm:$0xff] }
 0xab2   :  { %991 = vrot.lane.b32.xlu0 %v989_v26, %s3611_s28 }
 0xab7   :  { %v1133_v1 = vpop.permute.xlu1 %1132 }
 0xab8   :  { %v1135_v22 = vmul.f32 %v1133_v1, %v1127_v55 }
 0xaba   :  { %1137 = vrot.lane.b32.xlu1 %v1135_v22, %s3611_s28 }
 0xb02   :  { %v1286_v8 = vpop.permute.xlu2 %1285 }
 0xb03   :  { %v4385_v5 = vadd.f32 %v1286_v8, %v1278_v6 }
 0xb05   :  { %3428 = vtanh.f32 %v4385_v5 }
 0xb0b   :  { %v3429_v57 = vpop.eup %3428 }
 0xb0c   :  { %1291 = vrot.lane.b32.xlu2 %v3429_v57, %s3610_s27 }
 0xb24   :  { %v992_v42 = vpop.permute.xlu0 %991 }
 0xb25   :  { %v4390_v17 = vadd.f32 %v992_v42, %v984_v3 }
 0xb27   :  { %3430 = vtanh.f32 %v4390_v17 }
 0xb2c   :  { %v1138_v52 = vpop.permute.xlu1 %1137 }
 0xb2d   :  { %v3431_v23 = vpop.eup %3430  ;;  %v4394_v4 = vadd.f32 %v1138_v52, %v1130_v25 }
 0xb2e   :  { %997 = vrot.lane.b32.xlu0 %v3431_v23, %s3610_s27 }
 0xb2f   :  { %3432 = vtanh.f32 %v4394_v4 }
 0xb35   :  { %v3433_v0 = vpop.eup %3432 }
 0xb36   :  { %1143 = vrot.lane.b32.xlu1 %v3433_v0, %s3610_s27 }
 0xb66   :  { %v1292_v32 = vpop.permute.xlu2 %1291 }
 0xb67   :  { %v1294_v36 = vmul.f32 %v1292_v32, %v1275_v58  ;;  %v4411_v58 = vld [vmem:[%s4808_s2 + $0x18] sm:$0xff] }
 0xb69   :  { %1316 = vrot.lane.b32.xlu2 %v1294_v36, %s3611_s28 }
 0xba0   :  { %v998_v16 = vpop.permute.xlu0 %997 }
 0xba1   :  { %v1000_v48 = vmul.f32 %v998_v16, %v981_v53 }
 0xba3   :  { %1002 = vrot.lane.b32.xlu0 %v1000_v48, %s3611_s28 }
 0xba8   :  { %v1144_v59 = vpop.permute.xlu1 %1143 }
 0xba9   :  { %v1146_v24 = vmul.f32 %v1144_v59, %v1127_v55 }
 0xbab   :  { %1170 = vrot.lane.b32.xlu1 %v1146_v24, %s3611_s28 }
 0xbc3   :  { %v1317_v53 = vpop.permute.xlu2 %1316 }
 0xc15   :  { %v1003_v11 = vpop.permute.xlu0 %1002 }
 0xc16   :  { %1005 = vst.msk [vmem:[#allocation2 + $0x10] sm:$0xff] %vm218_vm0, %v1003_v11  ;;  %3261 = vmatmul.msk.f32.vlgmr.msra.gmra.mxu1 %vm218_vm0, %v1003_v11 }
 0xc17   :  { %1480 = vmatpush.msra.mxu1 %v4411_v58 }
 0xc19   :  { %1481 = vmatpush.msra.mxu1 %v4417_v49 }
 0xc1b   :  { %1482 = vmatpush.msra.mxu1 %v4423_v27 }
 0xc1d   :  { %v1171_v35 = vpop.permute.xlu1 %1170  ;;  %1483 = vmatpush.msra.mxu1 %v4429_v51 }
 0xc1e   :  { %3262 = vmatmul.msk.f32.vlgmr.msra.gmra.mxu2 %vm218_vm0, %v1171_v35  ;;  %3266 = vmatmul.msk.f32.vlgmr.msrb.gmra.mxu1 %vm218_vm0, %v1171_v35 }
 0xc1f   :  { %1538 = vmatpush.msra.mxu2 %v4437_v18  ;;  %1648 = vmatpush.msrb.mxu1 %v4163_v34  ;;  %v4458_v34 = vld [vmem:[%s4811_s5] sm:$0xff] }
 0xc21   :  { %1539 = vmatpush.msra.mxu2 %v4444_v9  ;;  %1649 = vmatpush.msrb.mxu1 %v4168_v19 }
 0xc23   :  { %1540 = vmatpush.msra.mxu2 %v4451_v41  ;;  %1650 = vmatpush.msrb.mxu1 %v4182_v37 }
 0xc25   :  { %1541 = vmatpush.msra.mxu2 %v4458_v34  ;;  %1651 = vmatpush.msrb.mxu1 %v4196_v39  ;;  %v275_v39 = vpop.f32.mrf.mxu0 }
 0xc26   :  { %3267 = vmatmul.msk.f32.vlgmr.msrb.gmra.mxu2 %vm218_vm0, %v1317_v53  ;;  %3272 = vmatmul.msk.f32.vlgmr.msra.gmra.mxu1 %vm218_vm0, %v1317_v53  ;;  %v276_v26 = vadd.f32 %v4376_v20, %v275_v39 }
 0xc27   :  { %1711 = vmatpush.msrb.mxu2 %v4411_v58  ;;  %1854 = vmatpush.msra.mxu1 %v4152_v38 }
 0xc29   :  { %1712 = vmatpush.msrb.mxu2 %v4417_v49  ;;  %1855 = vmatpush.msra.mxu1 %v4157_v21 }
 0xc2b   :  { %1713 = vmatpush.msrb.mxu2 %v4423_v27  ;;  %1856 = vmatpush.msra.mxu1 %v4174_v7 }
 0xc2d   :  { %1714 = vmatpush.msrb.mxu2 %v4429_v51  ;;  %1857 = vmatpush.msra.mxu1 %v4188_v54  ;;  %v4477_v54 = vld [vmem:[%s4812_s6] ss:$0 sm:$0xff] }
 0xc93   :  { %v1166_v19 = vpop.f32.mrf.mxu1 }
 0xc9b   :  { %v1312_v37 = vpop.f32.mrf.mxu1 }
 0xca1   :  { %v1191_v10 = vpop.f32.mrf.mxu2 }
 0xca2   :  { %v1192_v33 = vadd.f32 %v1191_v10, %v1166_v19 }
 0xca3   :  { %v1485_v38 = vpop.f32.mrf.mxu1 }
 0xca4   :  { %v1194_v56 = vadd.f32 %v4255_v50, %v1192_v33  ;;  %v1488_v40 = vadd.f32 %v1485_v38, %v276_v26 }
 0xca6   :  { %3434 = vtanh.f32 %v1194_v56  ;;  %v3273_v22 = vmul.f32 -1.442695, %v1488_v40  ;;  %v3263_v3 = vmul.f32 -1.442695, %v1194_v56 }
 0xca7   :  { %3436 = vtanh.f32 %v1488_v40 }
 0xca9   :  { %v1337_v21 = vpop.f32.mrf.mxu2 }
 0xcaa   :  { %v1338_v2 = vadd.f32 %v1337_v21, %v1312_v37 }
 0xcac   :  { %v3435_v7 = vpop.eup %3434  ;;  %v1340_v1 = vadd.f32 %v4477_v54, %v1338_v2 }
 0xcad   :  { %v3437_v55 = vpop.eup %3436  ;;  %1217 = vrot.lane.b32.xlu0 %v3435_v7, %s3610_s27 }
 0xcae   :  { %3438 = vtanh.f32 %v1340_v1  ;;  %1511 = vrot.lane.b32.xlu2 %v3437_v55, %s3610_s27  ;;  %v3268_v52 = vmul.f32 -1.442695, %v1340_v1 }
 0xcaf   :  { %3440 = vpow2.f32 %v3273_v22 }
 0xcb4   :  { %v3439_v50 = vpop.eup %3438 }
 0xcb5   :  { %1363 = vrot.lane.b32.xlu1 %v3439_v50, %s3610_s27  ;;  %v3441_v6 = vpop.eup %3440 }
 0xcb6   :  { %v1492_v8 = vadd.f32 1.0, %v3441_v6 }
 0xcb8   :  { %3442 = vrcp.f32 %v1492_v8  ;;  %v1504_v16 = vand.u32 2147483648, %v1492_v8  ;;  %vm1498_vm5 = vweird.f32 %v1492_v8  ;;  %v1502_v48 = vand.u32 2147483647, %v1492_v8 }
 0xcb9   :  { %3444 = vpow2.f32 %v3263_v3 }
 0xcba   :  { %3446 = vpow2.f32 %v3268_v52  ;;  %v1505_v43 = vor.u32 1.1754944e-38, %v1504_v16  ;;  %vm1503_vm7 = vcmp.eq.f32.partialorder %v1502_v48, 8.507059e+37 }
 0xcbe   :  { %v3443_v57 = vpop.eup %3442 }
 0xcbf   :  { %v1494_v42 = vmul.f32 %v3443_v57, %v1492_v8  ;;  %v3445_v23 = vpop.eup %3444  ;;  %vm1499_vm4 = vweird.f32 %v3443_v57 }
 0xcc0   :  { %v1198_v32 = vadd.f32 1.0, %v3445_v23  ;;  %v3447_v59 = vpop.eup %3446  ;;  %vm1500_vm6 = vmor %vm1498_vm5, %vm1499_vm4 }
 0xcc1   :  { %v1495_v25 = vsub.f32 1.0, %v1494_v42  ;;  %v1344_v11 = vadd.f32 1.0, %v3447_v59 }
 0xcc2   :  { %3448 = vrcp.f32 %v1198_v32  ;;  %v1210_v21 = vand.u32 2147483648, %v1198_v32  ;;  %vm1204_vm9 = vweird.f32 %v1198_v32  ;;  %v1208_v2 = vand.u32 2147483647, %v1198_v32 }
 0xcc3   :  { %v1496_v0 = vmul.f32 %v3443_v57, %v1495_v25  ;;  %3450 = vrcp.f32 %v1344_v11  ;;  %vm1350_vm13 = vweird.f32 %v1344_v11  ;;  %v1354_v3 = vand.u32 2147483647, %v1344_v11 }
 0xcc4   :  { %v1211_v55 = vor.u32 1.1754944e-38, %v1210_v21  ;;  %vm1209_vm11 = vcmp.eq.f32.partialorder %v1208_v2, 8.507059e+37  ;;  %v4524_v2 = vld [vmem:[%s4810_s4 + $0x18] sm:$0xff] }
 0xcc5   :  { %v1497_v36 = vadd.f32 %v3443_v57, %v1496_v0  ;;  %vm1355_vm15 = vcmp.eq.f32.partialorder %v1354_v3, 8.507059e+37 }
 0xcc7   :  { %v1501_v24 = vsel %vm1500_vm6, %v3443_v57, %v1497_v36  ;;  %v1356_v57 = vand.u32 2147483648, %v1344_v11 }
 0xcc8   :  { %v1506_v53 = vsel %vm1503_vm7, %v1505_v43, %v1501_v24  ;;  %v3449_v19 = vpop.eup %3448 }
 0xcc9   :  { %v1200_v39 = vmul.f32 %v3449_v19, %v1198_v32  ;;  %v3451_v10 = vpop.eup %3450  ;;  %vm1205_vm8 = vweird.f32 %v3449_v19  ;;  %v1357_v25 = vor.u32 1.1754944e-38, %v1356_v57  ;;  %v1509_v32 = vmul.f32 %v1506_v53, %v4385_v5 }
 0xcca   :  { %v1346_v38 = vmul.f32 %v3451_v10, %v1344_v11  ;;  %vm1206_vm10 = vmor %vm1204_vm9, %vm1205_vm8  ;;  %vm1351_vm12 = vweird.f32 %v3451_v10 }
 0xccb   :  { %v1201_v26 = vsub.f32 1.0, %v1200_v39  ;;  %vm1352_vm14 = vmor %vm1350_vm13, %vm1351_vm12 }
 0xccc   :  { %v1347_v40 = vsub.f32 1.0, %v1346_v38 }
 0xccd   :  { %v1202_v33 = vmul.f32 %v3449_v19, %v1201_v26  ;;  %v208_v26 = vld [vmem:[%s4806_s0 + $0x30] sm:$0xff] }
 0xcce   :  { %v1348_v1 = vmul.f32 %v3451_v10, %v1347_v40  ;;  %3233 = vmatmul.msk.f32.gmra.mxu0 %vm218_vm0, %v208_v26 }
 0xccf   :  { %v1203_v56 = vadd.f32 %v3449_v19, %v1202_v33 }
 0xcd0   :  { %v1349_v8 = vadd.f32 %v3451_v10, %v1348_v1  ;;  %v4537_v1 = vld [vmem:[%s4810_s4 + $0x10] sm:$0xff] }
 0xcd1   :  { %v1207_v7 = vsel %vm1206_vm10, %v3449_v19, %v1203_v56 }
 0xcd2   :  { %v1212_v22 = vsel %vm1209_vm11, %v1211_v55, %v1207_v7  ;;  %v1353_v42 = vsel %vm1352_vm14, %v3451_v10, %v1349_v8  ;;  %v4531_v7 = vld [vmem:[%s4813_s7 + $0x18] sm:$0xff]  ;;  %v4550_v55 = vld [vmem:[%s4810_s4 + $0x8] sm:$0xff]  ;;  %v3551_v8 = vld [vmem:[%s4814_s8] sm:$0xff] }
 0xcd3   :  { %v1358_v23 = vsel %vm1355_vm15, %v1357_v25, %v1353_v42  ;;  %v1215_v59 = vmul.f32 %v1212_v22, %v4390_v17 }
 0xcd4   :  { %v1361_v11 = vmul.f32 %v1358_v23, %v4394_v4 }
 0xd08   :  { %v1512_v35 = vpop.permute.xlu2 %1511 }
 0xd09   :  { %v1514_v37 = vmul.f32 %v1512_v35, %v1506_v53 }
 0xd0b   :  { %1516 = vrot.lane.b32.xlu2 %v1514_v37, %s3611_s28 }
 0xd1f   :  { %v1218_v50 = vpop.permute.xlu0 %1217 }
 0xd20   :  { %v1220_v6 = vmul.f32 %v1218_v50, %v1212_v22  ;;  %v4563_v50 = vld [vmem:[%s4810_s4] sm:$0xff] }
 0xd22   :  { %1222 = vrot.lane.b32.xlu0 %v1220_v6, %s3611_s28  ;;  %v3549_v6 = vld [vmem:[%s4814_s8 + $0x10] sm:$0xff] }
 0xd27   :  { %v1364_v52 = vpop.permute.xlu1 %1363 }
 0xd28   :  { %v1366_v0 = vmul.f32 %v1364_v52, %v1358_v23 }
 0xd2a   :  { %1368 = vrot.lane.b32.xlu1 %v1366_v0, %s3611_s28 }
 0xd4b   :  { %v278_v57 = vpop.f32.mrf.mxu0 }
 0xd65   :  { %v1517_v36 = vpop.permute.xlu2 %1516 }
 0xd66   :  { %v4487_v16 = vadd.f32 %v1517_v36, %v1509_v32 }
 0xd68   :  { %3452 = vtanh.f32 %v4487_v16 }
 0xd6e   :  { %v3453_v48 = vpop.eup %3452 }
 0xd6f   :  { %1522 = vrot.lane.b32.xlu2 %v3453_v48, %s3610_s27 }
 0xd94   :  { %v1223_v24 = vpop.permute.xlu0 %1222 }
 0xd95   :  { %v4492_v43 = vadd.f32 %v1223_v24, %v1215_v59 }
 0xd97   :  { %3454 = vtanh.f32 %v4492_v43 }
 0xd9c   :  { %v1369_v35 = vpop.permute.xlu1 %1368 }
 0xd9d   :  { %v3455_v19 = vpop.eup %3454  ;;  %v4496_v5 = vadd.f32 %v1369_v35, %v1361_v11  ;;  %v279_v11 = vadd.f32 %v4376_v20, %v278_v57 }
 0xd9e   :  { %1228 = vrot.lane.b32.xlu0 %v3455_v19, %s3610_s27 }
 0xd9f   :  { %3456 = vtanh.f32 %v4496_v5 }
 0xda5   :  { %v3457_v37 = vpop.eup %3456 }
 0xda6   :  { %1374 = vrot.lane.b32.xlu1 %v3457_v37, %s3610_s27 }
 0xdc9   :  { %v1523_v39 = vpop.permute.xlu2 %1522 }
 0xdca   :  { %v1525_v17 = vmul.f32 %v1523_v39, %v1506_v53  ;;  %v209_v53 = vld [vmem:[%s4806_s0 + $0x38] sm:$0xff] }
 0xdcb   :  { %3234 = vmatmul.msk.f32.gmra.mxu0 %vm218_vm0, %v209_v53 }
 0xdcc   :  { %1547 = vrot.lane.b32.xlu2 %v1525_v17, %s3611_s28 }
 0xe10   :  { %v1229_v4 = vpop.permute.xlu0 %1228 }
 0xe11   :  { %v1231_v10 = vmul.f32 %v1229_v4, %v1212_v22  ;;  %v3548_v22 = vld [vmem:[%s4814_s8 + $0x18] sm:$0xff] }
 0xe13   :  { %1233 = vrot.lane.b32.xlu0 %v1231_v10, %s3611_s28 }
 0xe18   :  { %v1375_v33 = vpop.permute.xlu1 %1374 }
 0xe19   :  { %v1377_v38 = vmul.f32 %v1375_v33, %v1358_v23  ;;  %v4591_v23 = vld [vmem:[%s4815_s9] ss:$0 sm:$0xff] }
 0xe1b   :  { %1401 = vrot.lane.b32.xlu1 %v1377_v38, %s3611_s28 }
 0xe26   :  { %v1548_v21 = vpop.permute.xlu2 %1547 }
 0xe48   :  { %v4586_v3 = vpop.f32.mrf.mxu0 }
 0xe85   :  { %v1234_v56 = vpop.permute.xlu0 %1233 }
 0xe86   :  { %1236 = vst.msk [vmem:[#allocation2 + $0x18] sm:$0xff] %vm218_vm0, %v1234_v56  ;;  %3269 = vmatmul.msk.f32.vlgmr.msrb.gmra.mxu3 %vm218_vm0, %v1234_v56 }
 0xe87   :  { %1769 = vmatpush.msrb.mxu3 %v4437_v18 }
 0xe89   :  { %1770 = vmatpush.msrb.mxu3 %v4444_v9 }
 0xe8b   :  { %1771 = vmatpush.msrb.mxu3 %v4451_v41 }
 0xe8d   :  { %v1402_v40 = vpop.permute.xlu1 %1401  ;;  %1772 = vmatpush.msrb.mxu3 %v4458_v34 }
 0xe8e   :  { %3270 = vmatmul.msk.f32.vlgmr.msrb.gmra.mxu0 %vm218_vm0, %v1402_v40  ;;  %3274 = vmatmul.msk.f32.vlgmr.msra.gmra.mxu2 %vm218_vm0, %v1402_v40 }
 0xe8f   :  { %3275 = vmatmul.msk.f32.vlgmr.msra.gmra.mxu3 %vm218_vm0, %v1548_v21  ;;  %1794 = vmatpush.msrb.mxu0 %v4524_v2 }
 0xe90   :  { %1942 = vmatpush.msra.mxu3 %v4411_v58  ;;  %1879 = vmatpush.msra.mxu2 %v4531_v7  ;;  %v4544_v58 = vld [vmem:[%s4813_s7 + $0x10] sm:$0xff] }
 0xe91   :  { %1795 = vmatpush.msrb.mxu0 %v4537_v1 }
 0xe92   :  { %1943 = vmatpush.msra.mxu3 %v4417_v49  ;;  %1880 = vmatpush.msra.mxu2 %v4544_v58  ;;  %v4557_v49 = vld [vmem:[%s4813_s7 + $0x8] sm:$0xff] }
 0xe93   :  { %1796 = vmatpush.msrb.mxu0 %v4550_v55 }
 0xe94   :  { %1944 = vmatpush.msra.mxu3 %v4423_v27  ;;  %1881 = vmatpush.msra.mxu2 %v4557_v49  ;;  %v4571_v27 = vld [vmem:[%s4813_s7] sm:$0xff] }
 0xe95   :  { %1797 = vmatpush.msrb.mxu0 %v4563_v50 }
 0xe96   :  { %3280 = vmatmul.msk.f32.vlgmr.msrb.gmra.mxu2 %vm218_vm0, %v1548_v21  ;;  %1945 = vmatpush.msra.mxu3 %v4429_v51  ;;  %v3550_v51 = vld [vmem:[%s4814_s8 + $0x8] sm:$0xff] }
 0xe97   :  { %1882 = vmatpush.msra.mxu2 %v4571_v27 }
 0xe99   :  { %2085 = vmatpush.msrb.mxu2 %v3548_v22 }
 0xe9b   :  { %2086 = vmatpush.msrb.mxu2 %v3549_v6 }
 0xe9d   :  { %2087 = vmatpush.msrb.mxu2 %v3550_v51 }
 0xe9f   :  { %2088 = vmatpush.msrb.mxu2 %v3551_v8 }
 0xf09   :  { %v1397_v42 = vpop.f32.mrf.mxu3 }
 0xf0b   :  { %v1422_v25 = vpop.f32.mrf.mxu0 }
 0xf0c   :  { %v1423_v52 = vadd.f32 %v1422_v25, %v1397_v42 }
 0xf0e   :  { %v1425_v0 = vadd.f32 %v4591_v23, %v1423_v52 }
 0xf10   :  { %3458 = vtanh.f32 %v1425_v0  ;;  %v3271_v4 = vmul.f32 -1.442695, %v1425_v0 }
 0xf11   :  { %v1543_v32 = vpop.f32.mrf.mxu2 }
 0xf12   :  { %v1568_v36 = vpop.f32.mrf.mxu3 }
 0xf13   :  { %v1569_v48 = vadd.f32 %v1568_v36, %v1543_v32 }
 0xf15   :  { %v1571_v59 = vadd.f32 %v4477_v54, %v1569_v48 }
 0xf16   :  { %v3459_v24 = vpop.eup %3458 }
 0xf17   :  { %3460 = vtanh.f32 %v1571_v59  ;;  %1448 = vrot.lane.b32.xlu0 %v3459_v24, %s3610_s27  ;;  %v3276_v33 = vmul.f32 -1.442695, %v1571_v59 }
 0xf19   :  { %v1716_v35 = vpop.f32.mrf.mxu2 }
 0xf1a   :  { %v1719_v19 = vadd.f32 %v1716_v35, %v279_v11 }
 0xf1c   :  { %3462 = vtanh.f32 %v1719_v19  ;;  %v3281_v17 = vmul.f32 -1.442695, %v1719_v19 }
 0xf1d   :  { %v3461_v37 = vpop.eup %3460 }
 0xf1e   :  { %1594 = vrot.lane.b32.xlu1 %v3461_v37, %s3610_s27  ;;  %3464 = vpow2.f32 %v3281_v17 }
 0xf1f   :  { %3466 = vpow2.f32 %v3271_v4 }
 0xf22   :  { %v3463_v39 = vpop.eup %3462 }
 0xf23   :  { %1742 = vrot.lane.b32.xlu2 %v3463_v39, %s3610_s27 }
 0xf24   :  { %v3465_v26 = vpop.eup %3464 }
 0xf25   :  { %v1723_v10 = vadd.f32 1.0, %v3465_v26  ;;  %v3467_v38 = vpop.eup %3466 }
 0xf26   :  { %v1429_v56 = vadd.f32 1.0, %v3467_v38 }
 0xf27   :  { %3468 = vrcp.f32 %v1723_v10  ;;  %v1735_v25 = vand.u32 2147483648, %v1723_v10  ;;  %vm1729_vm2 = vweird.f32 %v1723_v10  ;;  %v1733_v52 = vand.u32 2147483647, %v1723_v10 }
 0xf28   :  { %3470 = vpow2.f32 %v3276_v33  ;;  %v1441_v17 = vand.u32 2147483648, %v1429_v56  ;;  %vm1435_vm6 = vweird.f32 %v1429_v56  ;;  %v1439_v26 = vand.u32 2147483647, %v1429_v56 }
 0xf29   :  { %3472 = vrcp.f32 %v1429_v56  ;;  %v1736_v48 = vor.u32 1.1754944e-38, %v1735_v25  ;;  %vm1734_vm4 = vcmp.eq.f32.partialorder %v1733_v52, 8.507059e+37 }
 0xf2a   :  { %v1442_v33 = vor.u32 1.1754944e-38, %v1441_v17  ;;  %vm1440_vm8 = vcmp.eq.f32.partialorder %v1439_v26, 8.507059e+37 }
 0xf2d   :  { %v3469_v53 = vpop.eup %3468 }
 0xf2e   :  { %v1725_v40 = vmul.f32 %v3469_v53, %v1723_v10  ;;  %v3471_v21 = vpop.eup %3470  ;;  %vm1730_vm1 = vweird.f32 %v3469_v53 }
 0xf2f   :  { %v1575_v6 = vadd.f32 1.0, %v3471_v21  ;;  %v3473_v8 = vpop.eup %3472  ;;  %vm1731_vm3 = vmor %vm1729_vm2, %vm1730_vm1 }
 0xf30   :  { %v1726_v22 = vsub.f32 1.0, %v1725_v40  ;;  %v1431_v42 = vmul.f32 %v3473_v8, %v1429_v56  ;;  %vm1436_vm5 = vweird.f32 %v3473_v8 }
 0xf31   :  { %3474 = vrcp.f32 %v1575_v6  ;;  %vm1437_vm7 = vmor %vm1435_vm6, %vm1436_vm5  ;;  %vm1581_vm10 = vweird.f32 %v1575_v6 }
 0xf32   :  { %v1727_v51 = vmul.f32 %v3469_v53, %v1726_v22  ;;  %v1432_v36 = vsub.f32 1.0, %v1431_v42  ;;  %v1587_v22 = vand.u32 2147483648, %v1575_v6 }
 0xf34   :  { %v1728_v57 = vadd.f32 %v3469_v53, %v1727_v51  ;;  %v1433_v19 = vmul.f32 %v3473_v8, %v1432_v36  ;;  %v1585_v51 = vand.u32 2147483647, %v1575_v6  ;;  %v1588_v42 = vor.u32 1.1754944e-38, %v1587_v22 }
 0xf36   :  { %v1732_v32 = vsel %vm1731_vm3, %v3469_v53, %v1728_v57  ;;  %v1434_v39 = vadd.f32 %v3473_v8, %v1433_v19  ;;  %vm1586_vm12 = vcmp.eq.f32.partialorder %v1585_v51, 8.507059e+37 }
 0xf37   :  { %v3475_v0 = vpop.eup %3474  ;;  %v1737_v24 = vsel %vm1734_vm4, %v1736_v48, %v1732_v32 }
 0xf38   :  { %v1577_v11 = vmul.f32 %v3475_v0, %v1575_v6  ;;  %v1438_v10 = vsel %vm1437_vm7, %v3473_v8, %v1434_v39  ;;  %vm1582_vm9 = vweird.f32 %v3475_v0  ;;  %v1740_v8 = vmul.f32 %v1737_v24, %v4487_v16 }
 0xf39   :  { %v1443_v53 = vsel %vm1440_vm8, %v1442_v33, %v1438_v10  ;;  %vm1583_vm11 = vmor %vm1581_vm10, %vm1582_vm9 }
 0xf3a   :  { %v1578_v37 = vsub.f32 1.0, %v1577_v11  ;;  %v1446_v6 = vmul.f32 %v1443_v53, %v4492_v43 }
 0xf3c   :  { %v1579_v4 = vmul.f32 %v3475_v0, %v1578_v37 }
 0xf3e   :  { %v1580_v40 = vadd.f32 %v3475_v0, %v1579_v4 }
 0xf40   :  { %v1584_v57 = vsel %vm1583_vm11, %v3475_v0, %v1580_v40 }
 0xf41   :  { %v1589_v25 = vsel %vm1586_vm12, %v1588_v42, %v1584_v57 }
 0xf42   :  { %v1592_v11 = vmul.f32 %v1589_v25, %v4496_v5 }
 0xf7d   :  { %v1743_v59 = vpop.permute.xlu2 %1742 }
 0xf7e   :  { %v1745_v35 = vmul.f32 %v1743_v59, %v1737_v24 }
 0xf80   :  { %1747 = vrot.lane.b32.xlu2 %v1745_v35, %s3611_s28 }
 0xf89   :  { %v1449_v38 = vpop.permute.xlu0 %1448 }
 0xf8a   :  { %v1451_v21 = vmul.f32 %v1449_v38, %v1443_v53 }
 0xf8c   :  { %1453 = vrot.lane.b32.xlu0 %v1451_v21, %s3611_s28 }
 0xf90   :  { %v1595_v56 = vpop.permute.xlu1 %1594 }
 0xf91   :  { %v1597_v52 = vmul.f32 %v1595_v56, %v1589_v25 }
 0xf93   :  { %1599 = vrot.lane.b32.xlu1 %v1597_v52, %s3611_s28 }
 0xfda   :  { %v1748_v32 = vpop.permute.xlu2 %1747 }
 0xfdb   :  { %v4603_v36 = vadd.f32 %v1748_v32, %v1740_v8 }
 0xfdd   :  { %3476 = vtanh.f32 %v4603_v36 }
 0xfe3   :  { %v3477_v48 = vpop.eup %3476 }
 0xfe4   :  { %1753 = vrot.lane.b32.xlu2 %v3477_v48, %s3610_s27 }
 0xffe   :  { %v1454_v0 = vpop.permute.xlu0 %1453 }
 0xfff   :  { %v4608_v59 = vadd.f32 %v1454_v0, %v1446_v6 }
0x1001   :  { %3478 = vtanh.f32 %v4608_v59 }
0x1005   :  { %v1600_v35 = vpop.permute.xlu1 %1599 }
0x1006   :  { %v4612_v19 = vadd.f32 %v1600_v35, %v1592_v11 }
0x1007   :  { %v3479_v16 = vpop.eup %3478 }
0x1008   :  { %3480 = vtanh.f32 %v4612_v19  ;;  %1459 = vrot.lane.b32.xlu0 %v3479_v16, %s3610_s27 }
0x100e   :  { %v3481_v37 = vpop.eup %3480 }
0x100f   :  { %1605 = vrot.lane.b32.xlu1 %v3481_v37, %s3610_s27 }
0x103e   :  { %v1754_v39 = vpop.permute.xlu2 %1753 }
0x103f   :  { %v1756_v43 = vmul.f32 %v1754_v39, %v1737_v24 }
0x1041   :  { %1778 = vrot.lane.b32.xlu2 %v1756_v43, %s3611_s28 }
0x107a   :  { %v1460_v17 = vpop.permute.xlu0 %1459 }
0x107b   :  { %v1462_v26 = vmul.f32 %v1460_v17, %v1443_v53 }
0x107d   :  { %1464 = vrot.lane.b32.xlu0 %v1462_v26, %s3611_s28 }
0x1081   :  { %v1606_v5 = vpop.permute.xlu1 %1605 }
0x1082   :  { %v1608_v4 = vmul.f32 %v1606_v5, %v1589_v25 }
0x1084   :  { %1632 = vrot.lane.b32.xlu1 %v1608_v4, %s3611_s28 }
0x109b   :  { %v1779_v33 = vpop.permute.xlu2 %1778 }
0x10ef   :  { %v1465_v10 = vpop.permute.xlu0 %1464 }
0x10f0   :  { %1467 = vst.msk [vmem:[#allocation2 + $0x20] sm:$0xff] %vm218_vm0, %v1465_v10  ;;  %3277 = vmatmul.msk.f32.vlgmr.msra.gmra.mxu0 %vm218_vm0, %v1465_v10 }
0x10f1   :  { %2000 = vmatpush.msra.mxu0 %v4437_v18 }
0x10f3   :  { %2001 = vmatpush.msra.mxu0 %v4444_v9 }
0x10f5   :  { %2002 = vmatpush.msra.mxu0 %v4451_v41 }
0x10f6   :  { %v1633_v24 = vpop.permute.xlu1 %1632 }
0x10f7   :  { %3278 = vmatmul.msk.f32.vlgmr.msrb.gmra.mxu1 %vm218_vm0, %v1633_v24  ;;  %3282 = vmatmul.msk.f32.vlgmr.msrb.gmra.mxu3 %vm218_vm0, %v1633_v24 }
0x10f8   :  { %3283 = vmatmul.msk.f32.vlgmr.msrb.gmra.mxu0 %vm218_vm0, %v1779_v33  ;;  %2025 = vmatpush.msrb.mxu1 %v4524_v2 }
0x10f9   :  { %2003 = vmatpush.msra.mxu0 %v4458_v34  ;;  %2110 = vmatpush.msrb.mxu3 %v4531_v7 }
0x10fa   :  { %2026 = vmatpush.msrb.mxu1 %v4537_v1 }
0x10fb   :  { %2111 = vmatpush.msrb.mxu3 %v4544_v58 }
0x10fc   :  { %2027 = vmatpush.msrb.mxu1 %v4550_v55 }
0x10fd   :  { %2112 = vmatpush.msrb.mxu3 %v4557_v49  ;;  %v282_v49 = vadd.f32 %v4376_v20, %v4586_v3 }
0x10fe   :  { %2028 = vmatpush.msrb.mxu1 %v4563_v50 }
0x10ff   :  { %3288 = vmatmul.msk.f32.vlgmr.msra.gmra.mxu3 %vm218_vm0, %v1779_v33 }
0x1100   :  { %2113 = vmatpush.msrb.mxu3 %v4571_v27 }
0x116d   :  { %v1628_v18 = vpop.f32.mrf.mxu0 }
0x1174   :  { %v1653_v9 = vpop.f32.mrf.mxu1 }
0x1175   :  { %v1654_v41 = vadd.f32 %v1653_v9, %v1628_v18  ;;  %v1799_v2 = vpop.f32.mrf.mxu0 }
0x1177   :  { %v1656_v34 = vadd.f32 %v4591_v23, %v1654_v41 }
0x1179   :  { %3482 = vtanh.f32 %v1656_v34  ;;  %v3279_v22 = vmul.f32 -1.442695, %v1656_v34 }
0x117a   :  { %v1774_v7 = vpop.f32.mrf.mxu3 }
0x117b   :  { %v1800_v1 = vadd.f32 %v1799_v2, %v1774_v7 }
0x117d   :  { %v1802_v58 = vadd.f32 %v4477_v54, %v1800_v1 }
0x117f   :  { %v3483_v55 = vpop.eup %3482  ;;  %3484 = vtanh.f32 %v1802_v58  ;;  %v3284_v57 = vmul.f32 -1.442695, %v1802_v58 }
0x1180   :  { %1679 = vrot.lane.b32.xlu0 %v3483_v55, %s3610_s27 }
0x1182   :  { %v1947_v50 = vpop.f32.mrf.mxu3 }
0x1183   :  { %v1950_v27 = vadd.f32 %v1947_v50, %v282_v49 }
0x1185   :  { %v3485_v38 = vpop.eup %3484  ;;  %3486 = vtanh.f32 %v1950_v27  ;;  %v3289_v40 = vmul.f32 -1.442695, %v1950_v27 }
0x1186   :  { %1825 = vrot.lane.b32.xlu1 %v3485_v38, %s3610_s27 }
0x1187   :  { %3488 = vpow2.f32 %v3289_v40 }
0x1188   :  { %3490 = vpow2.f32 %v3279_v22 }
0x118b   :  { %v3487_v53 = vpop.eup %3486 }
0x118c   :  { %1973 = vrot.lane.b32.xlu2 %v3487_v53, %s3610_s27 }
0x118d   :  { %v3489_v21 = vpop.eup %3488 }
0x118e   :  { %v1954_v51 = vadd.f32 1.0, %v3489_v21  ;;  %v3491_v42 = vpop.eup %3490 }
0x118f   :  { %v1660_v3 = vadd.f32 1.0, %v3491_v42 }
0x1190   :  { %3492 = vrcp.f32 %v1954_v51  ;;  %v1966_v11 = vand.u32 2147483648, %v1954_v51  ;;  %vm1960_vm14 = vweird.f32 %v1954_v51  ;;  %v1964_v35 = vand.u32 2147483647, %v1954_v51 }
0x1191   :  { %3494 = vpow2.f32 %v3284_v57  ;;  %v1672_v18 = vand.u32 2147483648, %v1660_v3  ;;  %vm1666_vm3 = vweird.f32 %v1660_v3  ;;  %v1670_v9 = vand.u32 2147483647, %v1660_v3 }
0x1192   :  { %3496 = vrcp.f32 %v1660_v3  ;;  %v1967_v43 = vor.u32 1.1754944e-38, %v1966_v11  ;;  %vm1965_vm1 = vcmp.eq.f32.partialorder %v1964_v35, 8.507059e+37 }
0x1193   :  { %v1673_v2 = vor.u32 1.1754944e-38, %v1672_v18  ;;  %vm1671_vm5 = vcmp.eq.f32.partialorder %v1670_v9, 8.507059e+37 }
0x1196   :  { %v3493_v20 = vpop.eup %3492 }
0x1197   :  { %v1956_v56 = vmul.f32 %v3493_v20, %v1954_v51  ;;  %v3495_v25 = vpop.eup %3494  ;;  %vm1961_vm13 = vweird.f32 %v3493_v20 }
0x1198   :  { %v1806_v8 = vadd.f32 1.0, %v3495_v25  ;;  %v3497_v48 = vpop.eup %3496  ;;  %vm1962_vm15 = vmor %vm1960_vm14, %vm1961_vm13 }
0x1199   :  { %v1957_v52 = vsub.f32 1.0, %v1956_v56  ;;  %v1662_v0 = vmul.f32 %v3497_v48, %v1660_v3  ;;  %vm1667_vm2 = vweird.f32 %v3497_v48 }
0x119a   :  { %3498 = vrcp.f32 %v1806_v8  ;;  %vm1668_vm4 = vmor %vm1666_vm3, %vm1667_vm2  ;;  %v1818_v55 = vand.u32 2147483648, %v1806_v8  ;;  %vm1812_vm7 = vweird.f32 %v1806_v8  ;;  %v1816_v50 = vand.u32 2147483647, %v1806_v8 }
0x119b   :  { %v1958_v32 = vmul.f32 %v3493_v20, %v1957_v52  ;;  %v1663_v39 = vsub.f32 1.0, %v1662_v0 }
0x119c   :  { %v1819_v38 = vor.u32 1.1754944e-38, %v1818_v55  ;;  %vm1817_vm9 = vcmp.eq.f32.partialorder %v1816_v50, 8.507059e+37 }
0x119d   :  { %v1959_v6 = vadd.f32 %v3493_v20, %v1958_v32  ;;  %v1664_v10 = vmul.f32 %v3497_v48, %v1663_v39 }
0x119f   :  { %v1963_v37 = vsel %vm1962_vm15, %v3493_v20, %v1959_v6  ;;  %v1665_v33 = vadd.f32 %v3497_v48, %v1664_v10 }
0x11a0   :  { %v3499_v16 = vpop.eup %3498  ;;  %v1968_v5 = vsel %vm1965_vm1, %v1967_v43, %v1963_v37 }
0x11a1   :  { %v1808_v17 = vmul.f32 %v3499_v16, %v1806_v8  ;;  %v1669_v34 = vsel %vm1668_vm4, %v3497_v48, %v1665_v33  ;;  %vm1813_vm6 = vweird.f32 %v3499_v16  ;;  %v1971_v22 = vmul.f32 %v1968_v5, %v4603_v36 }
0x11a2   :  { %v1674_v58 = vsel %vm1671_vm5, %v1673_v2, %v1669_v34  ;;  %vm1814_vm8 = vmor %vm1812_vm7, %vm1813_vm6 }
0x11a3   :  { %v1809_v24 = vsub.f32 1.0, %v1808_v17  ;;  %v1677_v20 = vmul.f32 %v1674_v58, %v4608_v59 }
0x11a5   :  { %v1810_v41 = vmul.f32 %v3499_v16, %v1809_v24 }
0x11a7   :  { %v1811_v7 = vadd.f32 %v3499_v16, %v1810_v41 }
0x11a9   :  { %v1815_v27 = vsel %vm1814_vm8, %v3499_v16, %v1811_v7 }
0x11aa   :  { %v1820_v40 = vsel %vm1817_vm9, %v1819_v38, %v1815_v27 }
0x11ab   :  { %v1823_v25 = vmul.f32 %v1820_v40, %v4612_v19 }
0x11e6   :  { %v1974_v26 = vpop.permute.xlu2 %1973 }
0x11e7   :  { %v1976_v4 = vmul.f32 %v1974_v26, %v1968_v5 }
0x11e9   :  { %1978 = vrot.lane.b32.xlu2 %v1976_v4, %s3611_s28 }
0x11f2   :  { %v1680_v1 = vpop.permute.xlu0 %1679 }
0x11f3   :  { %v1682_v49 = vmul.f32 %v1680_v1, %v1674_v58 }
0x11f5   :  { %1684 = vrot.lane.b32.xlu0 %v1682_v49, %s3611_s28 }
0x11f8   :  { %v1826_v53 = vpop.permute.xlu1 %1825 }
0x11f9   :  { %v1828_v21 = vmul.f32 %v1826_v53, %v1820_v40 }
0x11fb   :  { %1830 = vrot.lane.b32.xlu1 %v1828_v21, %s3611_s28 }
0x1243   :  { %v1979_v51 = vpop.permute.xlu2 %1978 }
0x1244   :  { %v1981_v57 = vadd.f32 %v1979_v51, %v1971_v22 }
0x1246   :  { %3500 = vtanh.f32 %v1981_v57 }
0x124c   :  { %v3501_v42 = vpop.eup %3500 }
0x124d   :  { %1984 = vrot.lane.b32.xlu2 %v3501_v42, %s3610_s27 }
0x1267   :  { %v1685_v3 = vpop.permute.xlu0 %1684 }
0x1268   :  { %v4651_v56 = vadd.f32 %v1685_v3, %v1677_v20 }
0x126a   :  { %3502 = vtanh.f32 %v4651_v56 }
0x126d   :  { %v1831_v52 = vpop.permute.xlu1 %1830 }
0x126e   :  { %v4655_v8 = vadd.f32 %v1831_v52, %v1823_v25 }
0x1270   :  { %v3503_v32 = vpop.eup %3502  ;;  %3504 = vtanh.f32 %v4655_v8 }
0x1271   :  { %1690 = vrot.lane.b32.xlu0 %v3503_v32, %s3610_s27 }
0x1276   :  { %v3505_v36 = vpop.eup %3504 }
0x1277   :  { %1836 = vrot.lane.b32.xlu1 %v3505_v36, %s3610_s27 }
0x12a7   :  { %v1985_v48 = vpop.permute.xlu2 %1984 }
0x12a8   :  { %v1987_v59 = vmul.f32 %v1985_v48, %v1968_v5 }
0x12aa   :  { %2009 = vrot.lane.b32.xlu2 %v1987_v59, %s3611_s28 }
0x12e3   :  { %v1691_v6 = vpop.permute.xlu0 %1690 }
0x12e4   :  { %v1693_v0 = vmul.f32 %v1691_v6, %v1674_v58 }
0x12e6   :  { %1695 = vrot.lane.b32.xlu0 %v1693_v0, %s3611_s28 }
0x12e9   :  { %v1837_v19 = vpop.permute.xlu1 %1836 }
0x12ea   :  { %v1839_v11 = vmul.f32 %v1837_v19, %v1820_v40 }
0x12ec   :  { %1863 = vrot.lane.b32.xlu1 %v1839_v11, %s3611_s28 }
0x1304   :  { %v2010_v37 = vpop.permute.xlu2 %2009 }
0x1358   :  { %v1696_v35 = vpop.permute.xlu0 %1695 }
0x1359   :  { %1698 = vst.msk [vmem:[#allocation2 + $0x28] sm:$0xff] %vm218_vm0, %v1696_v35  ;;  %3285 = vmatmul.msk.f32.vlgmr.msra.gmra.mxu1 %vm218_vm0, %v1696_v35 }
0x135e   :  { %v1864_v16 = vpop.permute.xlu1 %1863 }
0x135f   :  { %3286 = vmatmul.msk.f32.vlgmr.msra.gmra.mxu2 %vm218_vm0, %v1864_v16  ;;  %3290 = vmatmul.msk.f32.vlgmr.msra.gmra.mxu0 %vm218_vm0, %v1864_v16 }
0x1361   :  { %3291 = vmatmul.msk.f32.vlgmr.msrb.gmra.mxu1 %vm218_vm0, %v2010_v37 }
0x13d6   :  { %v1859_v39 = vpop.f32.mrf.mxu1 }
0x13dc   :  { %v2005_v43 = vpop.f32.mrf.mxu0 }
0x13de   :  { %v2030_v17 = vpop.f32.mrf.mxu1 }
0x13df   :  { %v2031_v26 = vadd.f32 %v2030_v17, %v2005_v43 }
0x13e1   :  { %v2033_v5 = vadd.f32 %v4477_v54, %v2031_v26 }
0x13e2   :  { %v1884_v4 = vpop.f32.mrf.mxu2 }
0x13e3   :  { %3506 = vtanh.f32 %v2033_v5  ;;  %v1885_v10 = vadd.f32 %v1884_v4, %v1859_v39  ;;  %v3292_v9 = vmul.f32 -1.442695, %v2033_v5 }
0x13e5   :  { %v1887_v24 = vadd.f32 %v4591_v23, %v1885_v10 }
0x13e7   :  { %3508 = vtanh.f32 %v1887_v24  ;;  %v3287_v41 = vmul.f32 -1.442695, %v1887_v24 }
0x13e8   :  { %3510 = vpow2.f32 %v3292_v9 }
0x13e9   :  { %v3507_v33 = vpop.eup %3506  ;;  %3512 = vpow2.f32 %v3287_v41 }
0x13ea   :  { %2056 = vrot.lane.b32.xlu1 %v3507_v33, %s3610_s27 }
0x13ed   :  { %v3509_v18 = vpop.eup %3508 }
0x13ee   :  { %1910 = vrot.lane.b32.xlu0 %v3509_v18, %s3610_s27  ;;  %v3511_v34 = vpop.eup %3510 }
0x13ef   :  { %v2037_v2 = vadd.f32 1.0, %v3511_v34  ;;  %v3513_v7 = vpop.eup %3512 }
0x13f0   :  { %v1891_v54 = vadd.f32 1.0, %v3513_v7 }
0x13f1   :  { %3514 = vrcp.f32 %v2037_v2  ;;  %v2049_v21 = vand.u32 2147483648, %v2037_v2  ;;  %vm2043_vm11 = vweird.f32 %v2037_v2  ;;  %v2047_v22 = vand.u32 2147483647, %v2037_v2 }
0x13f2   :  { %3516 = vrcp.f32 %v1891_v54  ;;  %v1903_v20 = vand.u32 2147483648, %v1891_v54  ;;  %vm1897_vm15 = vweird.f32 %v1891_v54  ;;  %v1901_v3 = vand.u32 2147483647, %v1891_v54 }
0x13f3   :  { %v2050_v42 = vor.u32 1.1754944e-38, %v2049_v21  ;;  %vm2048_vm14 = vcmp.eq.f32.partialorder %v2047_v22, 8.507059e+37 }
0x13f4   :  { %v1904_v48 = vor.u32 1.1754944e-38, %v1903_v20  ;;  %vm1902_vm2 = vcmp.eq.f32.partialorder %v1901_v3, 8.507059e+37 }
0x13f7   :  { %v3515_v1 = vpop.eup %3514 }
0x13f8   :  { %v2039_v58 = vmul.f32 %v3515_v1, %v2037_v2  ;;  %v3517_v55 = vpop.eup %3516  ;;  %vm2044_vm10 = vweird.f32 %v3515_v1 }
0x13f9   :  { %v1893_v50 = vmul.f32 %v3517_v55, %v1891_v54  ;;  %vm2045_vm12 = vmor %vm2043_vm11, %vm2044_vm10  ;;  %vm1898_vm13 = vweird.f32 %v3517_v55 }
0x13fa   :  { %v2040_v49 = vsub.f32 1.0, %v2039_v58  ;;  %vm1899_vm1 = vmor %vm1897_vm15, %vm1898_vm13 }
0x13fb   :  { %v1894_v38 = vsub.f32 1.0, %v1893_v50 }
0x13fc   :  { %v2041_v27 = vmul.f32 %v3515_v1, %v2040_v49 }
0x13fd   :  { %v1895_v40 = vmul.f32 %v3517_v55, %v1894_v38 }
0x13fe   :  { %v2042_v53 = vadd.f32 %v3515_v1, %v2041_v27 }
0x13ff   :  { %v1896_v57 = vadd.f32 %v3517_v55, %v1895_v40 }
0x1400   :  { %v2046_v51 = vsel %vm2045_vm12, %v3515_v1, %v2042_v53 }
0x1401   :  { %v2051_v52 = vsel %vm2048_vm14, %v2050_v42, %v2046_v51  ;;  %v1900_v36 = vsel %vm1899_vm1, %v3517_v55, %v1896_v57 }
0x1402   :  { %v1905_v6 = vsel %vm1902_vm2, %v1904_v48, %v1900_v36  ;;  %v2054_v37 = vmul.f32 %v2051_v52, %v4655_v8 }
0x1403   :  { %v1908_v19 = vmul.f32 %v1905_v6, %v4651_v56 }
0x145c   :  { %v2057_v25 = vpop.permute.xlu1 %2056 }
0x145d   :  { %v2059_v32 = vmul.f32 %v2057_v25, %v2051_v52 }
0x145f   :  { %2061 = vrot.lane.b32.xlu0 %v2059_v32, %s3611_s28 }
0x1460   :  { %v1911_v59 = vpop.permute.xlu0 %1910 }
0x1461   :  { %v1913_v0 = vmul.f32 %v1911_v59, %v1905_v6 }
0x1463   :  { %1915 = vrot.lane.b32.xlu2 %v1913_v0, %s3611_s28 }
0x14bd   :  { %v1916_v11 = vpop.permute.xlu2 %1915 }
0x14be   :  { %v1918_v35 = vadd.f32 %v1916_v11, %v1908_v19 }
0x14c0   :  { %3518 = vtanh.f32 %v1918_v35 }
0x14c6   :  { %v3519_v16 = vpop.eup %3518 }
0x14c7   :  { %1921 = vrot.lane.b32.xlu1 %v3519_v16, %s3610_s27 }
0x14d1   :  { %v2062_v39 = vpop.permute.xlu0 %2061 }
0x14d2   :  { %v2064_v43 = vadd.f32 %v2062_v39, %v2054_v37 }
0x14d4   :  { %3520 = vtanh.f32 %v2064_v43 }
0x14da   :  { %v3521_v17 = vpop.eup %3520 }
0x14db   :  { %2067 = vrot.lane.b32.xlu2 %v3521_v17, %s3610_s27 }
0x1535   :  { %v2068_v26 = vpop.permute.xlu2 %2067 }
0x1536   :  { %v2070_v5 = vmul.f32 %v2068_v26, %v2051_v52 }
0x1538   :  { %2094 = vrot.lane.b32.xlu1 %v2070_v5, %s3611_s28 }
0x1539   :  { %v1922_v4 = vpop.permute.xlu1 %1921 }
0x153a   :  { %v1924_v56 = vmul.f32 %v1922_v4, %v1905_v6 }
0x153c   :  { %1926 = vrot.lane.b32.xlu0 %v1924_v56, %s3611_s28 }
0x15aa   :  { %v2095_v10 = vpop.permute.xlu1 %2094 }
0x15ab   :  { %3294 = vmatmul.msk.f32.vlgmr.msrb.gmra.mxu3 %vm218_vm0, %v2095_v10 }
0x15ae   :  { %v1927_v24 = vpop.permute.xlu0 %1926 }
0x15af   :  { %1929 = vst.msk [vmem:[#allocation2 + $0x30] sm:$0xff] %vm218_vm0, %v1927_v24  ;;  %3293 = vmatmul.msk.f32.vlgmr.msrb.gmra.mxu2 %vm218_vm0, %v1927_v24 }
0x162e   :  { %v2115_v8 = vpop.f32.mrf.mxu3 }
0x1632   :  { %v2090_v33 = vpop.f32.mrf.mxu2 }
0x1633   :  { %v2116_v18 = vadd.f32 %v2115_v8, %v2090_v33 }
0x1635   :  { %v2118_v9 = vadd.f32 %v4591_v23, %v2116_v18 }
0x1637   :  { %3522 = vtanh.f32 %v2118_v9  ;;  %v3295_v34 = vmul.f32 -1.442695, %v2118_v9 }
0x1639   :  { %3524 = vpow2.f32 %v3295_v34 }
0x163d   :  { %v3523_v41 = vpop.eup %3522 }
0x163e   :  { %2141 = vrot.lane.b32.xlu2 %v3523_v41, %s3610_s27 }
0x163f   :  { %v3525_v2 = vpop.eup %3524 }
0x1640   :  { %v2122_v7 = vadd.f32 1.0, %v3525_v2 }
0x1642   :  { %3526 = vrcp.f32 %v2122_v7  ;;  %v2134_v50 = vand.u32 2147483648, %v2122_v7  ;;  %vm2128_vm4 = vweird.f32 %v2122_v7  ;;  %v2132_v27 = vand.u32 2147483647, %v2122_v7 }
0x1644   :  { %v2135_v38 = vor.u32 1.1754944e-38, %v2134_v50  ;;  %vm2133_vm6 = vcmp.eq.f32.partialorder %v2132_v27, 8.507059e+37 }
0x1648   :  { %v3527_v54 = vpop.eup %3526 }
0x1649   :  { %v2124_v1 = vmul.f32 %v3527_v54, %v2122_v7  ;;  %vm2129_vm3 = vweird.f32 %v3527_v54 }
0x164a   :  { %vm2130_vm5 = vmor %vm2128_vm4, %vm2129_vm3 }
0x164b   :  { %v2125_v58 = vsub.f32 1.0, %v2124_v1 }
0x164d   :  { %v2126_v55 = vmul.f32 %v3527_v54, %v2125_v58 }
0x164f   :  { %v2127_v49 = vadd.f32 %v3527_v54, %v2126_v55 }
0x1651   :  { %v2131_v23 = vsel %vm2130_vm5, %v3527_v54, %v2127_v49 }
0x1652   :  { %v2136_v40 = vsel %vm2133_vm6, %v2135_v38, %v2131_v23 }
0x1653   :  { %v2139_v22 = vmul.f32 %v2136_v40, %v1918_v35 }
0x1698   :  { %v2142_v53 = vpop.permute.xlu2 %2141 }
0x1699   :  { %v2144_v21 = vmul.f32 %v2142_v53, %v2136_v40 }
0x169b   :  { %2146 = vrot.lane.b32.xlu0 %v2144_v21, %s3611_s28 }
0x170d   :  { %v2147_v51 = vpop.permute.xlu0 %2146 }
0x170e   :  { %v2149_v57 = vadd.f32 %v2147_v51, %v2139_v22 }
0x1710   :  { %3528 = vtanh.f32 %v2149_v57 }
0x1716   :  { %v3529_v42 = vpop.eup %3528 }
0x1717   :  { %2152 = vrot.lane.b32.xlu1 %v3529_v42, %s3610_s27 }
0x1789   :  { %v2153_v20 = vpop.permute.xlu1 %2152 }
0x178a   :  { %v2155_v3 = vmul.f32 %v2153_v20, %v2136_v40 }
0x178c   :  { %2157 = vrot.lane.b32.xlu2 %v2155_v3, %s3611_s28 }
0x17e6   :  { %v2158_v25 = vpop.permute.xlu2 %2157 }
0x17e7   :  { %2160 = vst.msk [vmem:[#allocation2 + $0x38] sm:$0xff] %vm218_vm0, %v2158_v25 }
0x17e8   :  { %3602 = dma.done.wait [#allocation5], 16384 }
0x17e9   :  { %3603 = vsyncadd [#allocation5], 4294950912  ;;  %v2190_v52 = vld [vmem:[#allocation3 + $0x60] sm:$0xff]  ;;  %v2191_v32 = vld [vmem:[#allocation3 + $0x68] sm:$0xff] }
0x17ea   :  { %v2192_v36 = vld [vmem:[#allocation3 + $0x70] sm:$0xff]  ;;  %2209 = vmatpush.msrb.mxu0 %v2190_v52  ;;  %2229 = vmatpush.msra.mxu1 %v2191_v32  ;;  %v2193_v48 = vld [vmem:[#allocation3 + $0x78] sm:$0xff]  ;;  %v2186_v59 = vld [vmem:[#allocation3 + $0x40] sm:$0xff] }
0x17eb   :  { %v2187_v6 = vld [vmem:[#allocation3 + $0x48] sm:$0xff]  ;;  %2249 = vmatpush.msra.mxu2 %v2192_v36  ;;  %2269 = vmatpush.msra.mxu3 %v2193_v48  ;;  %v2188_v0 = vld [vmem:[#allocation3 + $0x50] sm:$0xff]  ;;  %v2189_v19 = vld [vmem:[#allocation3 + $0x58] sm:$0xff] }
0x17ec   :  { %v2182_v11 = vld [vmem:[#allocation3 + $0x20] sm:$0xff]  ;;  %2210 = vmatpush.msrb.mxu0 %v2186_v59  ;;  %2230 = vmatpush.msra.mxu1 %v2187_v6  ;;  %v2183_v35 = vld [vmem:[#allocation3 + $0x28] sm:$0xff]  ;;  %v2184_v16 = vld [vmem:[#allocation3 + $0x30] sm:$0xff] }
0x17ed   :  { %v2185_v37 = vld [vmem:[#allocation3 + $0x38] sm:$0xff]  ;;  %2250 = vmatpush.msra.mxu2 %v2188_v0  ;;  %2270 = vmatpush.msra.mxu3 %v2189_v19  ;;  %v2178_v39 = vld [vmem:[#allocation3] sm:$0xff]  ;;  %v2179_v43 = vld [vmem:[#allocation3 + $0x8] sm:$0xff] }
0x17ee   :  { %2211 = vmatpush.msrb.mxu0 %v2182_v11  ;;  %2231 = vmatpush.msra.mxu1 %v2183_v35  ;;  %v2180_v17 = vld [vmem:[#allocation3 + $0x10] sm:$0xff]  ;;  %v2181_v26 = vld [vmem:[#allocation3 + $0x18] sm:$0xff]  ;;  %v2297_v8 = vld [vmem:[#allocation3 + $0xe0] sm:$0xff] }
0x17ef   :  { %v2175_v5 = vld [vmem:[#allocation2] ss:$8 sm:$0xf]  ;;  %2251 = vmatpush.msra.mxu2 %v2184_v16  ;;  %2271 = vmatpush.msra.mxu3 %v2185_v37  ;;  %v2282_v54 = vld [vmem:[#allocation2 + $0x1] ss:$8 sm:$0xf] }
0x17f0   :  { %v2176_v4 = vld [vmem:[#allocation2] ss:$8 sm:$0xf0]  ;;  %2212 = vmatpush.msrb.mxu0 %v2178_v39  ;;  %2232 = vmatpush.msra.mxu1 %v2179_v43  ;;  %v2283_v1 = vld [vmem:[#allocation2 + $0x1] ss:$8 sm:$0xf0] }
0x17f1   :  { %v2177_v56 = vor.u32 %v2176_v4, %v2175_v5  ;;  %2252 = vmatpush.msra.mxu2 %v2180_v17  ;;  %2272 = vmatpush.msra.mxu3 %v2181_v26  ;;  %v2299_v10 = vld [vmem:[#allocation3 + $0xf0] sm:$0xff]  ;;  %v2300_v24 = vld [vmem:[#allocation3 + $0xf8] sm:$0xff]  ;;  %v2298_v33 = vld [vmem:[#allocation3 + $0xe8] sm:$0xff]  ;;  %v2284_v38 = vor.u32 %v2283_v1, %v2282_v54 }
0x17f2   :  { %v2295_v18 = vld [vmem:[#allocation3 + $0xd0] sm:$0xff]  ;;  %v2296_v9 = vld [vmem:[#allocation3 + $0xd8] sm:$0xff]  ;;  %v2293_v41 = vld [vmem:[#allocation3 + $0xc0] sm:$0xff]  ;;  %2316 = vmatpush.msra.mxu0 %v2297_v8  ;;  %2336 = vmatpush.msrb.mxu1 %v2298_v33 }
0x17f3   :  { %3296 = vmatmul.msk.f32.vlgmr.msrb.gmra.mxu0 %vm218_vm0, %v2177_v56  ;;  %3297 = vmatmul.msk.f32.vlgmr.msra.gmra.mxu1 %vm218_vm0, %v2177_v56  ;;  %v2294_v34 = vld [vmem:[#allocation3 + $0xc8] sm:$0xff]  ;;  %v2291_v2 = vld [vmem:[#allocation3 + $0xb0] sm:$0xff]  ;;  %v2292_v7 = vld [vmem:[#allocation3 + $0xb8] sm:$0xff] }
0x17f4   :  { %3298 = vmatmul.msk.f32.vlgmr.msra.gmra.mxu2 %vm218_vm0, %v2177_v56  ;;  %3299 = vmatmul.msk.f32.vlgmr.msra.gmra.mxu3 %vm218_vm0, %v2177_v56  ;;  %v2289_v58 = vld [vmem:[#allocation3 + $0xa0] sm:$0xff]  ;;  %v2290_v55 = vld [vmem:[#allocation3 + $0xa8] sm:$0xff]  ;;  %v2287_v49 = vld [vmem:[#allocation3 + $0x90] sm:$0xff] }
0x17f5   :  { %2356 = vmatpush.msrb.mxu2 %v2299_v10  ;;  %2376 = vmatpush.msrb.mxu3 %v2300_v24  ;;  %v2288_v50 = vld [vmem:[#allocation3 + $0x98] sm:$0xff]  ;;  %v2285_v27 = vld [vmem:[#allocation3 + $0x80] sm:$0xff]  ;;  %v2286_v23 = vld [vmem:[#allocation3 + $0x88] sm:$0xff] }
0x17f6   :  { %2317 = vmatpush.msra.mxu0 %v2293_v41  ;;  %2337 = vmatpush.msrb.mxu1 %v2294_v34  ;;  %v2406_v53 = vld [vmem:[#allocation3 + $0x170] sm:$0xff]  ;;  %v2407_v40 = vld [vmem:[#allocation3 + $0x178] sm:$0xff]  ;;  %v2404_v21 = vld [vmem:[#allocation3 + $0x160] sm:$0xff] }
0x17f7   :  { %2357 = vmatpush.msrb.mxu2 %v2295_v18  ;;  %2377 = vmatpush.msrb.mxu3 %v2296_v9  ;;  %v2405_v22 = vld [vmem:[#allocation3 + $0x168] sm:$0xff]  ;;  %v2402_v51 = vld [vmem:[#allocation3 + $0x150] sm:$0xff]  ;;  %v2403_v57 = vld [vmem:[#allocation3 + $0x158] sm:$0xff] }
0x17f8   :  { %2318 = vmatpush.msra.mxu0 %v2289_v58  ;;  %2338 = vmatpush.msrb.mxu1 %v2290_v55  ;;  %v2400_v42 = vld [vmem:[#allocation3 + $0x140] sm:$0xff]  ;;  %v2401_v20 = vld [vmem:[#allocation3 + $0x148] sm:$0xff]  ;;  %v2398_v3 = vld [vmem:[#allocation3 + $0x130] sm:$0xff] }
0x17f9   :  { %2358 = vmatpush.msrb.mxu2 %v2291_v2  ;;  %2378 = vmatpush.msrb.mxu3 %v2292_v7  ;;  %v2399_v25 = vld [vmem:[#allocation3 + $0x138] sm:$0xff]  ;;  %v2396_v36 = vld [vmem:[#allocation3 + $0x120] sm:$0xff]  ;;  %v2397_v48 = vld [vmem:[#allocation3 + $0x128] sm:$0xff] }
0x17fa   :  { %2319 = vmatpush.msra.mxu0 %v2285_v27  ;;  %2339 = vmatpush.msrb.mxu1 %v2286_v23  ;;  %v2389_v52 = vld [vmem:[#allocation2 + $0x2] ss:$8 sm:$0xf]  ;;  %v2496_v10 = vld [vmem:[#allocation2 + $0x3] ss:$8 sm:$0xf] }
0x17fb   :  { %2359 = vmatpush.msrb.mxu2 %v2287_v49  ;;  %2379 = vmatpush.msrb.mxu3 %v2288_v50  ;;  %v2390_v32 = vld [vmem:[#allocation2 + $0x2] ss:$8 sm:$0xf0]  ;;  %v2497_v24 = vld [vmem:[#allocation2 + $0x3] ss:$8 sm:$0xf0] }
0x17fc   :  { %3300 = vmatmul.msk.f32.vlgmr.msra.gmra.mxu0 %vm218_vm0, %v2284_v38  ;;  %3301 = vmatmul.msk.f32.vlgmr.msrb.gmra.mxu1 %vm218_vm0, %v2284_v38  ;;  %v2394_v59 = vld [vmem:[#allocation3 + $0x110] sm:$0xff]  ;;  %v2395_v6 = vld [vmem:[#allocation3 + $0x118] sm:$0xff]  ;;  %v2392_v0 = vld [vmem:[#allocation3 + $0x100] sm:$0xff]  ;;  %v2391_v11 = vor.u32 %v2390_v32, %v2389_v52  ;;  %v2498_v2 = vor.u32 %v2497_v24, %v2496_v10 }
0x17fd   :  { %3302 = vmatmul.msk.f32.vlgmr.msrb.gmra.mxu2 %vm218_vm0, %v2284_v38  ;;  %3303 = vmatmul.msk.f32.vlgmr.msrb.gmra.mxu3 %vm218_vm0, %v2284_v38  ;;  %v2393_v19 = vld [vmem:[#allocation3 + $0x108] sm:$0xff]  ;;  %v2513_v35 = vld [vmem:[#allocation3 + $0x1f0] sm:$0xff]  ;;  %v2514_v16 = vld [vmem:[#allocation3 + $0x1f8] sm:$0xff] }
0x17fe   :  { %2463 = vmatpush.msra.mxu2 %v2406_v53  ;;  %2483 = vmatpush.msra.mxu3 %v2407_v40  ;;  %v2511_v37 = vld [vmem:[#allocation3 + $0x1e0] sm:$0xff]  ;;  %v2512_v39 = vld [vmem:[#allocation3 + $0x1e8] sm:$0xff]  ;;  %v2509_v43 = vld [vmem:[#allocation3 + $0x1d0] sm:$0xff] }
0x17ff   :  { %2423 = vmatpush.msrb.mxu0 %v2404_v21  ;;  %2443 = vmatpush.msra.mxu1 %v2405_v22  ;;  %v2510_v17 = vld [vmem:[#allocation3 + $0x1d8] sm:$0xff]  ;;  %v2507_v26 = vld [vmem:[#allocation3 + $0x1c0] sm:$0xff]  ;;  %v2508_v5 = vld [vmem:[#allocation3 + $0x1c8] sm:$0xff] }
0x1800   :  { %2464 = vmatpush.msra.mxu2 %v2402_v51  ;;  %2484 = vmatpush.msra.mxu3 %v2403_v57  ;;  %v2505_v4 = vld [vmem:[#allocation3 + $0x1b0] sm:$0xff]  ;;  %v2506_v56 = vld [vmem:[#allocation3 + $0x1b8] sm:$0xff]  ;;  %v2503_v8 = vld [vmem:[#allocation3 + $0x1a0] sm:$0xff] }
0x1801   :  { %2424 = vmatpush.msrb.mxu0 %v2400_v42  ;;  %2444 = vmatpush.msra.mxu1 %v2401_v20  ;;  %v2504_v33 = vld [vmem:[#allocation3 + $0x1a8] sm:$0xff]  ;;  %v2501_v18 = vld [vmem:[#allocation3 + $0x190] sm:$0xff]  ;;  %v2502_v9 = vld [vmem:[#allocation3 + $0x198] sm:$0xff] }
0x1802   :  { %2465 = vmatpush.msra.mxu2 %v2398_v3  ;;  %2485 = vmatpush.msra.mxu3 %v2399_v25  ;;  %v2499_v41 = vld [vmem:[#allocation3 + $0x180] sm:$0xff]  ;;  %v2500_v34 = vld [vmem:[#allocation3 + $0x188] sm:$0xff]  ;;  %v2620_v7 = vld [vmem:[#allocation3 + $0x270] sm:$0xff] }
0x1803   :  { %2425 = vmatpush.msrb.mxu0 %v2396_v36  ;;  %2445 = vmatpush.msra.mxu1 %v2397_v48  ;;  %v2621_v54 = vld [vmem:[#allocation3 + $0x278] sm:$0xff]  ;;  %v2618_v1 = vld [vmem:[#allocation3 + $0x260] sm:$0xff]  ;;  %v2619_v58 = vld [vmem:[#allocation3 + $0x268] sm:$0xff] }
0x1804   :  { %2466 = vmatpush.msra.mxu2 %v2394_v59  ;;  %2486 = vmatpush.msra.mxu3 %v2395_v6  ;;  %v2616_v55 = vld [vmem:[#allocation3 + $0x250] sm:$0xff]  ;;  %v2617_v49 = vld [vmem:[#allocation3 + $0x258] sm:$0xff]  ;;  %v2614_v50 = vld [vmem:[#allocation3 + $0x240] sm:$0xff] }
0x1805   :  { %2426 = vmatpush.msrb.mxu0 %v2392_v0  ;;  %2446 = vmatpush.msra.mxu1 %v2393_v19  ;;  %v2615_v27 = vld [vmem:[#allocation3 + $0x248] sm:$0xff]  ;;  %v2612_v23 = vld [vmem:[#allocation3 + $0x230] sm:$0xff]  ;;  %v2613_v38 = vld [vmem:[#allocation3 + $0x238] sm:$0xff] }
0x1806   :  { %3304 = vmatmul.msk.f32.vlgmr.msrb.gmra.mxu0 %vm218_vm0, %v2391_v11  ;;  %3305 = vmatmul.msk.f32.vlgmr.msra.gmra.mxu1 %vm218_vm0, %v2391_v11  ;;  %v2603_v53 = vld [vmem:[#allocation2 + $0x4] ss:$8 sm:$0xf] }
0x1807   :  { %3306 = vmatmul.msk.f32.vlgmr.msra.gmra.mxu2 %vm218_vm0, %v2391_v11  ;;  %3307 = vmatmul.msk.f32.vlgmr.msra.gmra.mxu3 %vm218_vm0, %v2391_v11  ;;  %v2604_v40 = vld [vmem:[#allocation2 + $0x4] ss:$8 sm:$0xf0] }
0x1808   :  { %2570 = vmatpush.msrb.mxu2 %v2513_v35  ;;  %2590 = vmatpush.msrb.mxu3 %v2514_v16  ;;  %v2610_v21 = vld [vmem:[#allocation3 + $0x220] sm:$0xff]  ;;  %v2611_v22 = vld [vmem:[#allocation3 + $0x228] sm:$0xff]  ;;  %v2608_v51 = vld [vmem:[#allocation3 + $0x210] sm:$0xff]  ;;  %v2605_v3 = vor.u32 %v2604_v40, %v2603_v53 }
0x1809   :  { %2530 = vmatpush.msra.mxu0 %v2511_v37  ;;  %2550 = vmatpush.msrb.mxu1 %v2512_v39  ;;  %v2609_v57 = vld [vmem:[#allocation3 + $0x218] sm:$0xff]  ;;  %v2606_v42 = vld [vmem:[#allocation3 + $0x200] sm:$0xff]  ;;  %v2607_v20 = vld [vmem:[#allocation3 + $0x208] sm:$0xff] }
0x180a   :  { %2571 = vmatpush.msrb.mxu2 %v2509_v43  ;;  %2591 = vmatpush.msrb.mxu3 %v2510_v17  ;;  %v2727_v25 = vld [vmem:[#allocation3 + $0x2f0] sm:$0xff]  ;;  %v2728_v52 = vld [vmem:[#allocation3 + $0x2f8] sm:$0xff]  ;;  %v2725_v32 = vld [vmem:[#allocation3 + $0x2e0] sm:$0xff] }
0x180b   :  { %2531 = vmatpush.msra.mxu0 %v2507_v26  ;;  %2551 = vmatpush.msrb.mxu1 %v2508_v5  ;;  %v2726_v36 = vld [vmem:[#allocation3 + $0x2e8] sm:$0xff]  ;;  %v2723_v48 = vld [vmem:[#allocation3 + $0x2d0] sm:$0xff]  ;;  %v2724_v59 = vld [vmem:[#allocation3 + $0x2d8] sm:$0xff] }
0x180c   :  { %2572 = vmatpush.msrb.mxu2 %v2505_v4  ;;  %2592 = vmatpush.msrb.mxu3 %v2506_v56  ;;  %v2721_v6 = vld [vmem:[#allocation3 + $0x2c0] sm:$0xff]  ;;  %v2722_v0 = vld [vmem:[#allocation3 + $0x2c8] sm:$0xff]  ;;  %v2719_v19 = vld [vmem:[#allocation3 + $0x2b0] sm:$0xff] }
0x180d   :  { %2532 = vmatpush.msra.mxu0 %v2503_v8  ;;  %2552 = vmatpush.msrb.mxu1 %v2504_v33  ;;  %v2720_v11 = vld [vmem:[#allocation3 + $0x2b8] sm:$0xff]  ;;  %v2717_v37 = vld [vmem:[#allocation3 + $0x2a0] sm:$0xff]  ;;  %v2718_v39 = vld [vmem:[#allocation3 + $0x2a8] sm:$0xff] }
0x180e   :  { %2573 = vmatpush.msrb.mxu2 %v2501_v18  ;;  %2593 = vmatpush.msrb.mxu3 %v2502_v9  ;;  %v2710_v35 = vld [vmem:[#allocation2 + $0x5] ss:$8 sm:$0xf] }
0x180f   :  { %2533 = vmatpush.msra.mxu0 %v2499_v41  ;;  %2553 = vmatpush.msrb.mxu1 %v2500_v34  ;;  %v2711_v16 = vld [vmem:[#allocation2 + $0x5] ss:$8 sm:$0xf0] }
0x1810   :  { %3308 = vmatmul.msk.f32.vlgmr.msra.gmra.mxu0 %vm218_vm0, %v2498_v2  ;;  %3309 = vmatmul.msk.f32.vlgmr.msrb.gmra.mxu1 %vm218_vm0, %v2498_v2  ;;  %v2715_v43 = vld [vmem:[#allocation3 + $0x290] sm:$0xff]  ;;  %v2716_v17 = vld [vmem:[#allocation3 + $0x298] sm:$0xff]  ;;  %v2713_v26 = vld [vmem:[#allocation3 + $0x280] sm:$0xff]  ;;  %v2712_v4 = vor.u32 %v2711_v16, %v2710_v35 }
0x1811   :  { %3310 = vmatmul.msk.f32.vlgmr.msrb.gmra.mxu2 %vm218_vm0, %v2498_v2  ;;  %3311 = vmatmul.msk.f32.vlgmr.msrb.gmra.mxu3 %vm218_vm0, %v2498_v2  ;;  %v2714_v5 = vld [vmem:[#allocation3 + $0x288] sm:$0xff]  ;;  %v2834_v56 = vld [vmem:[#allocation3 + $0x370] sm:$0xff]  ;;  %v2835_v10 = vld [vmem:[#allocation3 + $0x378] sm:$0xff] }
0x1812   :  { %2677 = vmatpush.msra.mxu2 %v2620_v7  ;;  %2697 = vmatpush.msra.mxu3 %v2621_v54  ;;  %v2832_v24 = vld [vmem:[#allocation3 + $0x360] sm:$0xff]  ;;  %v2833_v8 = vld [vmem:[#allocation3 + $0x368] sm:$0xff]  ;;  %v2830_v33 = vld [vmem:[#allocation3 + $0x350] sm:$0xff] }
0x1813   :  { %2637 = vmatpush.msrb.mxu0 %v2618_v1  ;;  %2657 = vmatpush.msra.mxu1 %v2619_v58  ;;  %v2831_v18 = vld [vmem:[#allocation3 + $0x358] sm:$0xff]  ;;  %v2828_v9 = vld [vmem:[#allocation3 + $0x340] sm:$0xff]  ;;  %v2829_v41 = vld [vmem:[#allocation3 + $0x348] sm:$0xff] }
0x1814   :  { %2678 = vmatpush.msra.mxu2 %v2616_v55  ;;  %2698 = vmatpush.msra.mxu3 %v2617_v49  ;;  %v2826_v34 = vld [vmem:[#allocation3 + $0x330] sm:$0xff]  ;;  %v2827_v2 = vld [vmem:[#allocation3 + $0x338] sm:$0xff]  ;;  %v2824_v1 = vld [vmem:[#allocation3 + $0x320] sm:$0xff] }
0x1815   :  { %2638 = vmatpush.msrb.mxu0 %v2614_v50  ;;  %2658 = vmatpush.msra.mxu1 %v2615_v27  ;;  %v2817_v7 = vld [vmem:[#allocation2 + $0x6] ss:$8 sm:$0xf] }
0x1816   :  { %2679 = vmatpush.msra.mxu2 %v2612_v23  ;;  %2699 = vmatpush.msra.mxu3 %v2613_v38  ;;  %v2818_v54 = vld [vmem:[#allocation2 + $0x6] ss:$8 sm:$0xf0] }
0x1817   :  { %2639 = vmatpush.msrb.mxu0 %v2610_v21  ;;  %2659 = vmatpush.msra.mxu1 %v2611_v22  ;;  %v2825_v58 = vld [vmem:[#allocation3 + $0x328] sm:$0xff]  ;;  %v2822_v55 = vld [vmem:[#allocation3 + $0x310] sm:$0xff]  ;;  %v2823_v49 = vld [vmem:[#allocation3 + $0x318] sm:$0xff]  ;;  %v2819_v23 = vor.u32 %v2818_v54, %v2817_v7 }
0x1818   :  { %2680 = vmatpush.msra.mxu2 %v2608_v51  ;;  %2700 = vmatpush.msra.mxu3 %v2609_v57  ;;  %v2820_v50 = vld [vmem:[#allocation3 + $0x300] sm:$0xff]  ;;  %v2821_v27 = vld [vmem:[#allocation3 + $0x308] sm:$0xff]  ;;  %v2941_v38 = vld [vmem:[#allocation3 + $0x3f0] sm:$0xff] }
0x1819   :  { %2640 = vmatpush.msrb.mxu0 %v2606_v42  ;;  %2660 = vmatpush.msra.mxu1 %v2607_v20  ;;  %v2942_v53 = vld [vmem:[#allocation3 + $0x3f8] sm:$0xff]  ;;  %v2939_v40 = vld [vmem:[#allocation3 + $0x3e0] sm:$0xff]  ;;  %v2940_v21 = vld [vmem:[#allocation3 + $0x3e8] sm:$0xff] }
0x181a   :  { %3312 = vmatmul.msk.f32.vlgmr.msrb.gmra.mxu0 %vm218_vm0, %v2605_v3  ;;  %3313 = vmatmul.msk.f32.vlgmr.msra.gmra.mxu1 %vm218_vm0, %v2605_v3  ;;  %v2937_v22 = vld [vmem:[#allocation3 + $0x3d0] sm:$0xff]  ;;  %v2938_v51 = vld [vmem:[#allocation3 + $0x3d8] sm:$0xff]  ;;  %v2935_v57 = vld [vmem:[#allocation3 + $0x3c0] sm:$0xff] }
0x181b   :  { %3314 = vmatmul.msk.f32.vlgmr.msra.gmra.mxu2 %vm218_vm0, %v2605_v3  ;;  %3315 = vmatmul.msk.f32.vlgmr.msra.gmra.mxu3 %vm218_vm0, %v2605_v3  ;;  %v2936_v42 = vld [vmem:[#allocation3 + $0x3c8] sm:$0xff]  ;;  %v2933_v20 = vld [vmem:[#allocation3 + $0x3b0] sm:$0xff]  ;;  %v2934_v3 = vld [vmem:[#allocation3 + $0x3b8] sm:$0xff] }
0x181c   :  { %2784 = vmatpush.msrb.mxu2 %v2727_v25  ;;  %2804 = vmatpush.msrb.mxu3 %v2728_v52  ;;  %v2924_v25 = vld [vmem:[#allocation2 + $0x7] ss:$8 sm:$0xf]  ;;  %v2165_v7 = vld [vmem:[%s4817_s11] sm:$0xf] }
0x181d   :  { %2744 = vmatpush.msra.mxu0 %v2725_v32  ;;  %2764 = vmatpush.msrb.mxu1 %v2726_v36  ;;  %v2925_v52 = vld [vmem:[#allocation2 + $0x7] ss:$8 sm:$0xf0] }
0x181e   :  { %2785 = vmatpush.msrb.mxu2 %v2723_v48  ;;  %2805 = vmatpush.msrb.mxu3 %v2724_v59  ;;  %v2931_v32 = vld [vmem:[#allocation3 + $0x3a0] sm:$0xff]  ;;  %v2932_v36 = vld [vmem:[#allocation3 + $0x3a8] sm:$0xff]  ;;  %v2929_v48 = vld [vmem:[#allocation3 + $0x390] sm:$0xff] }
0x181f   :  { %2745 = vmatpush.msra.mxu0 %v2721_v6  ;;  %2765 = vmatpush.msrb.mxu1 %v2722_v0  ;;  %v2930_v59 = vld [vmem:[#allocation3 + $0x398] sm:$0xff]  ;;  %v2927_v6 = vld [vmem:[#allocation3 + $0x380] sm:$0xff]  ;;  %v2928_v0 = vld [vmem:[#allocation3 + $0x388] sm:$0xff] }
0x1820   :  { %2786 = vmatpush.msrb.mxu2 %v2719_v19  ;;  %2806 = vmatpush.msrb.mxu3 %v2720_v11  ;;  %v2926_v19 = vor.u32 %v2925_v52, %v2924_v25 }
0x1821   :  { %2746 = vmatpush.msra.mxu0 %v2717_v37  ;;  %2766 = vmatpush.msrb.mxu1 %v2718_v39 }
0x1822   :  { %2787 = vmatpush.msrb.mxu2 %v2715_v43  ;;  %2807 = vmatpush.msrb.mxu3 %v2716_v17 }
0x1823   :  { %2747 = vmatpush.msra.mxu0 %v2713_v26  ;;  %2767 = vmatpush.msrb.mxu1 %v2714_v5 }
0x1824   :  { %3316 = vmatmul.msk.f32.vlgmr.msra.gmra.mxu0 %vm218_vm0, %v2712_v4  ;;  %3317 = vmatmul.msk.f32.vlgmr.msrb.gmra.mxu1 %vm218_vm0, %v2712_v4 }
0x1825   :  { %3318 = vmatmul.msk.f32.vlgmr.msrb.gmra.mxu2 %vm218_vm0, %v2712_v4  ;;  %3319 = vmatmul.msk.f32.vlgmr.msrb.gmra.mxu3 %vm218_vm0, %v2712_v4 }
0x1826   :  { %2891 = vmatpush.msra.mxu2 %v2834_v56  ;;  %2911 = vmatpush.msra.mxu3 %v2835_v10 }
0x1827   :  { %2851 = vmatpush.msrb.mxu0 %v2832_v24  ;;  %2871 = vmatpush.msra.mxu1 %v2833_v8 }
0x1828   :  { %2892 = vmatpush.msra.mxu2 %v2830_v33  ;;  %2912 = vmatpush.msra.mxu3 %v2831_v18 }
0x1829   :  { %2852 = vmatpush.msrb.mxu0 %v2828_v9  ;;  %2872 = vmatpush.msra.mxu1 %v2829_v41 }
0x182a   :  { %2893 = vmatpush.msra.mxu2 %v2826_v34  ;;  %2913 = vmatpush.msra.mxu3 %v2827_v2 }
0x182b   :  { %2853 = vmatpush.msrb.mxu0 %v2824_v1  ;;  %2873 = vmatpush.msra.mxu1 %v2825_v58  ;;  %v2167_v58 = vperm.slane %v2165_v7, 0 }
0x182c   :  { %2894 = vmatpush.msra.mxu2 %v2822_v55  ;;  %2914 = vmatpush.msra.mxu3 %v2823_v49  ;;  %v2168_v55 = vperm.slane %v2165_v7, 1 }
0x182d   :  { %2854 = vmatpush.msrb.mxu0 %v2820_v50  ;;  %2874 = vmatpush.msra.mxu1 %v2821_v27 }
0x182e   :  { %3320 = vmatmul.msk.f32.vlgmr.msrb.gmra.mxu0 %vm218_vm0, %v2819_v23  ;;  %3321 = vmatmul.msk.f32.vlgmr.msra.gmra.mxu1 %vm218_vm0, %v2819_v23 }
0x182f   :  { %3322 = vmatmul.msk.f32.vlgmr.msra.gmra.mxu2 %vm218_vm0, %v2819_v23  ;;  %3323 = vmatmul.msk.f32.vlgmr.msra.gmra.mxu3 %vm218_vm0, %v2819_v23 }
0x1830   :  { %2998 = vmatpush.msrb.mxu2 %v2941_v38  ;;  %3018 = vmatpush.msrb.mxu3 %v2942_v53 }
0x1831   :  { %2958 = vmatpush.msra.mxu0 %v2939_v40  ;;  %2978 = vmatpush.msrb.mxu1 %v2940_v21  ;;  %v2169_v40 = vperm.slane %v2165_v7, 2  ;;  %v2170_v21 = vperm.slane %v2165_v7, 3 }
0x1832   :  { %2999 = vmatpush.msrb.mxu2 %v2937_v22  ;;  %3019 = vmatpush.msrb.mxu3 %v2938_v51 }
0x1833   :  { %2959 = vmatpush.msra.mxu0 %v2935_v57  ;;  %2979 = vmatpush.msrb.mxu1 %v2936_v42 }
0x1834   :  { %3000 = vmatpush.msrb.mxu2 %v2933_v20  ;;  %3020 = vmatpush.msrb.mxu3 %v2934_v3 }
0x1835   :  { %2960 = vmatpush.msra.mxu0 %v2931_v32  ;;  %2980 = vmatpush.msrb.mxu1 %v2932_v36 }
0x1836   :  { %3001 = vmatpush.msrb.mxu2 %v2929_v48  ;;  %3021 = vmatpush.msrb.mxu3 %v2930_v59 }
0x1837   :  { %2961 = vmatpush.msra.mxu0 %v2927_v6  ;;  %2981 = vmatpush.msrb.mxu1 %v2928_v0 }
0x1838   :  { %3324 = vmatmul.msk.f32.vlgmr.msra.gmra.mxu0 %vm218_vm0, %v2926_v19  ;;  %3325 = vmatmul.msk.f32.vlgmr.msrb.gmra.mxu1 %vm218_vm0, %v2926_v19 }
0x1839   :  { %3326 = vmatmul.msk.f32.vlgmr.msrb.gmra.mxu2 %vm218_vm0, %v2926_v19  ;;  %3327 = vmatmul.msk.f32.vlgmr.msrb.gmra.mxu3 %vm218_vm0, %v2926_v19 }
0x183a   :  { %3153 = vmatpush.msra.mxu2 %v3929_v47  ;;  %3113 = vmatpush.msrb.mxu0 %v3769_v15 }
0x1870   :  { %v2214_v11 = vpop.f32.mrf.mxu0  ;;  %v2234_v35 = vpop.f32.mrf.mxu1 }
0x1871   :  { %v2277_v49 = vadd.f32 %v2214_v11, %v2167_v58  ;;  %v2278_v50 = vadd.f32 %v2234_v35, %v2168_v55 }
0x1877   :  { %v2254_v16 = vpop.f32.mrf.mxu2  ;;  %v2274_v37 = vpop.f32.mrf.mxu3 }
0x1878   :  { %v2279_v25 = vadd.f32 %v2254_v16, %v2169_v40  ;;  %v2280_v52 = vadd.f32 %v2274_v37, %v2170_v21 }
0x1879   :  { %v2321_v39 = vpop.f32.mrf.mxu0  ;;  %v2341_v43 = vpop.f32.mrf.mxu1 }
0x187a   :  { %v2384_v38 = vadd.f32 %v2321_v39, %v2277_v49  ;;  %v2385_v53 = vadd.f32 %v2341_v43, %v2278_v50 }
0x1880   :  { %v2361_v17 = vpop.f32.mrf.mxu2  ;;  %v2381_v26 = vpop.f32.mrf.mxu3 }
0x1881   :  { %v2386_v48 = vadd.f32 %v2361_v17, %v2279_v25  ;;  %v2387_v59 = vadd.f32 %v2381_v26, %v2280_v52 }
0x1883   :  { %v2428_v5 = vpop.f32.mrf.mxu0  ;;  %v2448_v4 = vpop.f32.mrf.mxu1 }
0x1884   :  { %v2491_v57 = vadd.f32 %v2428_v5, %v2384_v38  ;;  %v2492_v42 = vadd.f32 %v2448_v4, %v2385_v53 }
0x188a   :  { %v2468_v56 = vpop.f32.mrf.mxu2  ;;  %v2488_v10 = vpop.f32.mrf.mxu3 }
0x188b   :  { %v2493_v35 = vadd.f32 %v2468_v56, %v2386_v48  ;;  %v2494_v39 = vadd.f32 %v2488_v10, %v2387_v59 }
0x188d   :  { %v2535_v24 = vpop.f32.mrf.mxu0  ;;  %v2555_v8 = vpop.f32.mrf.mxu1 }
0x188e   :  { %v2598_v20 = vadd.f32 %v2535_v24, %v2491_v57  ;;  %v2599_v3 = vadd.f32 %v2555_v8, %v2492_v42 }
0x1894   :  { %v2575_v33 = vpop.f32.mrf.mxu2  ;;  %v2595_v18 = vpop.f32.mrf.mxu3 }
0x1895   :  { %v2600_v58 = vadd.f32 %v2575_v33, %v2493_v35  ;;  %v2601_v55 = vadd.f32 %v2595_v18, %v2494_v39 }
0x1897   :  { %v2642_v9 = vpop.f32.mrf.mxu0  ;;  %v2662_v41 = vpop.f32.mrf.mxu1 }
0x1898   :  { %v2705_v32 = vadd.f32 %v2642_v9, %v2598_v20  ;;  %v2706_v36 = vadd.f32 %v2662_v41, %v2599_v3 }
0x189e   :  { %v2682_v34 = vpop.f32.mrf.mxu2  ;;  %v2702_v2 = vpop.f32.mrf.mxu3 }
0x189f   :  { %v2707_v16 = vadd.f32 %v2682_v34, %v2600_v58  ;;  %v2708_v37 = vadd.f32 %v2702_v2, %v2601_v55 }
0x18a1   :  { %v2749_v54 = vpop.f32.mrf.mxu0  ;;  %v2769_v1 = vpop.f32.mrf.mxu1 }
0x18a2   :  { %v2812_v6 = vadd.f32 %v2749_v54, %v2705_v32  ;;  %v2813_v0 = vadd.f32 %v2769_v1, %v2706_v36 }
0x18a8   :  { %v2789_v27 = vpop.f32.mrf.mxu2  ;;  %v2809_v23 = vpop.f32.mrf.mxu3 }
0x18a9   :  { %v2814_v26 = vadd.f32 %v2789_v27, %v2707_v16  ;;  %v2815_v41 = vadd.f32 %v2809_v23, %v2708_v37 }
0x18ab   :  { %v2856_v22 = vpop.f32.mrf.mxu0  ;;  %v2876_v51 = vpop.f32.mrf.mxu1 }
0x18ac   :  { %v2919_v43 = vadd.f32 %v2856_v22, %v2812_v6  ;;  %v2920_v7 = vadd.f32 %v2876_v51, %v2813_v0 }
0x18b2   :  { %v2896_v19 = vpop.f32.mrf.mxu2  ;;  %v2916_v11 = vpop.f32.mrf.mxu3 }
0x18b3   :  { %v2921_v10 = vadd.f32 %v2896_v19, %v2814_v26  ;;  %v2922_v1 = vadd.f32 %v2916_v11, %v2815_v41 }
0x18b5   :  { %v2963_v5 = vpop.f32.mrf.mxu0  ;;  %v2983_v4 = vpop.f32.mrf.mxu1 }
0x18b6   :  { %v3026_v24 = vadd.f32 %v2963_v5, %v2919_v43  ;;  %v3027_v8 = vadd.f32 %v2983_v4, %v2920_v7 }
0x18b8   :  { %vm3030_vm0 = vcmp.gt.f32.partialorder %v3026_v24, 0.0  ;;  %v3034_v9 = vmul.f32 0.01, %v3026_v24  ;;  %vm3031_vm7 = vcmp.gt.f32.partialorder %v3027_v8, 0.0  ;;  %v3035_v17 = vmul.f32 0.01, %v3027_v8 }
0x18ba   :  { %v4724_v54 = vsel %vm3030_vm0, %v3026_v24, %v3034_v9  ;;  %v4726_v56 = vsel %vm3031_vm7, %v3027_v8, %v3035_v17 }
0x18bc   :  { %v3003_v33 = vpop.f32.mrf.mxu2  ;;  %v3023_v18 = vpop.f32.mrf.mxu3 }
0x18bd   :  { %v3028_v49 = vadd.f32 %v3003_v33, %v2921_v10  ;;  %v3029_v50 = vadd.f32 %v3023_v18, %v2922_v1 }
0x18bf   :  { %vm3032_vm8 = vcmp.gt.f32.partialorder %v3028_v49, 0.0  ;;  %v3036_v38 = vmul.f32 0.01, %v3028_v49  ;;  %vm3033_vm9 = vcmp.gt.f32.partialorder %v3029_v50, 0.0  ;;  %v3037_v34 = vmul.f32 0.01, %v3029_v50 }
0x18c1   :  { %v4728_v2 = vsel %vm3032_vm8, %v3028_v49, %v3036_v38  ;;  %v4730_v53 = vsel %vm3033_vm9, %v3029_v50, %v3037_v34 }
0x18c2   :  { %3604 = dma.done.wait [#allocation5 + $0x1], 8192 }
0x18c3   :  { %3605 = vsyncadd [#allocation5 + $0x1], 4294959104  ;;  %3173 = vmatpush.msra.mxu3 %v4009_v63  ;;  %3133 = vmatpush.msra.mxu1 %v3849_v31  ;;  %v4873_v15 = vld [vmem:[#allocation27_spill] sm:$0xff]  ;;  %v4883_v47 = vld [vmem:[#allocation37_spill] sm:$0xff]  ;;  %s3612_s28 = smov [#allocation6]   ;;  %s3201_s30 = sshll.u32 %s4820_s14, 4  ;;  %s3202_s30 = int_to_ptr.hbm [resolvable:$true] %s3201_s30 }
0x18c4   :  { %3154 = vmatpush.msra.mxu2 %v3924_v46  ;;  %3114 = vmatpush.msrb.mxu0 %v3764_v14  ;;  %v4872_v14 = vld [vmem:[#allocation51_spill] sm:$0xff]  ;;  %v4881_v46 = vld [vmem:[#allocation25_spill] sm:$0xff]  ;;  %v4887_v63 = vld [vmem:[#allocation36_spill] sm:$0xff]  ;;  %s3199_s1 = sshll.u32 %s3612_s28, 4  ;;  %s3200_s1 = int_to_ptr.vmem [resolvable:$true] %s3199_s1 }
0x18c5   :  { %3174 = vmatpush.msra.mxu3 %v4004_v62  ;;  %3134 = vmatpush.msra.mxu1 %v3844_v30  ;;  %v4874_v30 = vld [vmem:[#allocation63_spill] sm:$0xff]  ;;  %v4886_v62 = vld [vmem:[#allocation60_spill] sm:$0xff]  ;;  %v4892_v22 = vld [vmem:[#allocation46_spill] sm:$0xff] }
0x18c6   :  { %3155 = vmatpush.msra.mxu2 %v3919_v45  ;;  %3115 = vmatpush.msrb.mxu0 %v3759_v13  ;;  %v4875_v31 = vld [vmem:[#allocation39_spill] sm:$0xff]  ;;  %v4876_v13 = vld [vmem:[#allocation50_spill] sm:$0xff]  ;;  %v4896_v20 = vld [vmem:[#allocation45_spill] sm:$0xff] }
0x18c7   :  { %3175 = vmatpush.msra.mxu3 %v3999_v61  ;;  %3135 = vmatpush.msra.mxu1 %v3839_v29  ;;  %v4877_v45 = vld [vmem:[#allocation26_spill] sm:$0xff]  ;;  %v4885_v61 = vld [vmem:[#allocation24_spill] sm:$0xff]  ;;  %v4888_v27 = vld [vmem:[#allocation47_spill] sm:$0xff] }
0x18c8   :  { %3156 = vmatpush.msra.mxu2 %v3914_v44  ;;  %3116 = vmatpush.msrb.mxu0 %v3754_v12  ;;  %v4878_v29 = vld [vmem:[#allocation62_spill] sm:$0xff]  ;;  %v4880_v12 = vld [vmem:[#allocation49_spill] sm:$0xff]  ;;  %v4889_v23 = vld [vmem:[#allocation23_spill] sm:$0xff] }
0x18c9   :  { %3176 = vmatpush.msra.mxu3 %v3994_v60  ;;  %3136 = vmatpush.msra.mxu1 %v3834_v28  ;;  %v4879_v44 = vld [vmem:[#allocation38_spill] sm:$0xff]  ;;  %v4882_v28 = vld [vmem:[#allocation61_spill] sm:$0xff]  ;;  %v4884_v60 = vld [vmem:[#allocation48_spill] sm:$0xff] }
0x18ca   :  { %3157 = vmatpush.msra.mxu2 %v4872_v14  ;;  %3117 = vmatpush.msrb.mxu0 %v4873_v15  ;;  %v4890_v40 = vld [vmem:[#allocation59_spill] sm:$0xff]  ;;  %v4893_v51 = vld [vmem:[#allocation22_spill] sm:$0xff]  ;;  %v4897_v3 = vld [vmem:[#allocation21_spill] sm:$0xff] }
0x18cb   :  { %3177 = vmatpush.msra.mxu3 %v4874_v30  ;;  %3137 = vmatpush.msra.mxu1 %v4875_v31  ;;  %v4891_v21 = vld [vmem:[#allocation35_spill] sm:$0xff]  ;;  %v4894_v57 = vld [vmem:[#allocation58_spill] sm:$0xff]  ;;  %v4898_v25 = vld [vmem:[#allocation57_spill] sm:$0xff] }
0x18cc   :  { %3158 = vmatpush.msra.mxu2 %v4876_v13  ;;  %3118 = vmatpush.msrb.mxu0 %v4877_v45  ;;  %v4895_v42 = vld [vmem:[#allocation34_spill] sm:$0xff]  ;;  %v4899_v52 = vld [vmem:[#allocation33_spill] sm:$0xff]  ;;  %v4900_v32 = vld [vmem:[#allocation44_spill] sm:$0xff] }
0x18cd   :  { %3178 = vmatpush.msra.mxu3 %v4878_v29  ;;  %3138 = vmatpush.msra.mxu1 %v4879_v44  ;;  %v4901_v36 = vld [vmem:[#allocation20_spill] sm:$0xff]  ;;  %v4904_v6 = vld [vmem:[#allocation43_spill] sm:$0xff]  ;;  %v4908_v35 = vld [vmem:[#allocation42_spill] sm:$0xff] }
0x18ce   :  { %3159 = vmatpush.msra.mxu2 %v4880_v12  ;;  %3119 = vmatpush.msrb.mxu0 %v4881_v46  ;;  %v4902_v48 = vld [vmem:[#allocation56_spill] sm:$0xff]  ;;  %v4905_v0 = vld [vmem:[#allocation19_spill] sm:$0xff]  ;;  %v4909_v39 = vld [vmem:[#allocation18_spill] sm:$0xff] }
0x18cf   :  { %3179 = vmatpush.msra.mxu3 %v4882_v28  ;;  %3139 = vmatpush.msra.mxu1 %v4883_v47  ;;  %v4903_v59 = vld [vmem:[#allocation32_spill] sm:$0xff]  ;;  %v4906_v19 = vld [vmem:[#allocation55_spill] sm:$0xff]  ;;  %v4910_v43 = vld [vmem:[#allocation54_spill] sm:$0xff] }
0x18d0   :  { %3160 = vmatpush.msra.mxu2 %v4884_v60  ;;  %3120 = vmatpush.msrb.mxu0 %v4885_v61  ;;  %v4907_v11 = vld [vmem:[#allocation31_spill] sm:$0xff]  ;;  %v4911_v7 = vld [vmem:[#allocation30_spill] sm:$0xff]  ;;  %v4912_v58 = vld [vmem:[#allocation41_spill] sm:$0xff] }
0x18d1   :  { %3180 = vmatpush.msra.mxu3 %v4886_v62  ;;  %3140 = vmatpush.msra.mxu1 %v4887_v63  ;;  %v4913_v55 = vld [vmem:[#allocation17_spill] sm:$0xff]  ;;  %v4916_v24 = vld [vmem:[#allocation40_spill] sm:$0xff]  ;;  %v3553_v9 = vld [vmem:[%s4819_s13] ss:$0 sm:$0xff] }
0x18d2   :  { %3161 = vmatpush.msra.mxu2 %v4888_v27  ;;  %3121 = vmatpush.msrb.mxu0 %v4889_v23  ;;  %v4914_v5 = vld [vmem:[#allocation53_spill] sm:$0xff]  ;;  %v4917_v8 = vld [vmem:[#allocation16_spill] sm:$0xff] }
0x18d3   :  { %3181 = vmatpush.msra.mxu3 %v4890_v40  ;;  %3141 = vmatpush.msra.mxu1 %v4891_v21  ;;  %v4915_v4 = vld [vmem:[#allocation29_spill] sm:$0xff]  ;;  %v4918_v16 = vld [vmem:[#allocation52_spill] sm:$0xff] }
0x18d4   :  { %3162 = vmatpush.msra.mxu2 %v4892_v22  ;;  %3122 = vmatpush.msrb.mxu0 %v4893_v51  ;;  %v4919_v37 = vld [vmem:[#allocation28_spill] sm:$0xff] }
0x18d5   :  { %3182 = vmatpush.msra.mxu3 %v4894_v57  ;;  %3142 = vmatpush.msra.mxu1 %v4895_v42 }
0x18d6   :  { %3163 = vmatpush.msra.mxu2 %v4896_v20  ;;  %3123 = vmatpush.msrb.mxu0 %v4897_v3 }
0x18d7   :  { %3183 = vmatpush.msra.mxu3 %v4898_v25  ;;  %3143 = vmatpush.msra.mxu1 %v4899_v52 }
0x18d8   :  { %3164 = vmatpush.msra.mxu2 %v4900_v32  ;;  %3124 = vmatpush.msrb.mxu0 %v4901_v36 }
0x18d9   :  { %3184 = vmatpush.msra.mxu3 %v4902_v48  ;;  %3144 = vmatpush.msra.mxu1 %v4903_v59 }
0x18da   :  { %3165 = vmatpush.msra.mxu2 %v4904_v6  ;;  %3125 = vmatpush.msrb.mxu0 %v4905_v0 }
0x18db   :  { %3185 = vmatpush.msra.mxu3 %v4906_v19  ;;  %3145 = vmatpush.msra.mxu1 %v4907_v11 }
0x18dc   :  { %3166 = vmatpush.msra.mxu2 %v4908_v35  ;;  %3126 = vmatpush.msrb.mxu0 %v4909_v39 }
0x18dd   :  { %3186 = vmatpush.msra.mxu3 %v4910_v43  ;;  %3146 = vmatpush.msra.mxu1 %v4911_v7 }
0x18de   :  { %3167 = vmatpush.msra.mxu2 %v4912_v58  ;;  %3127 = vmatpush.msrb.mxu0 %v4913_v55 }
0x18df   :  { %3187 = vmatpush.msra.mxu3 %v4914_v5  ;;  %3147 = vmatpush.msra.mxu1 %v4915_v4 }
0x18e0   :  { %3168 = vmatpush.msra.mxu2 %v4916_v24  ;;  %3128 = vmatpush.msrb.mxu0 %v4917_v8 }
0x18e1   :  { %3169 = vmatmul.f32.vlgmr.msra.gmra.mxu2 %v4728_v2  ;;  %3188 = vmatpush.msra.mxu3 %v4918_v16 }
0x18e2   :  { %3129 = vmatmul.f32.vlgmr.msrb.gmra.mxu0 %v4724_v54  ;;  %3189 = vmatmul.f32.vlgmr.msra.gmra.mxu3 %v4730_v53 }
0x18e3   :  { %3148 = vmatpush.msra.mxu1 %v4919_v37 }
0x18e4   :  { %3149 = vmatmul.f32.vlgmr.msra.gmra.mxu1 %v4726_v56 }
0x195f   :  { %v3130_v17 = vpop.f32.mrf.mxu0 }
0x1960   :  { %v3131_v26 = vadd.f32 %v3553_v9, %v3130_v17 }
0x1961   :  { %v3150_v41 = vpop.f32.mrf.mxu1 }
0x1962   :  { %v3151_v10 = vadd.f32 %v3150_v41, %v3131_v26 }
0x1964   :  { %v3170_v1 = vpop.f32.mrf.mxu2 }
0x1965   :  { %v3171_v54 = vadd.f32 %v3170_v1, %v3151_v10  ;;  %v3190_v33 = vpop.f32.mrf.mxu3 }
0x1967   :  { %v3191_v18 = vadd.f32 %v3190_v33, %v3171_v54 }
0x1969   :  { %3193 = vst [vmem:[#allocation6] sm:$0xff] %v3191_v18 }
0x196a   :  { %3204 = dma.vmem_to_hbm [thread:$0]  %s3200_s1, 128, %s3202_s30, [#allocation7]  }
0x196b   :  { %3606 = dma.done.wait [#allocation7], 128  }
0x196c   :  { %3607 = vsyncadd [#allocation7], 4294967168 }
0x196d   :  { %3209 = vsyncpa [#allocation7], 1 }
0x196e   :  { %3210 = vsyncmov [#allocation5] }
0x1971   :  { %s3211_s13 = vpop.sfrf %3210 }
0x1972   :  { %p3328_p0 = scmp.ne.s32.totalorder %s3211_s13, 0 }
0x1974   :  { %3215 = shalt.err (%p3328_p0)  }
0x1975   :  { %3217 = vsyncmov [#allocation5 + $0x1] }
0x1978   :  { %s3218_s16 = vpop.sfrf %3217 }
0x1979   :  { %p3329_p1 = scmp.ne.s32.totalorder %s3218_s16, 0 }
0x197b   :  { %3222 = shalt.err (%p3329_p1)  }

</bundles_post_ra>
